<compile_context>
chip_gen: v6e
topology: v6e:2x2x1
jax: 0.10.0
libtpu: 0.0.40
codegen_flags: <defaults>
</compile_context>

<pallas_src>
import math
import jax
import jax.numpy as jnp
from jax.experimental import pallas as pl
from jax.experimental.pallas import tpu as pltpu

# ----- small, architecture-consistent config -----
B = 2
IM_H, IM_W, IM_C = 4, 4, 128      # im_feat_dim (H, W, C)
HW = IM_H * IM_W
CONV_OUT = 1024                   # hard-coded 1024-channel 1x1 conv in the module
HID = 96                          # hidden_feat_size (do NOT pad to 128 -- see review)
Q_DIM = 128                       # q_feat_dim
ANS_DIM = 256                     # ans_dim
NEG_SLOPE = 0.1                   # LeakyReLU slope
P_PIX = 8                         # pixels per grid step -> W1 tile = P_PIX*CONV_OUT = 8192 rows
assert HW % P_PIX == 0
K_IM = CONV_OUT * HW              # flattened conv-feature dim (16384)


def _leaky(x):
    return jnp.where(x > 0, x, NEG_SLOPE * x)


# ---------------------------------------------------------------------------
# Fused kernel: 1x1 conv + full MLP head in one pallas_call.
# Grid axis = pixel groups (contraction over the flattened conv features).
# ---------------------------------------------------------------------------
def fused_kernel(x_ref, wc_ref, bc_ref,
                 w1_ref, b1_ref, w2_ref, b2_ref,
                 q_ref, wq1_ref, bq1_ref, wq2_ref, bq2_ref,
                 a_ref, wa_ref, ba_ref,
                 wc1i_ref, wc1q_ref, wc1a_ref, bc1_ref,
                 wc2_ref, bc2_ref, wc3_ref, bc3_ref,
                 conv_ref, out_ref, acc_ref):
    k = pl.program_id(0)

    @pl.when(k == 0)
    def _():
        acc_ref[...] = jnp.zeros_like(acc_ref)

    # --- 1x1 conv for this pixel group: one full-width matmul ---
    # x rows are ordered (pixel, batch); channels on the lane axis.
    conv = jnp.dot(x_ref[...], wc_ref[...],
                   preferred_element_type=jnp.float32) + bc_ref[...]
    conv_ref[...] = conv.astype(conv_ref.dtype)

    # --- partial Linear(K_IM -> HID) over this pixel group ---
    # torch NCHW flatten:  im_flat @ W1 == sum_hw conv[:, hw, :] @ W1p[hw]
    # (W1p is W1 with rows pre-permuted to (hw, c) order, stored bf16).
    partial = jnp.zeros((B, HID), jnp.float32)
    for p in range(P_PIX):
        rows = conv[p * B:(p + 1) * B, :].astype(jnp.bfloat16)
        partial += jnp.dot(rows, w1_ref[p],
                           preferred_element_type=jnp.float32)
    acc_ref[...] += partial

    # --- tail of the network on the last reduction step ---
    @pl.when(k == pl.num_programs(0) - 1)
    def _():
        im_h = _leaky(acc_ref[...] + b1_ref[...])
        im_h = _leaky(jnp.dot(im_h, w2_ref[...],
                              preferred_element_type=jnp.float32) + b2_ref[...])
        q_h = _leaky(jnp.dot(q_ref[...], wq1_ref[...],
                             preferred_element_type=jnp.float32) + bq1_ref[...])
        q_h = _leaky(jnp.dot(q_h, wq2_ref[...],
                             preferred_element_type=jnp.float32) + bq2_ref[...])
        a_h = _leaky(jnp.dot(a_ref[...], wa_ref[...],
                             preferred_element_type=jnp.float32) + ba_ref[...])
        # concat([im, q, ans]) @ Wc1  ==  split matmuls summed
        c = (jnp.dot(im_h, wc1i_ref[...], preferred_element_type=jnp.float32)
             + jnp.dot(q_h, wc1q_ref[...], preferred_element_type=jnp.float32)
             + jnp.dot(a_h, wc1a_ref[...], preferred_element_type=jnp.float32)
             + bc1_ref[...])
        c = _leaky(c)
        c = _leaky(jnp.dot(c, wc2_ref[...],
                           preferred_element_type=jnp.float32) + bc2_ref[...])
        c = jnp.dot(c, wc3_ref[...],
                    preferred_element_type=jnp.float32) + bc3_ref[...]
        out_ref[...] = jax.nn.sigmoid(c).astype(out_ref.dtype)


def fused_forward_call(x_pix, q_feat, ans_scores, p):
    n_steps = HW // P_PIX
    rows_blk = P_PIX * B
    full2 = lambda k: (0, 0)
    return pl.pallas_call(
        fused_kernel,
        out_shape=(jax.ShapeDtypeStruct((HW * B, CONV_OUT), jnp.float32),
                   jax.ShapeDtypeStruct((B, 1), jnp.float32)),
        grid=(n_steps,),
        in_specs=[
            pl.BlockSpec((rows_blk, IM_C), lambda k: (k, 0)),          # x pixel-group
            pl.BlockSpec((IM_C, CONV_OUT), full2),                     # Wc (fetched once)
            pl.BlockSpec((1, CONV_OUT), full2),                        # bc
            pl.BlockSpec((P_PIX, CONV_OUT, HID), lambda k: (k, 0, 0)), # W1p tile (bf16 stream)
            pl.BlockSpec((1, HID), full2),                             # b1
            pl.BlockSpec((HID, HID), full2),                           # W2
            pl.BlockSpec((1, HID), full2),                             # b2
            pl.BlockSpec((B, Q_DIM), full2),                           # q_feat
            pl.BlockSpec((Q_DIM, HID), full2),                         # Wq1
            pl.BlockSpec((1, HID), full2),                             # bq1
            pl.BlockSpec((HID, HID), full2),                           # Wq2
            pl.BlockSpec((1, HID), full2),                             # bq2
            pl.BlockSpec((B, ANS_DIM), full2),                         # ans_scores
            pl.BlockSpec((ANS_DIM, HID), full2),                       # Wa
            pl.BlockSpec((1, HID), full2),                             # ba
            pl.BlockSpec((HID, HID), full2),                           # Wc1 (im part)
            pl.BlockSpec((HID, HID), full2),                           # Wc1 (q part)
            pl.BlockSpec((HID, HID), full2),                           # Wc1 (ans part)
            pl.BlockSpec((1, HID), full2),                             # bc1
            pl.BlockSpec((HID, HID // 2), full2),                      # Wc2
            pl.BlockSpec((1, HID // 2), full2),                        # bc2
            pl.BlockSpec((HID // 2, 1), full2),                        # Wc3
            pl.BlockSpec((1, 1), full2),                               # bc3
        ],
        out_specs=(pl.BlockSpec((rows_blk, CONV_OUT), lambda k: (k, 0)),  # conv rows (lane-dense)
                   pl.BlockSpec((B, 1), full2)),                          # wrong_pred
        scratch_shapes=[pltpu.VMEM((B, HID), jnp.float32)],
        compiler_params=pltpu.CompilerParams(
            dimension_semantics=("arbitrary",)),
    )(x_pix, p["wc"], p["bc"],
      p["w1p"], p["b1"], p["w2"], p["b2"],
      q_feat, p["wq1"], p["bq1"], p["wq2"], p["bq2"],
      ans_scores, p["wa"], p["ba"],
      p["wc1_im"], p["wc1_q"], p["wc1_a"], p["bc1"],
      p["wc2"], p["bc2"], p["wc3"], p["bc3"])


# ---------------------------------------------------------------------------
# Parameter init (deterministic, PyTorch-default-style uniform(-1/sqrt(fan_in)))
# Weights are stored (fan_in, fan_out) so the kernel computes x @ W.
# ---------------------------------------------------------------------------
def init_linear(key, fan_in, fan_out):
    kw, kb = jax.random.split(key)
    bound = 1.0 / math.sqrt(fan_in)
    w = jax.random.uniform(kw, (fan_in, fan_out), jnp.float32, -bound, bound)
    b = jax.random.uniform(kb, (1, fan_out), jnp.float32, -bound, bound)
    return w, b


def init_params(key):
    ks = jax.random.split(key, 9)
    wc, bc = init_linear(ks[0], IM_C, CONV_OUT)       # 1x1 conv == channel linear
    w1, b1 = init_linear(ks[1], K_IM, HID)            # rows in torch NCHW flatten order (c*HW + hw)
    w2, b2 = init_linear(ks[2], HID, HID)
    wq1, bq1 = init_linear(ks[3], Q_DIM, HID)
    wq2, bq2 = init_linear(ks[4], HID, HID)
    wa, ba = init_linear(ks[5], ANS_DIM, HID)
    wc1, bc1 = init_linear(ks[6], 3 * HID, HID)
    wc2, bc2 = init_linear(ks[7], HID, HID // 2)
    wc3, bc3 = init_linear(ks[8], HID // 2, 1)
    # Store W1 in bf16 (halves the dominant HBM read) and pre-permute its rows
    # from (c, hw) to (hw, c) order so the fused kernel contracts directly
    # against the NHWC-ordered conv rows kept in VMEM.
    w1_bf16 = w1.astype(jnp.bfloat16)
    w1p = jnp.transpose(w1_bf16.reshape(CONV_OUT, HW, HID), (1, 0, 2))  # (HW, C_OUT, HID)
    return dict(wc=wc, bc=bc, w1p=w1p, b1=b1, w2=w2, b2=b2,
                wq1=wq1, bq1=bq1, wq2=wq2, bq2=bq2, wa=wa, ba=ba,
                wc1_im=wc1[:HID], wc1_q=wc1[HID:2 * HID], wc1_a=wc1[2 * HID:],
                bc1=bc1, wc2=wc2, bc2=bc2, wc3=wc3, bc3=bc3)


# ---------------------------------------------------------------------------
# Full forward (tiny layout glue in plain JAX, everything else in ONE kernel)
# ---------------------------------------------------------------------------
@jax.jit
def forward(params, attention, im_feat, q_feat, ans_scores):
    del attention  # unused by the torch forward as well
    b_n, c_in, h, w = im_feat.shape
    # NCHW -> rows ordered (pixel, batch), channels last, for the 1x1-conv matmul
    x_pix = jnp.transpose(im_feat, (2, 3, 0, 1)).reshape(h * w * b_n, c_in)
    conv_rows, wrong_pred = fused_forward_call(x_pix, q_feat, ans_scores, params)
    # conv rows are (pixel, batch) ordered -> NCHW for the returned im_feature
    im_feature = jnp.transpose(
        conv_rows.reshape(h, w, b_n, CONV_OUT), (2, 3, 0, 1))
    return {"wrong_pred": wrong_pred, "im_feature": im_feature, "q_feats": q_feat}


# ---------------------------------------------------------------------------
# Pure-JAX reference for a correctness check (mirrors the bf16 W1 matmul inputs)
# ---------------------------------------------------------------------------
def forward_ref(p, attention, im_feat, q_feat, ans_scores):
    del attention
    b_n, c_in, h, w = im_feat.shape
    leaky = lambda x: jnp.where(x > 0, x, NEG_SLOPE * x)
    x_rows = jnp.transpose(im_feat, (0, 2, 3, 1)).reshape(b_n * h * w, c_in)
    conv_rows = x_rows @ p["wc"] + p["bc"]
    im_feature = jnp.transpose(conv_rows.reshape(b_n, h, w, CONV_OUT), (0, 3, 1, 2))
    im_flat = im_feature.reshape(b_n, -1)                        # torch .view(B, -1) (NCHW order)
    # canonical (c*HW + hw)-ordered W1, recovered from the kernel's permuted bf16 copy
    w1 = jnp.transpose(p["w1p"], (1, 0, 2)).reshape(K_IM, HID).astype(jnp.float32)
    im_flat_bf = im_flat.astype(jnp.bfloat16).astype(jnp.float32)  # mirror kernel's bf16 operands
    im_h = leaky(im_flat_bf @ w1 + p["b1"])
    im_h = leaky(im_h @ p["w2"] + p["b2"])
    q_h = leaky(leaky(q_feat @ p["wq1"] + p["bq1"]) @ p["wq2"] + p["bq2"])
    a_h = leaky(ans_scores @ p["wa"] + p["ba"])
    cat = jnp.concatenate([im_h, q_h, a_h], axis=1)
    wc1 = jnp.concatenate([p["wc1_im"], p["wc1_q"], p["wc1_a"]], axis=0)
    c = leaky(cat @ wc1 + p["bc1"])
    c = leaky(c @ p["wc2"] + p["bc2"])
    c = jax.nn.sigmoid(c @ p["wc3"] + p["bc3"])
    return {"wrong_pred": c, "im_feature": im_feature, "q_feats": q_feat}


if __name__ == "__main__":
    key = jax.random.PRNGKey(0)
    k_att, k_im, k_q, k_ans = jax.random.split(key, 4)
    attention = jax.random.normal(k_att, (B, 1, IM_H, IM_W), jnp.float32)
    im_feat = jax.random.normal(k_im, (B, IM_C, IM_H, IM_W), jnp.float32)
    q_feat = jax.random.normal(k_q, (B, Q_DIM), jnp.float32)
    ans_scores = jax.random.normal(k_ans, (B, ANS_DIM), jnp.float32)

    params = init_params(jax.random.PRNGKey(42))

    out = forward(params, attention, im_feat, q_feat, ans_scores)
    out = jax.block_until_ready(out)

    ref = forward_ref(params, attention, im_feat, q_feat, ans_scores)
    assert out["wrong_pred"].shape == (B, 1)
    assert out["im_feature"].shape == (B, CONV_OUT, IM_H, IM_W)
    assert out["q_feats"].shape == (B, Q_DIM)
    assert jnp.allclose(out["im_feature"], ref["im_feature"], rtol=1e-4, atol=1e-4)
    assert jnp.allclose(out["wrong_pred"], ref["wrong_pred"], rtol=1e-4, atol=1e-4)
    assert jnp.array_equal(out["q_feats"], q_feat)

    print("KERNEL_OK")
</pallas_src>

<mosaic_0001>
module attributes {stable_mosaic.version = 11 : i64} {
  func.func @fused_kernel(%arg0: i32, %arg1: memref<16x128xf32, #tpu.memory_space<vmem>>, %arg2: memref<128x1024xf32, #tpu.memory_space<vmem>>, %arg3: memref<1x1024xf32, #tpu.memory_space<vmem>>, %arg4: memref<8x1024x96xbf16, #tpu.memory_space<vmem>>, %arg5: memref<1x96xf32, #tpu.memory_space<vmem>>, %arg6: memref<96x96xf32, #tpu.memory_space<vmem>>, %arg7: memref<1x96xf32, #tpu.memory_space<vmem>>, %arg8: memref<2x128xf32, #tpu.memory_space<vmem>>, %arg9: memref<128x96xf32, #tpu.memory_space<vmem>>, %arg10: memref<1x96xf32, #tpu.memory_space<vmem>>, %arg11: memref<96x96xf32, #tpu.memory_space<vmem>>, %arg12: memref<1x96xf32, #tpu.memory_space<vmem>>, %arg13: memref<2x256xf32, #tpu.memory_space<vmem>>, %arg14: memref<256x96xf32, #tpu.memory_space<vmem>>, %arg15: memref<1x96xf32, #tpu.memory_space<vmem>>, %arg16: memref<96x96xf32, #tpu.memory_space<vmem>>, %arg17: memref<96x96xf32, #tpu.memory_space<vmem>>, %arg18: memref<96x96xf32, #tpu.memory_space<vmem>>, %arg19: memref<1x96xf32, #tpu.memory_space<vmem>>, %arg20: memref<96x48xf32, #tpu.memory_space<vmem>>, %arg21: memref<1x48xf32, #tpu.memory_space<vmem>>, %arg22: memref<48x1xf32, #tpu.memory_space<vmem>>, %arg23: memref<1x1xf32, #tpu.memory_space<vmem>>, %arg24: memref<16x1024xf32, #tpu.memory_space<vmem>>, %arg25: memref<2x1xf32, #tpu.memory_space<vmem>>, %arg26: memref<2x96xf32, #tpu.memory_space<vmem>>) attributes {dimension_semantics = [#tpu.dimension_semantics<arbitrary>], iteration_bounds = array<i64: 2>, scalar_prefetch = 0 : i64, scratch_operands = 1 : i64, tpu.core_type = #tpu.core_type<tc>, window_params = [{transform_indices = @transform_0, window_bounds = array<i64: 16, 128>}, {pipeline_mode = #tpu.pipeline_mode<synchronous>, transform_indices = @transform_1, window_bounds = array<i64: 128, 1024>}, {pipeline_mode = #tpu.pipeline_mode<synchronous>, transform_indices = @transform_2, window_bounds = array<i64: 1, 1024>}, {transform_indices = @transform_3, window_bounds = array<i64: 8, 1024, 96>}, {pipeline_mode = #tpu.pipeline_mode<synchronous>, transform_indices = @transform_4, window_bounds = array<i64: 1, 96>}, {pipeline_mode = #tpu.pipeline_mode<synchronous>, transform_indices = @transform_5, window_bounds = array<i64: 96, 96>}, {pipeline_mode = #tpu.pipeline_mode<synchronous>, transform_indices = @transform_6, window_bounds = array<i64: 1, 96>}, {pipeline_mode = #tpu.pipeline_mode<synchronous>, transform_indices = @transform_7, window_bounds = array<i64: 2, 128>}, {pipeline_mode = #tpu.pipeline_mode<synchronous>, transform_indices = @transform_8, window_bounds = array<i64: 128, 96>}, {pipeline_mode = #tpu.pipeline_mode<synchronous>, transform_indices = @transform_9, window_bounds = array<i64: 1, 96>}, {pipeline_mode = #tpu.pipeline_mode<synchronous>, transform_indices = @transform_10, window_bounds = array<i64: 96, 96>}, {pipeline_mode = #tpu.pipeline_mode<synchronous>, transform_indices = @transform_11, window_bounds = array<i64: 1, 96>}, {pipeline_mode = #tpu.pipeline_mode<synchronous>, transform_indices = @transform_12, window_bounds = array<i64: 2, 256>}, {pipeline_mode = #tpu.pipeline_mode<synchronous>, transform_indices = @transform_13, window_bounds = array<i64: 256, 96>}, {pipeline_mode = #tpu.pipeline_mode<synchronous>, transform_indices = @transform_14, window_bounds = array<i64: 1, 96>}, {pipeline_mode = #tpu.pipeline_mode<synchronous>, transform_indices = @transform_15, window_bounds = array<i64: 96, 96>}, {pipeline_mode = #tpu.pipeline_mode<synchronous>, transform_indices = @transform_16, window_bounds = array<i64: 96, 96>}, {pipeline_mode = #tpu.pipeline_mode<synchronous>, transform_indices = @transform_17, window_bounds = array<i64: 96, 96>}, {pipeline_mode = #tpu.pipeline_mode<synchronous>, transform_indices = @transform_18, window_bounds = array<i64: 1, 96>}, {pipeline_mode = #tpu.pipeline_mode<synchronous>, transform_indices = @transform_19, window_bounds = array<i64: 96, 48>}, {pipeline_mode = #tpu.pipeline_mode<synchronous>, transform_indices = @transform_20, window_bounds = array<i64: 1, 48>}, {pipeline_mode = #tpu.pipeline_mode<synchronous>, transform_indices = @transform_21, window_bounds = array<i64: 48, 1>}, {pipeline_mode = #tpu.pipeline_mode<synchronous>, transform_indices = @transform_22, window_bounds = array<i64: 1, 1>}, {transform_indices = @transform_23, window_bounds = array<i64: 16, 1024>}, {pipeline_mode = #tpu.pipeline_mode<synchronous>, transform_indices = @transform_24, window_bounds = array<i64: 2, 1>}]} {
    %c0_i32 = arith.constant 0 : i32
    %0 = arith.cmpi eq, %arg0, %c0_i32 : i32
    %1 = arith.extui %0 : i1 to i32
    %c0_i32_0 = arith.constant 0 : i32
    %2 = arith.cmpi ne, %1, %c0_i32_0 : i32
    scf.if %2 {
      %cst_39 = arith.constant 0.000000e+00 : f32
      %65 = vector.broadcast %cst_39 : f32 to vector<2x96xf32>
      %c0_40 = arith.constant 0 : index
      %c0_41 = arith.constant 0 : index
      %66 = vector.load %arg26[%c0_40, %c0_41] : memref<2x96xf32, #tpu.memory_space<vmem>>, vector<2x96xf32>
      tpu.vector_store %arg26[%c0_40, %c0_41], %65 {strides = array<i32>} : memref<2x96xf32, #tpu.memory_space<vmem>>, vector<2x96xf32>,
    } else {
    }
    %c0 = arith.constant 0 : index
    %c0_1 = arith.constant 0 : index
    %3 = vector.load %arg1[%c0, %c0_1] : memref<16x128xf32, #tpu.memory_space<vmem>>, vector<16x128xf32>
    %c0_2 = arith.constant 0 : index
    %c0_3 = arith.constant 0 : index
    %4 = vector.load %arg2[%c0_2, %c0_3] : memref<128x1024xf32, #tpu.memory_space<vmem>>, vector<128x1024xf32>
    %cst = arith.constant dense<0.000000e+00> : vector<16x1024xf32>
    %5 = tpu.matmul %3, %4, %cst {dimension_numbers = #tpu.dot_dimension_numbers<[1], [0], [0], [1], [0, 0, 1, 1], [], []>} : vector<16x128xf32>, vector<128x1024xf32>, vector<16x1024xf32> -> vector<16x1024xf32>
    %c0_4 = arith.constant 0 : index
    %c0_5 = arith.constant 0 : index
    %6 = vector.load %arg3[%c0_4, %c0_5] : memref<1x1024xf32, #tpu.memory_space<vmem>>, vector<1x1024xf32>
    %7 = vector.broadcast %6 : vector<1x1024xf32> to vector<16x1024xf32>
    %8 = arith.addf %5, %7 : vector<16x1024xf32>
    %c0_6 = arith.constant 0 : index
    %c0_7 = arith.constant 0 : index
    %9 = vector.load %arg24[%c0_6, %c0_7] : memref<16x1024xf32, #tpu.memory_space<vmem>>, vector<16x1024xf32>
    tpu.vector_store %arg24[%c0_6, %c0_7], %8 {strides = array<i32>} : memref<16x1024xf32, #tpu.memory_space<vmem>>, vector<16x1024xf32>,
    %cst_8 = arith.constant 0.000000e+00 : f32
    %10 = vector.broadcast %cst_8 : f32 to vector<2x96xf32>
    %11 = vector.extract_strided_slice %8 {offsets = [0, 0], sizes = [2, 1024], strides = [1, 1]} : vector<16x1024xf32> to vector<2x1024xf32>
    %12 = arith.truncf %11 : vector<2x1024xf32> to vector<2x1024xbf16>
    %c0_9 = arith.constant 0 : index
    %c0_10 = arith.constant 0 : index
    %c0_11 = arith.constant 0 : index
    %13 = vector.load %arg4[%c0_9, %c0_10, %c0_11] : memref<8x1024x96xbf16, #tpu.memory_space<vmem>>, vector<1x1024x96xbf16>
    %14 = vector.shape_cast %13 : vector<1x1024x96xbf16> to vector<1024x96xbf16>
    %cst_12 = arith.constant dense<0.000000e+00> : vector<2x96xf32>
    %15 = tpu.matmul %12, %14, %cst_12 {dimension_numbers = #tpu.dot_dimension_numbers<[1], [0], [0], [1], [0, 0, 1, 1], [], []>} : vector<2x1024xbf16>, vector<1024x96xbf16>, vector<2x96xf32> -> vector<2x96xf32>
    %16 = arith.addf %10, %15 : vector<2x96xf32>
    %17 = vector.extract_strided_slice %8 {offsets = [2, 0], sizes = [2, 1024], strides = [1, 1]} : vector<16x1024xf32> to vector<2x1024xf32>
    %18 = arith.truncf %17 : vector<2x1024xf32> to vector<2x1024xbf16>
    %c1 = arith.constant 1 : index
    %c0_13 = arith.constant 0 : index
    %c0_14 = arith.constant 0 : index
    %19 = vector.load %arg4[%c1, %c0_13, %c0_14] : memref<8x1024x96xbf16, #tpu.memory_space<vmem>>, vector<1x1024x96xbf16>
    %20 = vector.shape_cast %19 : vector<1x1024x96xbf16> to vector<1024x96xbf16>
    %cst_15 = arith.constant dense<0.000000e+00> : vector<2x96xf32>
    %21 = tpu.matmul %18, %20, %cst_15 {dimension_numbers = #tpu.dot_dimension_numbers<[1], [0], [0], [1], [0, 0, 1, 1], [], []>} : vector<2x1024xbf16>, vector<1024x96xbf16>, vector<2x96xf32> -> vector<2x96xf32>
    %22 = arith.addf %16, %21 : vector<2x96xf32>
    %23 = vector.extract_strided_slice %8 {offsets = [4, 0], sizes = [2, 1024], strides = [1, 1]} : vector<16x1024xf32> to vector<2x1024xf32>
    %24 = arith.truncf %23 : vector<2x1024xf32> to vector<2x1024xbf16>
    %c2 = arith.constant 2 : index
    %c0_16 = arith.constant 0 : index
    %c0_17 = arith.constant 0 : index
    %25 = vector.load %arg4[%c2, %c0_16, %c0_17] : memref<8x1024x96xbf16, #tpu.memory_space<vmem>>, vector<1x1024x96xbf16>
    %26 = vector.shape_cast %25 : vector<1x1024x96xbf16> to vector<1024x96xbf16>
    %cst_18 = arith.constant dense<0.000000e+00> : vector<2x96xf32>
    %27 = tpu.matmul %24, %26, %cst_18 {dimension_numbers = #tpu.dot_dimension_numbers<[1], [0], [0], [1], [0, 0, 1, 1], [], []>} : vector<2x1024xbf16>, vector<1024x96xbf16>, vector<2x96xf32> -> vector<2x96xf32>
    %28 = arith.addf %22, %27 : vector<2x96xf32>
    %29 = vector.extract_strided_slice %8 {offsets = [6, 0], sizes = [2, 1024], strides = [1, 1]} : vector<16x1024xf32> to vector<2x1024xf32>
    %30 = arith.truncf %29 : vector<2x1024xf32> to vector<2x1024xbf16>
    %c3 = arith.constant 3 : index
    %c0_19 = arith.constant 0 : index
    %c0_20 = arith.constant 0 : index
    %31 = vector.load %arg4[%c3, %c0_19, %c0_20] : memref<8x1024x96xbf16, #tpu.memory_space<vmem>>, vector<1x1024x96xbf16>
    %32 = vector.shape_cast %31 : vector<1x1024x96xbf16> to vector<1024x96xbf16>
    %cst_21 = arith.constant dense<0.000000e+00> : vector<2x96xf32>
    %33 = tpu.matmul %30, %32, %cst_21 {dimension_numbers = #tpu.dot_dimension_numbers<[1], [0], [0], [1], [0, 0, 1, 1], [], []>} : vector<2x1024xbf16>, vector<1024x96xbf16>, vector<2x96xf32> -> vector<2x96xf32>
    %34 = arith.addf %28, %33 : vector<2x96xf32>
    %35 = vector.extract_strided_slice %8 {offsets = [8, 0], sizes = [2, 1024], strides = [1, 1]} : vector<16x1024xf32> to vector<2x1024xf32>
    %36 = arith.truncf %35 : vector<2x1024xf32> to vector<2x1024xbf16>
    %c4 = arith.constant 4 : index
    %c0_22 = arith.constant 0 : index
    %c0_23 = arith.constant 0 : index
    %37 = vector.load %arg4[%c4, %c0_22, %c0_23] : memref<8x1024x96xbf16, #tpu.memory_space<vmem>>, vector<1x1024x96xbf16>
    %38 = vector.shape_cast %37 : vector<1x1024x96xbf16> to vector<1024x96xbf16>
    %cst_24 = arith.constant dense<0.000000e+00> : vector<2x96xf32>
    %39 = tpu.matmul %36, %38, %cst_24 {dimension_numbers = #tpu.dot_dimension_numbers<[1], [0], [0], [1], [0, 0, 1, 1], [], []>} : vector<2x1024xbf16>, vector<1024x96xbf16>, vector<2x96xf32> -> vector<2x96xf32>
    %40 = arith.addf %34, %39 : vector<2x96xf32>
    %41 = vector.extract_strided_slice %8 {offsets = [10, 0], sizes = [2, 1024], strides = [1, 1]} : vector<16x1024xf32> to vector<2x1024xf32>
    %42 = arith.truncf %41 : vector<2x1024xf32> to vector<2x1024xbf16>
    %c5 = arith.constant 5 : index
    %c0_25 = arith.constant 0 : index
    %c0_26 = arith.constant 0 : index
    %43 = vector.load %arg4[%c5, %c0_25, %c0_26] : memref<8x1024x96xbf16, #tpu.memory_space<vmem>>, vector<1x1024x96xbf16>
    %44 = vector.shape_cast %43 : vector<1x1024x96xbf16> to vector<1024x96xbf16>
    %cst_27 = arith.constant dense<0.000000e+00> : vector<2x96xf32>
    %45 = tpu.matmul %42, %44, %cst_27 {dimension_numbers = #tpu.dot_dimension_numbers<[1], [0], [0], [1], [0, 0, 1, 1], [], []>} : vector<2x1024xbf16>, vector<1024x96xbf16>, vector<2x96xf32> -> vector<2x96xf32>
    %46 = arith.addf %40, %45 : vector<2x96xf32>
    %47 = vector.extract_strided_slice %8 {offsets = [12, 0], sizes = [2, 1024], strides = [1, 1]} : vector<16x1024xf32> to vector<2x1024xf32>
    %48 = arith.truncf %47 : vector<2x1024xf32> to vector<2x1024xbf16>
    %c6 = arith.constant 6 : index
    %c0_28 = arith.constant 0 : index
    %c0_29 = arith.constant 0 : index
    %49 = vector.load %arg4[%c6, %c0_28, %c0_29] : memref<8x1024x96xbf16, #tpu.memory_space<vmem>>, vector<1x1024x96xbf16>
    %50 = vector.shape_cast %49 : vector<1x1024x96xbf16> to vector<1024x96xbf16>
    %cst_30 = arith.constant dense<0.000000e+00> : vector<2x96xf32>
    %51 = tpu.matmul %48, %50, %cst_30 {dimension_numbers = #tpu.dot_dimension_numbers<[1], [0], [0], [1], [0, 0, 1, 1], [], []>} : vector<2x1024xbf16>, vector<1024x96xbf16>, vector<2x96xf32> -> vector<2x96xf32>
    %52 = arith.addf %46, %51 : vector<2x96xf32>
    %53 = vector.extract_strided_slice %8 {offsets = [14, 0], sizes = [2, 1024], strides = [1, 1]} : vector<16x1024xf32> to vector<2x1024xf32>
    %54 = arith.truncf %53 : vector<2x1024xf32> to vector<2x1024xbf16>
    %c7 = arith.constant 7 : index
    %c0_31 = arith.constant 0 : index
    %c0_32 = arith.constant 0 : index
    %55 = vector.load %arg4[%c7, %c0_31, %c0_32] : memref<8x1024x96xbf16, #tpu.memory_space<vmem>>, vector<1x1024x96xbf16>
    %56 = vector.shape_cast %55 : vector<1x1024x96xbf16> to vector<1024x96xbf16>
    %cst_33 = arith.constant dense<0.000000e+00> : vector<2x96xf32>
    %57 = tpu.matmul %54, %56, %cst_33 {dimension_numbers = #tpu.dot_dimension_numbers<[1], [0], [0], [1], [0, 0, 1, 1], [], []>} : vector<2x1024xbf16>, vector<1024x96xbf16>, vector<2x96xf32> -> vector<2x96xf32>
    %58 = arith.addf %52, %57 : vector<2x96xf32>
    %c0_34 = arith.constant 0 : index
    %c0_35 = arith.constant 0 : index
    %59 = vector.load %arg26[%c0_34, %c0_35] : memref<2x96xf32, #tpu.memory_space<vmem>>, vector<2x96xf32>
    %60 = arith.addf %59, %58 : vector<2x96xf32>
    %c0_36 = arith.constant 0 : index
    %c0_37 = arith.constant 0 : index
    %61 = vector.load %arg26[%c0_36, %c0_37] : memref<2x96xf32, #tpu.memory_space<vmem>>, vector<2x96xf32>
    tpu.vector_store %arg26[%c0_36, %c0_37], %60 {strides = array<i32>} : memref<2x96xf32, #tpu.memory_space<vmem>>, vector<2x96xf32>,
    %c1_i32 = arith.constant 1 : i32
    %62 = arith.cmpi eq, %arg0, %c1_i32 : i32
    %63 = arith.extui %62 : i1 to i32
    %c0_i32_38 = arith.constant 0 : i32
    %64 = arith.cmpi ne, %63, %c0_i32_38 : i32
    scf.if %64 {
      %c0_39 = arith.constant 0 : index
      %c0_40 = arith.constant 0 : index
      %65 = vector.load %arg26[%c0_39, %c0_40] : memref<2x96xf32, #tpu.memory_space<vmem>>, vector<2x96xf32>
      %c0_41 = arith.constant 0 : index
      %c0_42 = arith.constant 0 : index
      %66 = vector.load %arg5[%c0_41, %c0_42] : memref<1x96xf32, #tpu.memory_space<vmem>>, vector<1x96xf32>
      %67 = vector.broadcast %66 : vector<1x96xf32> to vector<2x96xf32>
      %68 = arith.addf %65, %67 : vector<2x96xf32>
      %cst_43 = arith.constant 0.000000e+00 : f32
      %69 = vector.broadcast %cst_43 : f32 to vector<2x96xf32>
      %70 = arith.cmpf ogt, %68, %69 : vector<2x96xf32>
      %cst_44 = arith.constant 1.000000e-01 : f32
      %71 = vector.broadcast %cst_44 : f32 to vector<2x96xf32>
      %72 = arith.mulf %71, %68 : vector<2x96xf32>
      %73 = arith.select %70, %68, %72 : vector<2x96xi1>, vector<2x96xf32>
      %c0_45 = arith.constant 0 : index
      %c0_46 = arith.constant 0 : index
      %74 = vector.load %arg6[%c0_45, %c0_46] : memref<96x96xf32, #tpu.memory_space<vmem>>, vector<96x96xf32>
      %cst_47 = arith.constant dense<0.000000e+00> : vector<2x96xf32>
      %75 = tpu.matmul %73, %74, %cst_47 {dimension_numbers = #tpu.dot_dimension_numbers<[1], [0], [0], [1], [0, 0, 1, 1], [], []>} : vector<2x96xf32>, vector<96x96xf32>, vector<2x96xf32> -> vector<2x96xf32>
      %c0_48 = arith.constant 0 : index
      %c0_49 = arith.constant 0 : index
      %76 = vector.load %arg7[%c0_48, %c0_49] : memref<1x96xf32, #tpu.memory_space<vmem>>, vector<1x96xf32>
      %77 = vector.broadcast %76 : vector<1x96xf32> to vector<2x96xf32>
      %78 = arith.addf %75, %77 : vector<2x96xf32>
      %cst_50 = arith.constant 0.000000e+00 : f32
      %79 = vector.broadcast %cst_50 : f32 to vector<2x96xf32>
      %80 = arith.cmpf ogt, %78, %79 : vector<2x96xf32>
      %cst_51 = arith.constant 1.000000e-01 : f32
      %81 = vector.broadcast %cst_51 : f32 to vector<2x96xf32>
      %82 = arith.mulf %81, %78 : vector<2x96xf32>
      %83 = arith.select %80, %78, %82 : vector<2x96xi1>, vector<2x96xf32>
      %c0_52 = arith.constant 0 : index
      %c0_53 = arith.constant 0 : index
      %84 = vector.load %arg8[%c0_52, %c0_53] : memref<2x128xf32, #tpu.memory_space<vmem>>, vector<2x128xf32>
      %c0_54 = arith.constant 0 : index
      %c0_55 = arith.constant 0 : index
      %85 = vector.load %arg9[%c0_54, %c0_55] : memref<128x96xf32, #tpu.memory_space<vmem>>, vector<128x96xf32>
      %cst_56 = arith.constant dense<0.000000e+00> : vector<2x96xf32>
      %86 = tpu.matmul %84, %85, %cst_56 {dimension_numbers = #tpu.dot_dimension_numbers<[1], [0], [0], [1], [0, 0, 1, 1], [], []>} : vector<2x128xf32>, vector<128x96xf32>, vector<2x96xf32> -> vector<2x96xf32>
      %c0_57 = arith.constant 0 : index
      %c0_58 = arith.constant 0 : index
      %87 = vector.load %arg10[%c0_57, %c0_58] : memref<1x96xf32, #tpu.memory_space<vmem>>, vector<1x96xf32>
      %88 = vector.broadcast %87 : vector<1x96xf32> to vector<2x96xf32>
      %89 = arith.addf %86, %88 : vector<2x96xf32>
      %cst_59 = arith.constant 0.000000e+00 : f32
      %90 = vector.broadcast %cst_59 : f32 to vector<2x96xf32>
      %91 = arith.cmpf ogt, %89, %90 : vector<2x96xf32>
      %cst_60 = arith.constant 1.000000e-01 : f32
      %92 = vector.broadcast %cst_60 : f32 to vector<2x96xf32>
      %93 = arith.mulf %92, %89 : vector<2x96xf32>
      %94 = arith.select %91, %89, %93 : vector<2x96xi1>, vector<2x96xf32>
      %c0_61 = arith.constant 0 : index
      %c0_62 = arith.constant 0 : index
      %95 = vector.load %arg11[%c0_61, %c0_62] : memref<96x96xf32, #tpu.memory_space<vmem>>, vector<96x96xf32>
      %cst_63 = arith.constant dense<0.000000e+00> : vector<2x96xf32>
      %96 = tpu.matmul %94, %95, %cst_63 {dimension_numbers = #tpu.dot_dimension_numbers<[1], [0], [0], [1], [0, 0, 1, 1], [], []>} : vector<2x96xf32>, vector<96x96xf32>, vector<2x96xf32> -> vector<2x96xf32>
      %c0_64 = arith.constant 0 : index
      %c0_65 = arith.constant 0 : index
      %97 = vector.load %arg12[%c0_64, %c0_65] : memref<1x96xf32, #tpu.memory_space<vmem>>, vector<1x96xf32>
      %98 = vector.broadcast %97 : vector<1x96xf32> to vector<2x96xf32>
      %99 = arith.addf %96, %98 : vector<2x96xf32>
      %cst_66 = arith.constant 0.000000e+00 : f32
      %100 = vector.broadcast %cst_66 : f32 to vector<2x96xf32>
      %101 = arith.cmpf ogt, %99, %100 : vector<2x96xf32>
      %cst_67 = arith.constant 1.000000e-01 : f32
      %102 = vector.broadcast %cst_67 : f32 to vector<2x96xf32>
      %103 = arith.mulf %102, %99 : vector<2x96xf32>
      %104 = arith.select %101, %99, %103 : vector<2x96xi1>, vector<2x96xf32>
      %c0_68 = arith.constant 0 : index
      %c0_69 = arith.constant 0 : index
      %105 = vector.load %arg13[%c0_68, %c0_69] : memref<2x256xf32, #tpu.memory_space<vmem>>, vector<2x256xf32>
      %c0_70 = arith.constant 0 : index
      %c0_71 = arith.constant 0 : index
      %106 = vector.load %arg14[%c0_70, %c0_71] : memref<256x96xf32, #tpu.memory_space<vmem>>, vector<256x96xf32>
      %cst_72 = arith.constant dense<0.000000e+00> : vector<2x96xf32>
      %107 = tpu.matmul %105, %106, %cst_72 {dimension_numbers = #tpu.dot_dimension_numbers<[1], [0], [0], [1], [0, 0, 1, 1], [], []>} : vector<2x256xf32>, vector<256x96xf32>, vector<2x96xf32> -> vector<2x96xf32>
      %c0_73 = arith.constant 0 : index
      %c0_74 = arith.constant 0 : index
      %108 = vector.load %arg15[%c0_73, %c0_74] : memref<1x96xf32, #tpu.memory_space<vmem>>, vector<1x96xf32>
      %109 = vector.broadcast %108 : vector<1x96xf32> to vector<2x96xf32>
      %110 = arith.addf %107, %109 : vector<2x96xf32>
      %cst_75 = arith.constant 0.000000e+00 : f32
      %111 = vector.broadcast %cst_75 : f32 to vector<2x96xf32>
      %112 = arith.cmpf ogt, %110, %111 : vector<2x96xf32>
      %cst_76 = arith.constant 1.000000e-01 : f32
      %113 = vector.broadcast %cst_76 : f32 to vector<2x96xf32>
      %114 = arith.mulf %113, %110 : vector<2x96xf32>
      %115 = arith.select %112, %110, %114 : vector<2x96xi1>, vector<2x96xf32>
      %c0_77 = arith.constant 0 : index
      %c0_78 = arith.constant 0 : index
      %116 = vector.load %arg16[%c0_77, %c0_78] : memref<96x96xf32, #tpu.memory_space<vmem>>, vector<96x96xf32>
      %cst_79 = arith.constant dense<0.000000e+00> : vector<2x96xf32>
      %117 = tpu.matmul %83, %116, %cst_79 {dimension_numbers = #tpu.dot_dimension_numbers<[1], [0], [0], [1], [0, 0, 1, 1], [], []>} : vector<2x96xf32>, vector<96x96xf32>, vector<2x96xf32> -> vector<2x96xf32>
      %c0_80 = arith.constant 0 : index
      %c0_81 = arith.constant 0 : index
      %118 = vector.load %arg17[%c0_80, %c0_81] : memref<96x96xf32, #tpu.memory_space<vmem>>, vector<96x96xf32>
      %cst_82 = arith.constant dense<0.000000e+00> : vector<2x96xf32>
      %119 = tpu.matmul %104, %118, %cst_82 {dimension_numbers = #tpu.dot_dimension_numbers<[1], [0], [0], [1], [0, 0, 1, 1], [], []>} : vector<2x96xf32>, vector<96x96xf32>, vector<2x96xf32> -> vector<2x96xf32>
      %120 = arith.addf %117, %119 : vector<2x96xf32>
      %c0_83 = arith.constant 0 : index
      %c0_84 = arith.constant 0 : index
      %121 = vector.load %arg18[%c0_83, %c0_84] : memref<96x96xf32, #tpu.memory_space<vmem>>, vector<96x96xf32>
      %cst_85 = arith.constant dense<0.000000e+00> : vector<2x96xf32>
      %122 = tpu.matmul %115, %121, %cst_85 {dimension_numbers = #tpu.dot_dimension_numbers<[1], [0], [0], [1], [0, 0, 1, 1], [], []>} : vector<2x96xf32>, vector<96x96xf32>, vector<2x96xf32> -> vector<2x96xf32>
      %123 = arith.addf %120, %122 : vector<2x96xf32>
      %c0_86 = arith.constant 0 : index
      %c0_87 = arith.constant 0 : index
      %124 = vector.load %arg19[%c0_86, %c0_87] : memref<1x96xf32, #tpu.memory_space<vmem>>, vector<1x96xf32>
      %125 = vector.broadcast %124 : vector<1x96xf32> to vector<2x96xf32>
      %126 = arith.addf %123, %125 : vector<2x96xf32>
      %cst_88 = arith.constant 0.000000e+00 : f32
      %127 = vector.broadcast %cst_88 : f32 to vector<2x96xf32>
      %128 = arith.cmpf ogt, %126, %127 : vector<2x96xf32>
      %cst_89 = arith.constant 1.000000e-01 : f32
      %129 = vector.broadcast %cst_89 : f32 to vector<2x96xf32>
      %130 = arith.mulf %129, %126 : vector<2x96xf32>
      %131 = arith.select %128, %126, %130 : vector<2x96xi1>, vector<2x96xf32>
      %c0_90 = arith.constant 0 : index
      %c0_91 = arith.constant 0 : index
      %132 = vector.load %arg20[%c0_90, %c0_91] : memref<96x48xf32, #tpu.memory_space<vmem>>, vector<96x48xf32>
      %cst_92 = arith.constant dense<0.000000e+00> : vector<2x48xf32>
      %133 = tpu.matmul %131, %132, %cst_92 {dimension_numbers = #tpu.dot_dimension_numbers<[1], [0], [0], [1], [0, 0, 1, 1], [], []>} : vector<2x96xf32>, vector<96x48xf32>, vector<2x48xf32> -> vector<2x48xf32>
      %c0_93 = arith.constant 0 : index
      %c0_94 = arith.constant 0 : index
      %134 = vector.load %arg21[%c0_93, %c0_94] : memref<1x48xf32, #tpu.memory_space<vmem>>, vector<1x48xf32>
      %135 = vector.broadcast %134 : vector<1x48xf32> to vector<2x48xf32>
      %136 = arith.addf %133, %135 : vector<2x48xf32>
      %cst_95 = arith.constant 0.000000e+00 : f32
      %137 = vector.broadcast %cst_95 : f32 to vector<2x48xf32>
      %138 = arith.cmpf ogt, %136, %137 : vector<2x48xf32>
      %cst_96 = arith.constant 1.000000e-01 : f32
      %139 = vector.broadcast %cst_96 : f32 to vector<2x48xf32>
      %140 = arith.mulf %139, %136 : vector<2x48xf32>
      %141 = arith.select %138, %136, %140 : vector<2x48xi1>, vector<2x48xf32>
      %c0_97 = arith.constant 0 : index
      %c0_98 = arith.constant 0 : index
      %142 = vector.load %arg22[%c0_97, %c0_98] : memref<48x1xf32, #tpu.memory_space<vmem>>, vector<48x1xf32>
      %cst_99 = arith.constant dense<0.000000e+00> : vector<2x1xf32>
      %143 = tpu.matmul %141, %142, %cst_99 {dimension_numbers = #tpu.dot_dimension_numbers<[1], [0], [0], [1], [0, 0, 1, 1], [], []>} : vector<2x48xf32>, vector<48x1xf32>, vector<2x1xf32> -> vector<2x1xf32>
      %c0_100 = arith.constant 0 : index
      %c0_101 = arith.constant 0 : index
      %144 = vector.load %arg23[%c0_100, %c0_101] : memref<1x1xf32, #tpu.memory_space<vmem>>, vector<1x1xf32>
      %145 = vector.broadcast %144 : vector<1x1xf32> to vector<2x1xf32>
      %146 = arith.addf %143, %145 : vector<2x1xf32>
      %147 = arith.negf %146 : vector<2x1xf32>
      %148 = math.exp %147 : vector<2x1xf32>
      %cst_102 = arith.constant 1.000000e+00 : f32
      %149 = vector.broadcast %cst_102 : f32 to vector<2x1xf32>
      %150 = arith.addf %149, %148 : vector<2x1xf32>
      %151 = arith.divf %149, %150 : vector<2x1xf32>
      %c0_103 = arith.constant 0 : index
      %c0_104 = arith.constant 0 : index
      %152 = vector.load %arg25[%c0_103, %c0_104] : memref<2x1xf32, #tpu.memory_space<vmem>>, vector<2x1xf32>
      tpu.vector_store %arg25[%c0_103, %c0_104], %151 {strides = array<i32>} : memref<2x1xf32, #tpu.memory_space<vmem>>, vector<2x1xf32>,
    } else {
    }
    return
  }
  func.func @transform_0(%arg0: i32) -> (i32, i32) {
    %c0_i32 = arith.constant 0 : i32
    %c0_i32_0 = arith.constant 0 : i32
    return %arg0, %c0_i32 : i32, i32
  }
  func.func @transform_1(%arg0: i32) -> (i32, i32) {
    %c0_i32 = arith.constant 0 : i32
    %c0_i32_0 = arith.constant 0 : i32
    %c0_i32_1 = arith.constant 0 : i32
    return %c0_i32, %c0_i32_0 : i32, i32
  }
  func.func @transform_2(%arg0: i32) -> (i32, i32) {
    %c0_i32 = arith.constant 0 : i32
    %c0_i32_0 = arith.constant 0 : i32
    %c0_i32_1 = arith.constant 0 : i32
    return %c0_i32, %c0_i32_0 : i32, i32
  }
  func.func @transform_3(%arg0: i32) -> (i32, i32, i32) {
    %c0_i32 = arith.constant 0 : i32
    %c0_i32_0 = arith.constant 0 : i32
    %c0_i32_1 = arith.constant 0 : i32
    return %arg0, %c0_i32, %c0_i32_0 : i32, i32, i32
  }
  func.func @transform_4(%arg0: i32) -> (i32, i32) {
    %c0_i32 = arith.constant 0 : i32
    %c0_i32_0 = arith.constant 0 : i32
    %c0_i32_1 = arith.constant 0 : i32
    return %c0_i32, %c0_i32_0 : i32, i32
  }
  func.func @transform_5(%arg0: i32) -> (i32, i32) {
    %c0_i32 = arith.constant 0 : i32
    %c0_i32_0 = arith.constant 0 : i32
    %c0_i32_1 = arith.constant 0 : i32
    return %c0_i32, %c0_i32_0 : i32, i32
  }
  func.func @transform_6(%arg0: i32) -> (i32, i32) {
    %c0_i32 = arith.constant 0 : i32
    %c0_i32_0 = arith.constant 0 : i32
    %c0_i32_1 = arith.constant 0 : i32
    return %c0_i32, %c0_i32_0 : i32, i32
  }
  func.func @transform_7(%arg0: i32) -> (i32, i32) {
    %c0_i32 = arith.constant 0 : i32
    %c0_i32_0 = arith.constant 0 : i32
    %c0_i32_1 = arith.constant 0 : i32
    return %c0_i32, %c0_i32_0 : i32, i32
  }
  func.func @transform_8(%arg0: i32) -> (i32, i32) {
    %c0_i32 = arith.constant 0 : i32
    %c0_i32_0 = arith.constant 0 : i32
    %c0_i32_1 = arith.constant 0 : i32
    return %c0_i32, %c0_i32_0 : i32, i32
  }
  func.func @transform_9(%arg0: i32) -> (i32, i32) {
    %c0_i32 = arith.constant 0 : i32
    %c0_i32_0 = arith.constant 0 : i32
    %c0_i32_1 = arith.constant 0 : i32
    return %c0_i32, %c0_i32_0 : i32, i32
  }
  func.func @transform_10(%arg0: i32) -> (i32, i32) {
    %c0_i32 = arith.constant 0 : i32
    %c0_i32_0 = arith.constant 0 : i32
    %c0_i32_1 = arith.constant 0 : i32
    return %c0_i32, %c0_i32_0 : i32, i32
  }
  func.func @transform_11(%arg0: i32) -> (i32, i32) {
    %c0_i32 = arith.constant 0 : i32
    %c0_i32_0 = arith.constant 0 : i32
    %c0_i32_1 = arith.constant 0 : i32
    return %c0_i32, %c0_i32_0 : i32, i32
  }
  func.func @transform_12(%arg0: i32) -> (i32, i32) {
    %c0_i32 = arith.constant 0 : i32
    %c0_i32_0 = arith.constant 0 : i32
    %c0_i32_1 = arith.constant 0 : i32
    return %c0_i32, %c0_i32_0 : i32, i32
  }
  func.func @transform_13(%arg0: i32) -> (i32, i32) {
    %c0_i32 = arith.constant 0 : i32
    %c0_i32_0 = arith.constant 0 : i32
    %c0_i32_1 = arith.constant 0 : i32
    return %c0_i32, %c0_i32_0 : i32, i32
  }
  func.func @transform_14(%arg0: i32) -> (i32, i32) {
    %c0_i32 = arith.constant 0 : i32
    %c0_i32_0 = arith.constant 0 : i32
    %c0_i32_1 = arith.constant 0 : i32
    return %c0_i32, %c0_i32_0 : i32, i32
  }
  func.func @transform_15(%arg0: i32) -> (i32, i32) {
    %c0_i32 = arith.constant 0 : i32
    %c0_i32_0 = arith.constant 0 : i32
    %c0_i32_1 = arith.constant 0 : i32
    return %c0_i32, %c0_i32_0 : i32, i32
  }
  func.func @transform_16(%arg0: i32) -> (i32, i32) {
    %c0_i32 = arith.constant 0 : i32
    %c0_i32_0 = arith.constant 0 : i32
    %c0_i32_1 = arith.constant 0 : i32
    return %c0_i32, %c0_i32_0 : i32, i32
  }
  func.func @transform_17(%arg0: i32) -> (i32, i32) {
    %c0_i32 = arith.constant 0 : i32
    %c0_i32_0 = arith.constant 0 : i32
    %c0_i32_1 = arith.constant 0 : i32
    return %c0_i32, %c0_i32_0 : i32, i32
  }
  func.func @transform_18(%arg0: i32) -> (i32, i32) {
    %c0_i32 = arith.constant 0 : i32
    %c0_i32_0 = arith.constant 0 : i32
    %c0_i32_1 = arith.constant 0 : i32
    return %c0_i32, %c0_i32_0 : i32, i32
  }
  func.func @transform_19(%arg0: i32) -> (i32, i32) {
    %c0_i32 = arith.constant 0 : i32
    %c0_i32_0 = arith.constant 0 : i32
    %c0_i32_1 = arith.constant 0 : i32
    return %c0_i32, %c0_i32_0 : i32, i32
  }
  func.func @transform_20(%arg0: i32) -> (i32, i32) {
    %c0_i32 = arith.constant 0 : i32
    %c0_i32_0 = arith.constant 0 : i32
    %c0_i32_1 = arith.constant 0 : i32
    return %c0_i32, %c0_i32_0 : i32, i32
  }
  func.func @transform_21(%arg0: i32) -> (i32, i32) {
    %c0_i32 = arith.constant 0 : i32
    %c0_i32_0 = arith.constant 0 : i32
    %c0_i32_1 = arith.constant 0 : i32
    return %c0_i32, %c0_i32_0 : i32, i32
  }
  func.func @transform_22(%arg0: i32) -> (i32, i32) {
    %c0_i32 = arith.constant 0 : i32
    %c0_i32_0 = arith.constant 0 : i32
    %c0_i32_1 = arith.constant 0 : i32
    return %c0_i32, %c0_i32_0 : i32, i32
  }
  func.func @transform_23(%arg0: i32) -> (i32, i32) {
    %c0_i32 = arith.constant 0 : i32
    %c0_i32_0 = arith.constant 0 : i32
    return %arg0, %c0_i32 : i32, i32
  }
  func.func @transform_24(%arg0: i32) -> (i32, i32) {
    %c0_i32 = arith.constant 0 : i32
    %c0_i32_0 = arith.constant 0 : i32
    %c0_i32_1 = arith.constant 0 : i32
    return %c0_i32, %c0_i32_0 : i32, i32
  }
}

</mosaic_0001>

<bundles_post_ra>
// kernel: forward.1
= control target key start
LH: loop header
LB: loop body
LE: loop exit
PB: predicated region body
PF: predicated region fallthrough
CT: control target
= control target key end

     0   :  { %s10926_s27 = smov 0   ;;  %s12602_s0 = inlined_call_operand.vmem [shape: f32[32,128], index: 0, kind: input, shape index: {}]   ;;  %s12603_s1 = inlined_call_operand.vmem [shape: f32[128,1024], index: 1, kind: input, shape index: {}]   ;;  %s12604_s2 = inlined_call_operand.vmem [shape: f32[1,1024], index: 2, kind: input, shape index: {}]   ;;  %s12605_s3 = inlined_call_operand.vmem [shape: bf16[16,1024,96], index: 3, kind: input, shape index: {}]   ;;  %s12606_s4 = inlined_call_operand.vmem [shape: f32[1,96], index: 4, kind: input, shape index: {}]   ;;  %s12607_s5 = inlined_call_operand.vmem [shape: f32[96,96], index: 5, kind: input, shape index: {}]   ;;  %s12608_s6 = inlined_call_operand.vmem [shape: f32[1,96], index: 6, kind: input, shape index: {}]   ;;  %s12609_s7 = inlined_call_operand.vmem [shape: f32[2,128], index: 7, kind: input, shape index: {}]   ;;  %s12610_s8 = inlined_call_operand.vmem [shape: f32[128,96], index: 8, kind: input, shape index: {}]   ;;  %s12611_s9 = inlined_call_operand.vmem [shape: f32[1,96], index: 9, kind: input, shape index: {}]   ;;  %s12612_s10 = inlined_call_operand.vmem [shape: f32[96,96], index: 10, kind: input, shape index: {}]   ;;  %s12613_s11 = inlined_call_operand.vmem [shape: f32[1,96], index: 11, kind: input, shape index: {}]   ;;  %s12614_s12 = inlined_call_operand.vmem [shape: f32[2,256], index: 12, kind: input, shape index: {}]   ;;  %s12615_s13 = inlined_call_operand.vmem [shape: f32[256,96], index: 13, kind: input, shape index: {}]   ;;  %s12616_s14 = inlined_call_operand.vmem [shape: f32[1,96], index: 14, kind: input, shape index: {}]   ;;  %s12617_s15 = inlined_call_operand.vmem [shape: f32[96,96], index: 15, kind: input, shape index: {}]   ;;  %s12618_s16 = inlined_call_operand.vmem [shape: f32[96,96], index: 16, kind: input, shape index: {}]   ;;  %s12619_s17 = inlined_call_operand.vmem [shape: f32[96,96], index: 17, kind: input, shape index: {}]   ;;  %s12620_s18 = inlined_call_operand.vmem [shape: f32[1,96], index: 18, kind: input, shape index: {}]   ;;  %s12621_s19 = inlined_call_operand.vmem [shape: f32[96,48], index: 19, kind: input, shape index: {}]   ;;  %s12622_s20 = inlined_call_operand.vmem [shape: f32[1,48], index: 20, kind: input, shape index: {}]   ;;  %s12623_s21 = inlined_call_operand.vmem [shape: f32[48,1], index: 21, kind: input, shape index: {}]   ;;  %s12624_s22 = inlined_call_operand.<no memory space> [shape: f32[1,1], index: 22, kind: input, shape index: {}]   ;;  %s12625_s23 = inlined_call_operand.vmem [shape: f32[32,1024], index: 23, kind: output, shape index: {0}]   ;;  %s12626_s24 = inlined_call_operand.vmem [shape: f32[2,1], index: 24, kind: output, shape index: {1}]  }
   0x1   :  { %12631 = sst [smem:[#allocation5_spill]] %s12602_s0  ;;  %v30_v0 = vstv %s12624_s22 }
   0x2   :  { %12632 = sst [smem:[#allocation6_spill]] %s12603_s1  ;;  %31 = vst [vmem:[#allocation3] sm:$0x1] %v30_v0 }
   0x3   :  { %12633 = sst [smem:[#allocation7_spill]] %s12604_s2 }
   0x4   :  { %12634 = sst [smem:[#allocation8_spill]] %s12605_s3 }
   0x5   :  { %12635 = sst [smem:[#allocation9_spill]] %s12606_s4 }
   0x6   :  { %12636 = sst [smem:[#allocation10_spill]] %s12607_s5 }
   0x7   :  { %12637 = sst [smem:[#allocation11_spill]] %s12608_s6 }
   0x8   :  { %12638 = sst [smem:[#allocation12_spill]] %s12609_s7 }
   0x9   :  { %12639 = sst [smem:[#allocation13_spill]] %s12610_s8 }
   0xa   :  { %12640 = sst [smem:[#allocation14_spill]] %s12626_s24 }
   0xb LB: > { %12641 = sst [smem:[#allocation4_spill]] %s10792_s27  ;;  %s10932_s28 = sadd.s32 4294967295, %s10792_s27   ;;  %s10792_s27 = sphi %s10926_s27, %s37_s27  }
   0xc   : > { %p7757_p0 = scmp.ge.s32.totalorder %s10792_s27, 1  ;;  %p675_p1 = scmp.lt.s32.totalorder %s10792_s27, 3 }
   0xe   : > { %p676_p2 = pnand %p7757_p0, %p675_p1 }
   0xf   : > { %s7758_s22 = sshll.u32 (!%p676_p2), %s10932_s28, 1  ;;  %s7760_s6 = sshll.u32 (!%p676_p2), %s10932_s28, 3 }
  0x10   : > { %679 = sbr.rel (%p676_p2) target bundleno = 2043 (0x7fb), region = 112  ;;  %p749_p3 = scmp.lt.s32.totalorder (!%p676_p2), %s7758_s22, 3 }
  0x11   : > { %p755_p4 = scmp.lt.s32.totalorder (!%p676_p2), %s7760_s6, 15  ;;  %s12642_s30 = sld [smem:[#allocation5_spill]] (!%p676_p2) }
  0x12   : > { %s12643_s1 = sld [smem:[#allocation8_spill]] (!%p676_p2)  ;;  %p7766_p5 = scmp.ne.s32.totalorder (!%p676_p2), %s10932_s28, 0 }
  0x15   : > { %s12654_s22 = smov (!%p749_p3, %s7758_s22), 3  ;;  %s12656_s6 = smov (!%p755_p4, %s7760_s6), 15 }
  0x16   : > { %s7759_s2 = sshll.u32 %s12654_s22, 3  ;;  %s9196_s29 = sshll.u32 %s12654_s22, 6 }
  0x17   : > { %s10941_s3 = scalar_lea.vmem %s12642_s30, %s7759_s2  ;;  %s9195_s25 = sshll.u32 %s12656_s6, 9 }
  0x18   : > { %s10946_s5 = scalar_lea.vmem %s12643_s1, %s9195_s25  ;;  %s10951_s24 = scalar_lea.vmem %s12625_s23, %s9196_s29 }
  0x19   : > { %772 = sbr.rel (%p7766_p5) target bundleno = 32 (0x20), region = 116 }
  0x1e   : > { %vm773_vm0 = vcmask 779264   ;;  %v10794_v1 = vmov 0.0  }
  0x1f   : > { %774 = vst.msk [vmem:[#allocation2] sm:$0x3] %vm773_vm0, %v10794_v1 }
  0x20 PF: > { %s12644_s6 = sld [smem:[#allocation6_spill]]  ;;  %vm6790_vm1 = vcmask 779264   ;;  %p9175_p6 = scmp.ne.s32.totalorder %s10932_s28, 1 }
  0x21   : > { %s12645_s30 = sld [smem:[#allocation7_spill]] }
  0x22   : > { %s12646_s25 = sld [smem:[#allocation13_spill]] (!%p9175_p6) }
  0x23   : > { %s12647_s22 = sld [smem:[#allocation10_spill]] (!%p9175_p6) }
  0x24   : > { %s12648_s4 = sld [smem:[#allocation9_spill]] (!%p9175_p6) }
  0x25   : > { %s12650_s2 = sld [smem:[#allocation11_spill]] (!%p9175_p6) }
  0x26   : > { %v898_v2 = vld [vmem:[%s12644_s6 + $0x3c8] sm:$0xff]  ;;  %v900_v3 = vld [vmem:[%s12644_s6 + $0x3d8] sm:$0xff]  ;;  %v897_v4 = vld [vmem:[%s12644_s6 + $0x3c0] sm:$0xff]  ;;  %s12651_s26 = sld [smem:[#allocation14_spill]] (!%p9175_p6) }
  0x27   : > { %947 = vmatprep.subr.mxu0 %v898_v2  ;;  %1024 = vmatprep.subr.mxu1 %v900_v3  ;;  %v899_v5 = vld [vmem:[%s12644_s6 + $0x3d0] sm:$0xff]  ;;  %v890_v6 = vld [vmem:[%s12644_s6 + $0x388] sm:$0xff]  ;;  %v892_v7 = vld [vmem:[%s12644_s6 + $0x398] sm:$0xff]  ;;  %v10795_v3 = vmov 0.0  }
  0x28   : > { %948 = vmatpush1.msra.mxu0 %v897_v4  ;;  %1025 = vmatpush1.msra.mxu1 %v899_v5  ;;  %v889_v8 = vld [vmem:[%s12644_s6 + $0x380] sm:$0xff]  ;;  %v891_v9 = vld [vmem:[%s12644_s6 + $0x390] sm:$0xff]  ;;  %v882_v10 = vld [vmem:[%s12644_s6 + $0x348] sm:$0xff] }
  0x29   : > { %949 = vmatprep.subr.mxu0 %v890_v6  ;;  %1026 = vmatprep.subr.mxu1 %v892_v7  ;;  %v884_v11 = vld [vmem:[%s12644_s6 + $0x358] sm:$0xff]  ;;  %v881_v12 = vld [vmem:[%s12644_s6 + $0x340] sm:$0xff]  ;;  %v883_v13 = vld [vmem:[%s12644_s6 + $0x350] sm:$0xff] }
  0x2a   : > { %950 = vmatpush1.msra.mxu0 %v889_v8  ;;  %1027 = vmatpush1.msra.mxu1 %v891_v9  ;;  %v874_v14 = vld [vmem:[%s12644_s6 + $0x308] sm:$0xff]  ;;  %v876_v15 = vld [vmem:[%s12644_s6 + $0x318] sm:$0xff]  ;;  %v873_v16 = vld [vmem:[%s12644_s6 + $0x300] sm:$0xff] }
  0x2b   : > { %951 = vmatprep.subr.mxu0 %v882_v10  ;;  %1028 = vmatprep.subr.mxu1 %v884_v11  ;;  %v875_v17 = vld [vmem:[%s12644_s6 + $0x310] sm:$0xff]  ;;  %v866_v18 = vld [vmem:[%s12644_s6 + $0x2c8] sm:$0xff]  ;;  %v868_v19 = vld [vmem:[%s12644_s6 + $0x2d8] sm:$0xff] }
  0x2c   : > { %952 = vmatpush1.msra.mxu0 %v881_v12  ;;  %1029 = vmatpush1.msra.mxu1 %v883_v13  ;;  %v865_v20 = vld [vmem:[%s12644_s6 + $0x2c0] sm:$0xff]  ;;  %v867_v21 = vld [vmem:[%s12644_s6 + $0x2d0] sm:$0xff]  ;;  %v858_v22 = vld [vmem:[%s12644_s6 + $0x288] sm:$0xff] }
  0x2d   : > { %953 = vmatprep.subr.mxu0 %v874_v14  ;;  %1030 = vmatprep.subr.mxu1 %v876_v15  ;;  %v860_v23 = vld [vmem:[%s12644_s6 + $0x298] sm:$0xff]  ;;  %v857_v24 = vld [vmem:[%s12644_s6 + $0x280] sm:$0xff]  ;;  %v859_v25 = vld [vmem:[%s12644_s6 + $0x290] sm:$0xff] }
  0x2e   : > { %954 = vmatpush1.msra.mxu0 %v873_v16  ;;  %1031 = vmatpush1.msra.mxu1 %v875_v17  ;;  %v850_v26 = vld [vmem:[%s12644_s6 + $0x248] sm:$0xff]  ;;  %v852_v27 = vld [vmem:[%s12644_s6 + $0x258] sm:$0xff]  ;;  %v849_v28 = vld [vmem:[%s12644_s6 + $0x240] sm:$0xff] }
  0x2f   : > { %955 = vmatprep.subr.mxu0 %v866_v18  ;;  %1032 = vmatprep.subr.mxu1 %v868_v19  ;;  %v851_v29 = vld [vmem:[%s12644_s6 + $0x250] sm:$0xff]  ;;  %v842_v30 = vld [vmem:[%s12644_s6 + $0x208] sm:$0xff]  ;;  %v844_v31 = vld [vmem:[%s12644_s6 + $0x218] sm:$0xff] }
  0x30   : > { %956 = vmatpush1.msra.mxu0 %v865_v20  ;;  %1033 = vmatpush1.msra.mxu1 %v867_v21  ;;  %v841_v32 = vld [vmem:[%s12644_s6 + $0x200] sm:$0xff]  ;;  %v843_v33 = vld [vmem:[%s12644_s6 + $0x210] sm:$0xff]  ;;  %v834_v34 = vld [vmem:[%s12644_s6 + $0x1c8] sm:$0xff] }
  0x31   : > { %957 = vmatprep.subr.mxu0 %v858_v22  ;;  %1034 = vmatprep.subr.mxu1 %v860_v23  ;;  %v836_v35 = vld [vmem:[%s12644_s6 + $0x1d8] sm:$0xff]  ;;  %v833_v36 = vld [vmem:[%s12644_s6 + $0x1c0] sm:$0xff]  ;;  %v835_v37 = vld [vmem:[%s12644_s6 + $0x1d0] sm:$0xff] }
  0x32   : > { %958 = vmatpush1.msra.mxu0 %v857_v24  ;;  %1035 = vmatpush1.msra.mxu1 %v859_v25  ;;  %v826_v38 = vld [vmem:[%s12644_s6 + $0x188] sm:$0xff]  ;;  %v828_v39 = vld [vmem:[%s12644_s6 + $0x198] sm:$0xff]  ;;  %v825_v40 = vld [vmem:[%s12644_s6 + $0x180] sm:$0xff] }
  0x33   : > { %959 = vmatprep.subr.mxu0 %v850_v26  ;;  %1036 = vmatprep.subr.mxu1 %v852_v27  ;;  %v827_v41 = vld [vmem:[%s12644_s6 + $0x190] sm:$0xff]  ;;  %v818_v42 = vld [vmem:[%s12644_s6 + $0x148] sm:$0xff]  ;;  %v820_v43 = vld [vmem:[%s12644_s6 + $0x158] sm:$0xff] }
  0x34   : > { %960 = vmatpush1.msra.mxu0 %v849_v28  ;;  %1037 = vmatpush1.msra.mxu1 %v851_v29  ;;  %v817_v44 = vld [vmem:[%s12644_s6 + $0x140] sm:$0xff]  ;;  %v819_v45 = vld [vmem:[%s12644_s6 + $0x150] sm:$0xff]  ;;  %v810_v46 = vld [vmem:[%s12644_s6 + $0x108] sm:$0xff] }
  0x35   : > { %961 = vmatprep.subr.mxu0 %v842_v30  ;;  %1038 = vmatprep.subr.mxu1 %v844_v31  ;;  %v812_v47 = vld [vmem:[%s12644_s6 + $0x118] sm:$0xff]  ;;  %v809_v48 = vld [vmem:[%s12644_s6 + $0x100] sm:$0xff]  ;;  %v811_v49 = vld [vmem:[%s12644_s6 + $0x110] sm:$0xff] }
  0x36   : > { %962 = vmatpush1.msra.mxu0 %v841_v32  ;;  %1039 = vmatpush1.msra.mxu1 %v843_v33  ;;  %v802_v50 = vld [vmem:[%s12644_s6 + $0xc8] sm:$0xff]  ;;  %v804_v51 = vld [vmem:[%s12644_s6 + $0xd8] sm:$0xff]  ;;  %v801_v52 = vld [vmem:[%s12644_s6 + $0xc0] sm:$0xff] }
  0x37   : > { %963 = vmatprep.subr.mxu0 %v834_v34  ;;  %1040 = vmatprep.subr.mxu1 %v836_v35  ;;  %v803_v53 = vld [vmem:[%s12644_s6 + $0xd0] sm:$0xff]  ;;  %v794_v54 = vld [vmem:[%s12644_s6 + $0x88] sm:$0xff]  ;;  %v796_v55 = vld [vmem:[%s12644_s6 + $0x98] sm:$0xff] }
  0x38   : > { %964 = vmatpush1.msra.mxu0 %v833_v36  ;;  %1041 = vmatpush1.msra.mxu1 %v835_v37  ;;  %v793_v56 = vld [vmem:[%s12644_s6 + $0x80] sm:$0xff]  ;;  %v795_v57 = vld [vmem:[%s12644_s6 + $0x90] sm:$0xff]  ;;  %v786_v58 = vld [vmem:[%s12644_s6 + $0x48] sm:$0xff] }
  0x39   : > { %965 = vmatprep.subr.mxu0 %v826_v38  ;;  %1042 = vmatprep.subr.mxu1 %v828_v39  ;;  %v788_v59 = vld [vmem:[%s12644_s6 + $0x58] sm:$0xff]  ;;  %v785_v60 = vld [vmem:[%s12644_s6 + $0x40] sm:$0xff]  ;;  %v787_v61 = vld [vmem:[%s12644_s6 + $0x50] sm:$0xff] }
  0x3a   : > { %966 = vmatpush1.msra.mxu0 %v825_v40  ;;  %1043 = vmatpush1.msra.mxu1 %v827_v41  ;;  %v778_v62 = vld [vmem:[%s12644_s6 + $0x8] sm:$0xff]  ;;  %v780_v63 = vld [vmem:[%s12644_s6 + $0x18] sm:$0xff]  ;;  %v777_v0 = vld [vmem:[%s12644_s6] sm:$0xff] }
  0x3b   : > { %967 = vmatprep.subr.mxu0 %v818_v42  ;;  %1044 = vmatprep.subr.mxu1 %v820_v43  ;;  %v779_v1 = vld [vmem:[%s12644_s6 + $0x10] sm:$0xff]  ;;  %v11147_v2 = vld [vmem:[%s10941_s3] sm:$0xff]  ;;  %v902_v4 = vld [vmem:[%s12644_s6 + $0x3e8] sm:$0xff] }
  0x3c   : > { %968 = vmatpush1.msra.mxu0 %v817_v44  ;;  %1045 = vmatpush1.msra.mxu1 %v819_v45  ;;  %v904_v5 = vld [vmem:[%s12644_s6 + $0x3f8] sm:$0xff]  ;;  %v901_v6 = vld [vmem:[%s12644_s6 + $0x3e0] sm:$0xff]  ;;  %v903_v7 = vld [vmem:[%s12644_s6 + $0x3f0] sm:$0xff] }
  0x3d   : > { %969 = vmatprep.subr.mxu0 %v810_v46  ;;  %1046 = vmatprep.subr.mxu1 %v812_v47  ;;  %v894_v8 = vld [vmem:[%s12644_s6 + $0x3a8] sm:$0xff]  ;;  %v896_v9 = vld [vmem:[%s12644_s6 + $0x3b8] sm:$0xff]  ;;  %v893_v10 = vld [vmem:[%s12644_s6 + $0x3a0] sm:$0xff] }
  0x3e   : > { %970 = vmatpush1.msra.mxu0 %v809_v48  ;;  %1047 = vmatpush1.msra.mxu1 %v811_v49  ;;  %v895_v11 = vld [vmem:[%s12644_s6 + $0x3b0] sm:$0xff]  ;;  %v886_v12 = vld [vmem:[%s12644_s6 + $0x368] sm:$0xff]  ;;  %v888_v13 = vld [vmem:[%s12644_s6 + $0x378] sm:$0xff] }
  0x3f   : > { %971 = vmatprep.subr.mxu0 %v802_v50  ;;  %1048 = vmatprep.subr.mxu1 %v804_v51  ;;  %v885_v14 = vld [vmem:[%s12644_s6 + $0x360] sm:$0xff]  ;;  %v887_v15 = vld [vmem:[%s12644_s6 + $0x370] sm:$0xff]  ;;  %v878_v16 = vld [vmem:[%s12644_s6 + $0x328] sm:$0xff] }
  0x40   : > { %972 = vmatpush1.msra.mxu0 %v801_v52  ;;  %1049 = vmatpush1.msra.mxu1 %v803_v53  ;;  %v880_v17 = vld [vmem:[%s12644_s6 + $0x338] sm:$0xff]  ;;  %v877_v18 = vld [vmem:[%s12644_s6 + $0x320] sm:$0xff]  ;;  %v879_v19 = vld [vmem:[%s12644_s6 + $0x330] sm:$0xff] }
  0x41   : > { %973 = vmatprep.subr.mxu0 %v794_v54  ;;  %1050 = vmatprep.subr.mxu1 %v796_v55  ;;  %v870_v20 = vld [vmem:[%s12644_s6 + $0x2e8] sm:$0xff]  ;;  %v872_v21 = vld [vmem:[%s12644_s6 + $0x2f8] sm:$0xff]  ;;  %v869_v22 = vld [vmem:[%s12644_s6 + $0x2e0] sm:$0xff] }
  0x42   : > { %974 = vmatpush1.msra.mxu0 %v793_v56  ;;  %1051 = vmatpush1.msra.mxu1 %v795_v57  ;;  %v871_v23 = vld [vmem:[%s12644_s6 + $0x2f0] sm:$0xff]  ;;  %v862_v24 = vld [vmem:[%s12644_s6 + $0x2a8] sm:$0xff]  ;;  %v864_v25 = vld [vmem:[%s12644_s6 + $0x2b8] sm:$0xff] }
  0x43   : > { %975 = vmatprep.subr.mxu0 %v786_v58  ;;  %1052 = vmatprep.subr.mxu1 %v788_v59  ;;  %v861_v26 = vld [vmem:[%s12644_s6 + $0x2a0] sm:$0xff]  ;;  %v863_v27 = vld [vmem:[%s12644_s6 + $0x2b0] sm:$0xff]  ;;  %v854_v28 = vld [vmem:[%s12644_s6 + $0x268] sm:$0xff] }
  0x44   : > { %976 = vmatpush1.msra.mxu0 %v785_v60  ;;  %1053 = vmatpush1.msra.mxu1 %v787_v61  ;;  %v856_v29 = vld [vmem:[%s12644_s6 + $0x278] sm:$0xff]  ;;  %v853_v30 = vld [vmem:[%s12644_s6 + $0x260] sm:$0xff]  ;;  %v855_v31 = vld [vmem:[%s12644_s6 + $0x270] sm:$0xff] }
  0x45   : > { %977 = vmatprep.subr.mxu0 %v778_v62  ;;  %1054 = vmatprep.subr.mxu1 %v780_v63  ;;  %v846_v32 = vld [vmem:[%s12644_s6 + $0x228] sm:$0xff]  ;;  %v848_v33 = vld [vmem:[%s12644_s6 + $0x238] sm:$0xff]  ;;  %v845_v34 = vld [vmem:[%s12644_s6 + $0x220] sm:$0xff] }
  0x46   : > { %978 = vmatpush1.msra.mxu0 %v777_v0  ;;  %1011 = vmatprep.mubr.f32.mxu0 %v10795_v3  ;;  %v847_v35 = vld [vmem:[%s12644_s6 + $0x230] sm:$0xff]  ;;  %v838_v36 = vld [vmem:[%s12644_s6 + $0x1e8] sm:$0xff]  ;;  %v840_v37 = vld [vmem:[%s12644_s6 + $0x1f8] sm:$0xff] }
  0x47   : > { %1055 = vmatpush1.msra.mxu1 %v779_v1  ;;  %1088 = vmatprep.mubr.f32.mxu1 %v10795_v3  ;;  %v837_v38 = vld [vmem:[%s12644_s6 + $0x1e0] sm:$0xff]  ;;  %v839_v39 = vld [vmem:[%s12644_s6 + $0x1f0] sm:$0xff]  ;;  %v830_v40 = vld [vmem:[%s12644_s6 + $0x1a8] sm:$0xff] }
  0x48   : > { %1012 = vmatmul.mubr.f32.vlgmr.msra.gmra.mxu0 %v11147_v2  ;;  %1089 = vmatmul.mubr.f32.vlgmr.msra.gmra.mxu1 %v11147_v2  ;;  %v832_v41 = vld [vmem:[%s12644_s6 + $0x1b8] sm:$0xff]  ;;  %v829_v42 = vld [vmem:[%s12644_s6 + $0x1a0] sm:$0xff]  ;;  %v831_v43 = vld [vmem:[%s12644_s6 + $0x1b0] sm:$0xff] }
  0x49   : > { %1101 = vmatprep.subr.mxu0 %v902_v4  ;;  %1178 = vmatprep.subr.mxu1 %v904_v5  ;;  %v822_v44 = vld [vmem:[%s12644_s6 + $0x168] sm:$0xff]  ;;  %v824_v45 = vld [vmem:[%s12644_s6 + $0x178] sm:$0xff]  ;;  %v821_v46 = vld [vmem:[%s12644_s6 + $0x160] sm:$0xff] }
  0x4a   : > { %1102 = vmatpush1.msra.mxu0 %v901_v6  ;;  %1179 = vmatpush1.msra.mxu1 %v903_v7  ;;  %v823_v47 = vld [vmem:[%s12644_s6 + $0x170] sm:$0xff]  ;;  %v814_v48 = vld [vmem:[%s12644_s6 + $0x128] sm:$0xff]  ;;  %v816_v49 = vld [vmem:[%s12644_s6 + $0x138] sm:$0xff] }
  0x4b   : > { %1103 = vmatprep.subr.mxu0 %v894_v8  ;;  %1180 = vmatprep.subr.mxu1 %v896_v9  ;;  %v813_v50 = vld [vmem:[%s12644_s6 + $0x120] sm:$0xff]  ;;  %v815_v51 = vld [vmem:[%s12644_s6 + $0x130] sm:$0xff]  ;;  %v806_v52 = vld [vmem:[%s12644_s6 + $0xe8] sm:$0xff] }
  0x4c   : > { %1104 = vmatpush1.msra.mxu0 %v893_v10  ;;  %1181 = vmatpush1.msra.mxu1 %v895_v11  ;;  %v808_v53 = vld [vmem:[%s12644_s6 + $0xf8] sm:$0xff]  ;;  %v805_v54 = vld [vmem:[%s12644_s6 + $0xe0] sm:$0xff]  ;;  %v807_v55 = vld [vmem:[%s12644_s6 + $0xf0] sm:$0xff] }
  0x4d   : > { %1105 = vmatprep.subr.mxu0 %v886_v12  ;;  %1182 = vmatprep.subr.mxu1 %v888_v13  ;;  %v11310_v56 = vld [vmem:[%s10941_s3 + $0x8] sm:$0xff]  ;;  %v800_v58 = vld [vmem:[%s12644_s6 + $0xb8] sm:$0xff]  ;;  %v797_v59 = vld [vmem:[%s12644_s6 + $0xa0] sm:$0xff]  ;;  %s12649_s3 = sld [smem:[#allocation12_spill]] (!%p9175_p6) }
  0x4e   : > { %1106 = vmatpush1.msra.mxu0 %v885_v14  ;;  %1183 = vmatpush1.msra.mxu1 %v887_v15  ;;  %v798_v57 = vld [vmem:[%s12644_s6 + $0xa8] sm:$0xff]  ;;  %v799_v60 = vld [vmem:[%s12644_s6 + $0xb0] sm:$0xff]  ;;  %v792_v62 = vld [vmem:[%s12644_s6 + $0x78] sm:$0xff] }
  0x4f   : > { %1107 = vmatprep.subr.mxu0 %v878_v16  ;;  %1184 = vmatprep.subr.mxu1 %v880_v17  ;;  %v790_v61 = vld [vmem:[%s12644_s6 + $0x68] sm:$0xff]  ;;  %v789_v63 = vld [vmem:[%s12644_s6 + $0x60] sm:$0xff]  ;;  %v791_v0 = vld [vmem:[%s12644_s6 + $0x70] sm:$0xff] }
  0x50   : > { %1108 = vmatpush1.msra.mxu0 %v877_v18  ;;  %1185 = vmatpush1.msra.mxu1 %v879_v19  ;;  %v782_v1 = vld [vmem:[%s12644_s6 + $0x28] sm:$0xff]  ;;  %v784_v4 = vld [vmem:[%s12644_s6 + $0x38] sm:$0xff]  ;;  %v781_v5 = vld [vmem:[%s12644_s6 + $0x20] sm:$0xff] }
  0x51   : > { %1109 = vmatprep.subr.mxu0 %v870_v20  ;;  %1186 = vmatprep.subr.mxu1 %v872_v21  ;;  %v783_v6 = vld [vmem:[%s12644_s6 + $0x30] sm:$0xff]  ;;  %v10262_v7 = vld [vmem:[%s10946_s5 + $0x278] sm:$0xff]   ;;  %v10270_v15 = vld [vmem:[%s10946_s5 + $0x268] sm:$0xff]  }
  0x52   : > { %1110 = vmatpush1.msra.mxu0 %v869_v22  ;;  %1187 = vmatpush1.msra.mxu1 %v871_v23  ;;  %v10263_v8 = vld [vmem:[%s10946_s5 + $0x2f8] sm:$0xff]   ;;  %v10266_v11 = vld [vmem:[%s10946_s5 + $0x270] sm:$0xff]   ;;  %v10271_v16 = vld [vmem:[%s10946_s5 + $0x2e8] sm:$0xff]  }
  0x53   : > { %1111 = vmatprep.subr.mxu0 %v862_v24  ;;  %1188 = vmatprep.subr.mxu1 %v864_v25  ;;  %v10264_v9 = vld [vmem:[%s10946_s5 + $0x238] sm:$0xff]   ;;  %v10267_v12 = vld [vmem:[%s10946_s5 + $0x2f0] sm:$0xff]   ;;  %v10272_v17 = vld [vmem:[%s10946_s5 + $0x228] sm:$0xff]  }
  0x54   : > { %1112 = vmatpush1.msra.mxu0 %v861_v26  ;;  %1189 = vmatpush1.msra.mxu1 %v863_v27  ;;  %v10265_v10 = vld [vmem:[%s10946_s5 + $0x2b8] sm:$0xff]   ;;  %v10268_v13 = vld [vmem:[%s10946_s5 + $0x230] sm:$0xff]   ;;  %v10273_v18 = vld [vmem:[%s10946_s5 + $0x2a8] sm:$0xff]  }
  0x55   : > { %1113 = vmatprep.subr.mxu0 %v854_v28  ;;  %1190 = vmatprep.subr.mxu1 %v856_v29  ;;  %v10269_v14 = vld [vmem:[%s10946_s5 + $0x2b0] sm:$0xff]   ;;  %v10275_v19 = vld [vmem:[%s10946_s5 + $0x2e0] sm:$0xff]   ;;  %v10278_v22 = vld [vmem:[%s10946_s5 + $0x258] sm:$0xff]  }
  0x56   : > { %1114 = vmatpush1.msra.mxu0 %v853_v30  ;;  %1191 = vmatpush1.msra.mxu1 %v855_v31  ;;  %v10276_v20 = vld [vmem:[%s10946_s5 + $0x220] sm:$0xff]   ;;  %v10280_v23 = vld [vmem:[%s10946_s5 + $0x218] sm:$0xff]   ;;  %v10282_v25 = vld [vmem:[%s10946_s5 + $0x250] sm:$0xff]  }
  0x57   : > { %1115 = vmatprep.subr.mxu0 %v846_v32  ;;  %1192 = vmatprep.subr.mxu1 %v848_v33  ;;  %v10277_v21 = vld [vmem:[%s10946_s5 + $0x2a0] sm:$0xff]   ;;  %v10281_v24 = vld [vmem:[%s10946_s5 + $0x298] sm:$0xff]   ;;  %v10283_v26 = vld [vmem:[%s10946_s5 + $0x2d0] sm:$0xff]  }
  0x58   : > { %1116 = vmatpush1.msra.mxu0 %v845_v34  ;;  %1193 = vmatpush1.msra.mxu1 %v847_v35  ;;  %v10284_v27 = vld [vmem:[%s10946_s5 + $0x210] sm:$0xff]   ;;  %v10286_v29 = vld [vmem:[%s10946_s5 + $0x248] sm:$0xff]   ;;  %v10290_v33 = vld [vmem:[%s10946_s5 + $0x240] sm:$0xff]  }
  0x59   : > { %1117 = vmatprep.subr.mxu0 %v838_v36  ;;  %1194 = vmatprep.subr.mxu1 %v840_v37  ;;  %v10285_v28 = vld [vmem:[%s10946_s5 + $0x290] sm:$0xff]   ;;  %v10287_v30 = vld [vmem:[%s10946_s5 + $0x2c8] sm:$0xff]   ;;  %v10291_v34 = vld [vmem:[%s10946_s5 + $0x2c0] sm:$0xff]  }
  0x5a   : > { %1118 = vmatpush1.msra.mxu0 %v837_v38  ;;  %1195 = vmatpush1.msra.mxu1 %v839_v39  ;;  %v10288_v31 = vld [vmem:[%s10946_s5 + $0x208] sm:$0xff]   ;;  %v10292_v35 = vld [vmem:[%s10946_s5 + $0x200] sm:$0xff]   ;;  %v10294_v37 = vld [vmem:[%s10946_s5 + $0x378] sm:$0xff]   ;;  %v907_v39 = vlaneseq }
  0x5b   : > { %1119 = vmatprep.subr.mxu0 %v830_v40  ;;  %1196 = vmatprep.subr.mxu1 %v832_v41  ;;  %v10289_v32 = vld [vmem:[%s10946_s5 + $0x288] sm:$0xff]   ;;  %v10293_v36 = vld [vmem:[%s10946_s5 + $0x280] sm:$0xff]   ;;  %v10295_v38 = vld [vmem:[%s10946_s5 + $0x3f8] sm:$0xff]  }
  0x5c   : > { %1120 = vmatpush1.msra.mxu0 %v829_v42  ;;  %1197 = vmatpush1.msra.mxu1 %v831_v43  ;;  %v11394_v40 = vshrl.u32 %v907_v39, 7  ;;  %v11400_v42 = vld [vmem:[%s12645_s30] sm:$0xff] }
  0x5d   : > { %1121 = vmatprep.subr.mxu0 %v822_v44  ;;  %1198 = vmatprep.subr.mxu1 %v824_v45  ;;  %v10323_v39 = vld [vmem:[%s10946_s5 + $0x3c0] sm:$0xff]  }
  0x5e   : > { %1122 = vmatpush1.msra.mxu0 %v821_v46  ;;  %1199 = vmatpush1.msra.mxu1 %v823_v47  ;;  %v909_v41 = vsub.s32 0, %v11394_v40  ;;  %v917_v43 = vsub.s32 2, %v11394_v40  ;;  %v913_v44 = vsub.s32 1, %v11394_v40  ;;  %v921_v45 = vsub.s32 3, %v11394_v40 }
  0x5f   : > { %1123 = vmatprep.subr.mxu0 %v814_v48  ;;  %1200 = vmatprep.subr.mxu1 %v816_v49 }
  0x60   : > { %1124 = vmatpush1.msra.mxu0 %v813_v50  ;;  %1201 = vmatpush1.msra.mxu1 %v815_v51  ;;  %v11406_v46 = vrot.slane %v11400_v42, %v909_v41  ;;  %v11409_v47 = vrot.slane %v11400_v42, %v917_v43  ;;  %v11412_v48 = vrot.slane %v11400_v42, %v913_v44 }
  0x61   : > { %1125 = vmatprep.subr.mxu0 %v806_v52  ;;  %1202 = vmatprep.subr.mxu1 %v808_v53  ;;  %v11415_v49 = vrot.slane %v11400_v42, %v921_v45 }
  0x62   : > { %1017 = vmatprep.mubr.f32.mxu0 %v10795_v3  ;;  %1126 = vmatpush1.msra.mxu0 %v805_v54 }
  0x63   : > { %1203 = vmatpush1.msra.mxu1 %v807_v55  ;;  %1018 = vmatmul.mubr.f32.gmra.mxu0 %v11310_v56 }
  0x64   : > { %1127 = vmatprep.subr.mxu0 %v798_v57  ;;  %1204 = vmatprep.subr.mxu1 %v800_v58 }
  0x65   : > { %1094 = vmatprep.mubr.f32.mxu1 %v10795_v3  ;;  %1128 = vmatpush1.msra.mxu0 %v797_v59 }
  0x66   : > { %1205 = vmatpush1.msra.mxu1 %v799_v60  ;;  %1129 = vmatprep.subr.mxu0 %v790_v61 }
  0x67   : > { %1095 = vmatmul.mubr.f32.gmra.mxu1 %v11310_v56  ;;  %1206 = vmatprep.subr.mxu1 %v792_v62 }
  0x68   : > { %1130 = vmatpush1.msra.mxu0 %v789_v63  ;;  %1207 = vmatpush1.msra.mxu1 %v791_v0 }
  0x69   : > { %1131 = vmatprep.subr.mxu0 %v782_v1  ;;  %1208 = vmatprep.subr.mxu1 %v784_v4  ;;  %v10296_v1 = vld [vmem:[%s10946_s5 + $0x338] sm:$0xff]  }
  0x6a   : > { %1132 = vmatpush1.msra.mxu0 %v781_v5  ;;  %1165 = vmatprep.mubr.f32.mxu0 %v10795_v3  ;;  %v10297_v4 = vld [vmem:[%s10946_s5 + $0x3b8] sm:$0xff]  }
  0x6b   : > { %1209 = vmatpush1.msra.mxu1 %v783_v6  ;;  %1242 = vmatprep.mubr.f32.mxu1 %v10795_v3  ;;  %v10298_v6 = vld [vmem:[%s10946_s5 + $0x370] sm:$0xff]  }
  0x6c   : > { %1166 = vmatmul.mubr.f32.vlgmr.msra.gmra.mxu0 %v11147_v2  ;;  %1243 = vmatmul.mubr.f32.vlgmr.msra.gmra.mxu1 %v11147_v2  ;;  %v10274_v2 = vld [vmem:[%s10946_s5 + $0x260] sm:$0xff]  }
  0x6d   : > { %9197 = vmatprep.subr.bf16.mxu0 %v10262_v7  ;;  %9219 = vmatprep.subr.bf16.mxu1 %v10263_v8  ;;  %v10299_v7 = vld [vmem:[%s10946_s5 + $0x3f0] sm:$0xff]  }
  0x6e   : > { %9198 = vmatpush3.bf16.msra.mxu0 %v10264_v9  ;;  %9220 = vmatpush3.bf16.msra.mxu1 %v10265_v10  ;;  %v10300_v8 = vld [vmem:[%s10946_s5 + $0x330] sm:$0xff]   ;;  %v10302_v10 = vld [vmem:[%s10946_s5 + $0x368] sm:$0xff]  }
  0x6f   : > { %9199 = vmatprep.subr.bf16.mxu0 %v10266_v11  ;;  %9221 = vmatprep.subr.bf16.mxu1 %v10267_v12  ;;  %v10301_v9 = vld [vmem:[%s10946_s5 + $0x3b0] sm:$0xff]   ;;  %v10303_v11 = vld [vmem:[%s10946_s5 + $0x3e8] sm:$0xff]  }
  0x70   : > { %1171 = vmatprep.mubr.f32.mxu0 %v10795_v3  ;;  %1248 = vmatprep.mubr.f32.mxu1 %v10795_v3  ;;  %v10279_v3 = vld [vmem:[%s10946_s5 + $0x2d8] sm:$0xff]   ;;  %v10304_v12 = vld [vmem:[%s10946_s5 + $0x328] sm:$0xff]  }
  0x71   : > { %1172 = vmatmul.mubr.f32.gmra.mxu0 %v11310_v56  ;;  %1249 = vmatmul.mubr.f32.gmra.mxu1 %v11310_v56 }
  0x72   : > { %9200 = vmatpush3.bf16.msra.mxu0 %v10268_v13  ;;  %9222 = vmatpush3.bf16.msra.mxu1 %v10269_v14  ;;  %v10305_v13 = vld [vmem:[%s10946_s5 + $0x3a8] sm:$0xff]   ;;  %v10306_v14 = vld [vmem:[%s10946_s5 + $0x360] sm:$0xff]  }
  0x73   : > { %9201 = vmatprep.subr.bf16.mxu0 %v10270_v15  ;;  %9223 = vmatprep.subr.bf16.mxu1 %v10271_v16  ;;  %v10307_v15 = vld [vmem:[%s10946_s5 + $0x3e0] sm:$0xff]  }
  0x74   : > { %v10308_v16 = vld [vmem:[%s10946_s5 + $0x320] sm:$0xff]  }
  0x76   : > { %9202 = vmatpush3.bf16.msra.mxu0 %v10272_v17  ;;  %9224 = vmatpush3.bf16.msra.mxu1 %v10273_v18  ;;  %v10309_v17 = vld [vmem:[%s10946_s5 + $0x3a0] sm:$0xff]   ;;  %v10310_v18 = vld [vmem:[%s10946_s5 + $0x358] sm:$0xff]  }
  0x77   : > { %9203 = vmatprep.subr.bf16.mxu0 %v10274_v2  ;;  %9225 = vmatprep.subr.bf16.mxu1 %v10275_v19  ;;  %v10311_v2 = vld [vmem:[%s10946_s5 + $0x3d8] sm:$0xff]  }
  0x78   : > { %v10312_v19 = vld [vmem:[%s10946_s5 + $0x318] sm:$0xff]  }
  0x7a   : > { %9204 = vmatpush3.bf16.msra.mxu0 %v10276_v20  ;;  %9226 = vmatpush3.bf16.msra.mxu1 %v10277_v21  ;;  %v10313_v20 = vld [vmem:[%s10946_s5 + $0x398] sm:$0xff]   ;;  %v10314_v21 = vld [vmem:[%s10946_s5 + $0x350] sm:$0xff]  }
  0x7b   : > { %9205 = vmatprep.subr.bf16.mxu0 %v10278_v22  ;;  %9227 = vmatprep.subr.bf16.mxu1 %v10279_v3  ;;  %v10315_v22 = vld [vmem:[%s10946_s5 + $0x3d0] sm:$0xff]  }
  0x7c   : > { %v10316_v3 = vld [vmem:[%s10946_s5 + $0x310] sm:$0xff]  }
  0x7e   : > { %9206 = vmatpush3.bf16.msra.mxu0 %v10280_v23  ;;  %9228 = vmatpush3.bf16.msra.mxu1 %v10281_v24  ;;  %v10317_v24 = vld [vmem:[%s10946_s5 + $0x390] sm:$0xff]  }
  0x7f   : > { %9207 = vmatprep.subr.bf16.mxu0 %v10282_v25  ;;  %9229 = vmatprep.subr.bf16.mxu1 %v10283_v26  ;;  %v925_v26 = vsub.s32 4, %v11394_v40 }
  0x81   : > { %v11475_v43 = vrot.slane %v11400_v42, %v925_v26  ;;  %v10348_v26 = vld [vmem:[%s10946_s5 + $0x10] sm:$0xff]  }
  0x82   : > { %9208 = vmatpush3.bf16.msra.mxu0 %v10284_v27  ;;  %9230 = vmatpush3.bf16.msra.mxu1 %v10285_v28  ;;  %v933_v27 = vsub.s32 6, %v11394_v40  ;;  %v10318_v28 = vld [vmem:[%s10946_s5 + $0x348] sm:$0xff]  }
  0x83   : > { %9209 = vmatprep.subr.bf16.mxu0 %v10286_v29  ;;  %9231 = vmatprep.subr.bf16.mxu1 %v10287_v30  ;;  %v10319_v29 = vld [vmem:[%s10946_s5 + $0x3c8] sm:$0xff]  }
  0x84   : > { %v11478_v44 = vrot.slane %v11400_v42, %v933_v27  ;;  %v10349_v27 = vld [vmem:[%s10946_s5 + $0x90] sm:$0xff]  }
  0x86   : > { %9210 = vmatpush3.bf16.msra.mxu0 %v10288_v31  ;;  %9232 = vmatpush3.bf16.msra.mxu1 %v10289_v32  ;;  %v929_v31 = vsub.s32 5, %v11394_v40  ;;  %v10320_v32 = vld [vmem:[%s10946_s5 + $0x308] sm:$0xff]  }
  0x87   : > { %9211 = vmatprep.subr.bf16.mxu0 %v10290_v33  ;;  %9233 = vmatprep.subr.bf16.mxu1 %v10291_v34 }
  0x88   : > { %v11483_v45 = vrot.slane %v11400_v42, %v929_v31  ;;  %v10353_v31 = vld [vmem:[%s10946_s5 + $0x88] sm:$0xff]  }
  0x8a   : > { %9212 = vmatpush3.bf16.msra.mxu0 %v10292_v35  ;;  %9234 = vmatpush3.bf16.msra.mxu1 %v10293_v36  ;;  %v937_v35 = vsub.s32 7, %v11394_v40  ;;  %v10321_v36 = vld [vmem:[%s10946_s5 + $0x388] sm:$0xff]  }
  0x8b   : > { %9241 = vmatprep.subr.bf16.mxu0 %v10294_v37  ;;  %9263 = vmatprep.subr.bf16.mxu1 %v10295_v38  ;;  %v10322_v38 = vld [vmem:[%s10946_s5 + $0x340] sm:$0xff]  }
 0x108   : > { %v1013_v50 = vpop.f32.mrf.mxu0  ;;  %v1090_v51 = vpop.f32.mrf.mxu1 }
 0x109   : > { %v1014_v52 = vadd.f32 %v1013_v50, %v11406_v46  ;;  %v1091_v53 = vadd.f32 %v1090_v51, %v11409_v47  ;;  %v10325_v51 = vld [vmem:[%s10946_s5 + $0x380] sm:$0xff]  }
 0x10a   : > { %v1015_v54 = vpop.f32.mrf.mxu0  ;;  %v1092_v55 = vpop.f32.mrf.mxu1 }
 0x10b   : > { %1255 = vst [vmem:[%s10951_s24] sm:$0xff] %v1014_v52  ;;  %1257 = vst [vmem:[%s10951_s24 + $0x10] sm:$0xff] %v1091_v53  ;;  %v11421_v56 = vpack.c.bf16 %v1091_v53, %v1091_v53  ;;  %v1016_v57 = vadd.f32 %v1015_v54, %v11412_v48  ;;  %v1093_v58 = vadd.f32 %v1092_v55, %v11415_v49 }
 0x10c   : > { %v11425_v59 = vpack.c.bf16 %v1014_v52, %v1014_v52  ;;  %v10326_v52 = vld [vmem:[%s10946_s5 + $0x78] sm:$0xff]  }
 0x10d   : > { %1256 = vst [vmem:[%s10951_s24 + $0x8] sm:$0xff] %v1016_v57  ;;  %v11428_v60 = vpack.c.bf16 %v1016_v57, %v1016_v57  ;;  %1258 = vst [vmem:[%s10951_s24 + $0x18] sm:$0xff] %v1093_v58  ;;  %v11431_v61 = vpack.c.bf16 %v1093_v58, %v1093_v58  ;;  %v1546_v62 = vrot.slane %v11421_v56, 1 }
 0x10e   : > { %v1544_v5 = vrot.slane %v11425_v59, 1 }
 0x10f   : > { %v1545_v63 = vrot.slane %v11428_v60, 1  ;;  %v1547_v0 = vrot.slane %v11431_v61, 1 }
 0x111   : > { %1976 = vmatprep.mubr.bf16.mxu0 %v1545_v63  ;;  %2016 = vmatprep.mubr.bf16.mxu1 %v1547_v0 }
 0x112   : > { %1977 = vmatmul.mubr.bf16.vlgmr.msra.gmra.mxu0 %v1544_v5  ;;  %2017 = vmatmul.mubr.bf16.vlgmr.msra.gmra.mxu1 %v1546_v62 }
 0x113   : > { %9242 = vmatpush3.bf16.msra.mxu0 %v10296_v1  ;;  %9264 = vmatpush3.bf16.msra.mxu1 %v10297_v4 }
 0x114   : > { %9243 = vmatprep.subr.bf16.mxu0 %v10298_v6  ;;  %9265 = vmatprep.subr.bf16.mxu1 %v10299_v7  ;;  %v10328_v7 = vld [vmem:[%s10946_s5 + $0x38] sm:$0xff]  }
 0x117   : > { %9244 = vmatpush3.bf16.msra.mxu0 %v10300_v8  ;;  %9266 = vmatpush3.bf16.msra.mxu1 %v10301_v9  ;;  %v10329_v8 = vld [vmem:[%s10946_s5 + $0xb8] sm:$0xff]   ;;  %v10330_v9 = vld [vmem:[%s10946_s5 + $0x70] sm:$0xff]  }
 0x118   : > { %9245 = vmatprep.subr.bf16.mxu0 %v10302_v10  ;;  %9267 = vmatprep.subr.bf16.mxu1 %v10303_v11  ;;  %v10331_v11 = vld [vmem:[%s10946_s5 + $0xf0] sm:$0xff]  }
 0x11b   : > { %9246 = vmatpush3.bf16.msra.mxu0 %v10304_v12  ;;  %9268 = vmatpush3.bf16.msra.mxu1 %v10305_v13  ;;  %v10332_v12 = vld [vmem:[%s10946_s5 + $0x30] sm:$0xff]  }
 0x11c   : > { %9247 = vmatprep.subr.bf16.mxu0 %v10306_v14  ;;  %9269 = vmatprep.subr.bf16.mxu1 %v10307_v15  ;;  %v10333_v13 = vld [vmem:[%s10946_s5 + $0xb0] sm:$0xff]   ;;  %v10334_v14 = vld [vmem:[%s10946_s5 + $0x68] sm:$0xff]  }
 0x11d   : > { %v10335_v15 = vld [vmem:[%s10946_s5 + $0xe8] sm:$0xff]  }
 0x11f   : > { %9248 = vmatpush3.bf16.msra.mxu0 %v10308_v16  ;;  %9270 = vmatpush3.bf16.msra.mxu1 %v10309_v17  ;;  %v10336_v16 = vld [vmem:[%s10946_s5 + $0x28] sm:$0xff]  }
 0x120   : > { %9249 = vmatprep.subr.bf16.mxu0 %v10310_v18  ;;  %9271 = vmatprep.subr.bf16.mxu1 %v10311_v2  ;;  %v10337_v17 = vld [vmem:[%s10946_s5 + $0xa8] sm:$0xff]   ;;  %v10338_v18 = vld [vmem:[%s10946_s5 + $0x60] sm:$0xff]  }
 0x121   : > { %v10339_v2 = vld [vmem:[%s10946_s5 + $0xe0] sm:$0xff]  }
 0x123   : > { %v1019_v23 = vpop.f32.mrf.mxu0  ;;  %9250 = vmatpush3.bf16.msra.mxu0 %v10312_v19  ;;  %9272 = vmatpush3.bf16.msra.mxu1 %v10313_v20  ;;  %v10340_v19 = vld [vmem:[%s10946_s5 + $0x20] sm:$0xff]  }
 0x124   : > { %v1020_v25 = vadd.f32 %v1019_v23, %v11406_v46  ;;  %9251 = vmatprep.subr.bf16.mxu0 %v10314_v21  ;;  %9273 = vmatprep.subr.bf16.mxu1 %v10315_v22  ;;  %v11486_v46 = vrot.slane %v11400_v42, %v937_v35  ;;  %v10327_v42 = vld [vmem:[%s10946_s5 + $0xf8] sm:$0xff]   ;;  %v10341_v20 = vld [vmem:[%s10946_s5 + $0xa0] sm:$0xff]  }
 0x125   : > { %v1021_v30 = vpop.f32.mrf.mxu0  ;;  %v10342_v21 = vld [vmem:[%s10946_s5 + $0x58] sm:$0xff]   ;;  %v10357_v35 = vld [vmem:[%s10946_s5 + $0x80] sm:$0xff]  }
 0x126   : > { %1263 = vst [vmem:[%s10951_s24 + $0x40] sm:$0xff] %v1020_v25  ;;  %v1022_v33 = vadd.f32 %v1021_v30, %v11412_v48  ;;  %v10343_v22 = vld [vmem:[%s10946_s5 + $0xd8] sm:$0xff]   ;;  %v10347_v25 = vld [vmem:[%s10946_s5 + $0xd0] sm:$0xff]   ;;  %v10352_v30 = vld [vmem:[%s10946_s5 + $0x8] sm:$0xff]  }
 0x127   : > { %v1096_v34 = vpop.f32.mrf.mxu1  ;;  %9252 = vmatpush3.bf16.msra.mxu0 %v10316_v3  ;;  %9274 = vmatpush3.bf16.msra.mxu1 %v10317_v24  ;;  %v10344_v3 = vld [vmem:[%s10946_s5 + $0x18] sm:$0xff]   ;;  %v10346_v24 = vld [vmem:[%s10946_s5 + $0x50] sm:$0xff]  }
 0x128   : > { %1264 = vst [vmem:[%s10951_s24 + $0x48] sm:$0xff] %v1022_v33  ;;  %v1097_v37 = vadd.f32 %v1096_v34, %v11409_v47  ;;  %9253 = vmatprep.subr.bf16.mxu0 %v10318_v28  ;;  %9275 = vmatprep.subr.bf16.mxu1 %v10319_v29  ;;  %v10324_v47 = vld [vmem:[%s10946_s5 + $0x300] sm:$0xff]   ;;  %v10345_v23 = vld [vmem:[%s10946_s5 + $0x98] sm:$0xff]   ;;  %v10350_v28 = vld [vmem:[%s10946_s5 + $0x48] sm:$0xff]  }
 0x129   : > { %v1098_v41 = vpop.f32.mrf.mxu1  ;;  %v10351_v29 = vld [vmem:[%s10946_s5 + $0xc8] sm:$0xff]   ;;  %v10355_v33 = vld [vmem:[%s10946_s5 + $0xc0] sm:$0xff]  }
 0x12a   : > { %1265 = vst [vmem:[%s10951_s24 + $0x50] sm:$0xff] %v1097_v37  ;;  %v1099_v40 = vadd.f32 %v1098_v41, %v11415_v49  ;;  %v10356_v34 = vld [vmem:[%s10946_s5] sm:$0xff]   ;;  %v10359_v37 = vld [vmem:[%s10946_s5 + $0x1f8] sm:$0xff]  }
 0x12b   : > { %9254 = vmatpush3.bf16.msra.mxu0 %v10320_v32  ;;  %9276 = vmatpush3.bf16.msra.mxu1 %v10321_v36  ;;  %v10354_v32 = vld [vmem:[%s10946_s5 + $0x40] sm:$0xff]   ;;  %v10358_v36 = vld [vmem:[%s10946_s5 + $0x178] sm:$0xff]  }
 0x12c   : > { %1266 = vst [vmem:[%s10951_s24 + $0x58] sm:$0xff] %v1099_v40  ;;  %v1167_v48 = vpop.f32.mrf.mxu0  ;;  %v1244_v50 = vpop.f32.mrf.mxu1  ;;  %9255 = vmatprep.subr.bf16.mxu0 %v10322_v38  ;;  %9277 = vmatprep.subr.bf16.mxu1 %v10323_v39  ;;  %v10360_v39 = vld [vmem:[%s10946_s5 + $0x138] sm:$0xff]  }
 0x12d   : > { %v1168_v49 = vadd.f32 %v1167_v48, %v11475_v43  ;;  %v1245_v53 = vadd.f32 %v1244_v50, %v11478_v44 }
 0x12e   : > { %v1169_v54 = vpop.f32.mrf.mxu0  ;;  %v1246_v55 = vpop.f32.mrf.mxu1 }
 0x12f   : > { %1259 = vst [vmem:[%s10951_s24 + $0x20] sm:$0xff] %v1168_v49  ;;  %1261 = vst [vmem:[%s10951_s24 + $0x30] sm:$0xff] %v1245_v53  ;;  %v11497_v57 = vpack.c.bf16 %v1245_v53, %v1245_v53  ;;  %v1170_v58 = vadd.f32 %v1169_v54, %v11483_v45  ;;  %v1247_v62 = vadd.f32 %v1246_v55, %v11486_v46  ;;  %9256 = vmatpush3.bf16.msra.mxu0 %v10324_v47  ;;  %v10361_v47 = vld [vmem:[%s10946_s5 + $0x1b8] sm:$0xff]   ;;  %v10368_v54 = vld [vmem:[%s10946_s5 + $0x128] sm:$0xff]  }
 0x130   : > { %v11501_v63 = vpack.c.bf16 %v1168_v49, %v1168_v49  ;;  %9278 = vmatpush3.bf16.msra.mxu1 %v10325_v51  ;;  %9285 = vmatprep.subr.bf16.mxu0 %v10326_v52  ;;  %v10362_v51 = vld [vmem:[%s10946_s5 + $0x170] sm:$0xff]   ;;  %v10369_v55 = vld [vmem:[%s10946_s5 + $0x1a8] sm:$0xff]  }
 0x131   : > { %1260 = vst [vmem:[%s10951_s24 + $0x28] sm:$0xff] %v1170_v58  ;;  %v11504_v0 = vpack.c.bf16 %v1170_v58, %v1170_v58  ;;  %1262 = vst [vmem:[%s10951_s24 + $0x38] sm:$0xff] %v1247_v62  ;;  %v11507_v1 = vpack.c.bf16 %v1247_v62, %v1247_v62  ;;  %9307 = vmatprep.subr.bf16.mxu1 %v10327_v42  ;;  %v1550_v4 = vrot.slane %v11497_v57, 1  ;;  %v1173_v38 = vpop.f32.mrf.mxu0  ;;  %v1250_v40 = vpop.f32.mrf.mxu1  ;;  %v10363_v52 = vld [vmem:[%s10946_s5 + $0x1f0] sm:$0xff]   ;;  %v10366_v42 = vld [vmem:[%s10946_s5 + $0x168] sm:$0xff]  }
 0x132   : > { %v1548_v10 = vrot.slane %v11501_v63, 1  ;;  %v1174_v41 = vadd.f32 %v1173_v38, %v11475_v43  ;;  %v1251_v50 = vadd.f32 %v1250_v40, %v11478_v44  ;;  %v10364_v44 = vld [vmem:[%s10946_s5 + $0x130] sm:$0xff]   ;;  %v10370_v58 = vld [vmem:[%s10946_s5 + $0x160] sm:$0xff]   ;;  %v10406_v38 = vld [vmem:[%s10946_s5 + $0x458] sm:$0xff]  }
 0x133   : > { %v1549_v5 = vrot.slane %v11504_v0, 1  ;;  %v1551_v6 = vrot.slane %v11507_v1, 1  ;;  %v1175_v48 = vpop.f32.mrf.mxu0  ;;  %v1252_v43 = vpop.f32.mrf.mxu1  ;;  %v10371_v62 = vld [vmem:[%s10946_s5 + $0x1e0] sm:$0xff]   ;;  %v10409_v40 = vld [vmem:[%s10946_s5 + $0x498] sm:$0xff]  }
 0x134   : > { %1267 = vst [vmem:[%s10951_s24 + $0x60] sm:$0xff] %v1174_v41  ;;  %v1176_v49 = vadd.f32 %v1175_v48, %v11483_v45  ;;  %1269 = vst [vmem:[%s10951_s24 + $0x70] sm:$0xff] %v1251_v50  ;;  %v1253_v53 = vadd.f32 %v1252_v43, %v11486_v46  ;;  %v10365_v45 = vld [vmem:[%s10946_s5 + $0x1b0] sm:$0xff]   ;;  %v10367_v46 = vld [vmem:[%s10946_s5 + $0x1e8] sm:$0xff]  }
 0x135   : > { %2056 = vmatprep.mubr.bf16.mxu0 %v1549_v5  ;;  %2096 = vmatprep.mubr.bf16.mxu1 %v1551_v6  ;;  %v10373_v5 = vld [vmem:[%s10946_s5 + $0x1a0] sm:$0xff]   ;;  %v10374_v6 = vld [vmem:[%s10946_s5 + $0x158] sm:$0xff]   ;;  %v10411_v48 = vld [vmem:[%s10946_s5 + $0x4d0] sm:$0xff]  }
 0x136   : > { %2057 = vmatmul.mubr.bf16.vlgmr.msra.gmra.mxu0 %v1548_v10  ;;  %2097 = vmatmul.mubr.bf16.vlgmr.msra.gmra.mxu1 %v1550_v4  ;;  %1268 = vst [vmem:[%s10951_s24 + $0x68] sm:$0xff] %v1176_v49  ;;  %1270 = vst [vmem:[%s10951_s24 + $0x78] sm:$0xff] %v1253_v53  ;;  %v10372_v4 = vld [vmem:[%s10946_s5 + $0x120] sm:$0xff]   ;;  %v10378_v10 = vld [vmem:[%s10946_s5 + $0x150] sm:$0xff]  }
 0x137   : > { %9286 = vmatpush3.bf16.msra.mxu0 %v10328_v7  ;;  %9308 = vmatpush3.bf16.msra.mxu1 %v10329_v8  ;;  %v10375_v7 = vld [vmem:[%s10946_s5 + $0x1d8] sm:$0xff]   ;;  %v10412_v50 = vld [vmem:[%s10946_s5 + $0x410] sm:$0xff]   ;;  %v10415_v49 = vld [vmem:[%s10946_s5 + $0x4c8] sm:$0xff]  }
 0x138   : > { %2520 = vmatprep.mubr.bf16.mxu0 %v11428_v60  ;;  %2560 = vmatprep.mubr.bf16.mxu1 %v11431_v61  ;;  %v10376_v8 = vld [vmem:[%s10946_s5 + $0x118] sm:$0xff]   ;;  %v10416_v43 = vld [vmem:[%s10946_s5 + $0x408] sm:$0xff]  }
 0x139   : > { %9287 = vmatprep.subr.bf16.mxu0 %v10330_v9  ;;  %9309 = vmatprep.subr.bf16.mxu1 %v10331_v11  ;;  %v10377_v9 = vld [vmem:[%s10946_s5 + $0x198] sm:$0xff]   ;;  %v10379_v11 = vld [vmem:[%s10946_s5 + $0x1d0] sm:$0xff]   ;;  %v10417_v53 = vld [vmem:[%s10946_s5 + $0x488] sm:$0xff]  }
 0x13a   : > { %v10408_v41 = vld [vmem:[%s10946_s5 + $0x418] sm:$0xff]  }
 0x13b   : > { %9288 = vmatpush3.bf16.msra.mxu0 %v10332_v12  ;;  %9310 = vmatpush3.bf16.msra.mxu1 %v10333_v13  ;;  %v10380_v12 = vld [vmem:[%s10946_s5 + $0x110] sm:$0xff]  }
 0x13c   : > { %9289 = vmatprep.subr.bf16.mxu0 %v10334_v14  ;;  %9311 = vmatprep.subr.bf16.mxu1 %v10335_v15  ;;  %v10381_v13 = vld [vmem:[%s10946_s5 + $0x190] sm:$0xff]   ;;  %v10382_v14 = vld [vmem:[%s10946_s5 + $0x148] sm:$0xff]  }
 0x13d   : > { %v10383_v15 = vld [vmem:[%s10946_s5 + $0x1c8] sm:$0xff]  }
 0x13f   : > { %9290 = vmatpush3.bf16.msra.mxu0 %v10336_v16  ;;  %9312 = vmatpush3.bf16.msra.mxu1 %v10337_v17  ;;  %v10384_v16 = vld [vmem:[%s10946_s5 + $0x108] sm:$0xff]  }
 0x140   : > { %9291 = vmatprep.subr.bf16.mxu0 %v10338_v18  ;;  %9313 = vmatprep.subr.bf16.mxu1 %v10339_v2  ;;  %v10385_v17 = vld [vmem:[%s10946_s5 + $0x188] sm:$0xff]   ;;  %v10386_v18 = vld [vmem:[%s10946_s5 + $0x140] sm:$0xff]  }
 0x141   : > { %v10387_v2 = vld [vmem:[%s10946_s5 + $0x1c0] sm:$0xff]  }
 0x143   : > { %9292 = vmatpush3.bf16.msra.mxu0 %v10340_v19  ;;  %9314 = vmatpush3.bf16.msra.mxu1 %v10341_v20  ;;  %v10388_v19 = vld [vmem:[%s10946_s5 + $0x100] sm:$0xff]  }
 0x144   : > { %9293 = vmatprep.subr.bf16.mxu0 %v10342_v21  ;;  %9315 = vmatprep.subr.bf16.mxu1 %v10343_v22  ;;  %v10389_v20 = vld [vmem:[%s10946_s5 + $0x180] sm:$0xff]   ;;  %v10390_v21 = vld [vmem:[%s10946_s5 + $0x478] sm:$0xff]  }
 0x145   : > { %v10391_v22 = vld [vmem:[%s10946_s5 + $0x4f8] sm:$0xff]  }
 0x147   : > { %9294 = vmatpush3.bf16.msra.mxu0 %v10344_v3  ;;  %9316 = vmatpush3.bf16.msra.mxu1 %v10345_v23  ;;  %v10392_v3 = vld [vmem:[%s10946_s5 + $0x438] sm:$0xff]  }
 0x148   : > { %9295 = vmatprep.subr.bf16.mxu0 %v10346_v24  ;;  %9317 = vmatprep.subr.bf16.mxu1 %v10347_v25  ;;  %v10393_v23 = vld [vmem:[%s10946_s5 + $0x4b8] sm:$0xff]   ;;  %v2778_v24 = vrot.slane %v11428_v60, 2  ;;  %v10394_v25 = vld [vmem:[%s10946_s5 + $0x470] sm:$0xff]  }
 0x14b   : > { %9296 = vmatpush3.bf16.msra.mxu0 %v10348_v26  ;;  %9318 = vmatpush3.bf16.msra.mxu1 %v10349_v27  ;;  %v10395_v26 = vld [vmem:[%s10946_s5 + $0x4f0] sm:$0xff]   ;;  %v2780_v27 = vrot.slane %v11431_v61, 2 }
 0x14c   : > { %9297 = vmatprep.subr.bf16.mxu0 %v10350_v28  ;;  %9319 = vmatprep.subr.bf16.mxu1 %v10351_v29  ;;  %v10396_v28 = vld [vmem:[%s10946_s5 + $0x430] sm:$0xff]  }
 0x14d   : > { %v10397_v29 = vld [vmem:[%s10946_s5 + $0x4b0] sm:$0xff]  }
 0x14f   : > { %9298 = vmatpush3.bf16.msra.mxu0 %v10352_v30  ;;  %9320 = vmatpush3.bf16.msra.mxu1 %v10353_v31  ;;  %v10398_v30 = vld [vmem:[%s10946_s5 + $0x468] sm:$0xff]  }
 0x150   : > { %9299 = vmatprep.subr.bf16.mxu0 %v10354_v32  ;;  %9321 = vmatprep.subr.bf16.mxu1 %v10355_v33  ;;  %v10399_v31 = vld [vmem:[%s10946_s5 + $0x4e8] sm:$0xff]  }
 0x151   : > { %v10400_v32 = vld [vmem:[%s10946_s5 + $0x428] sm:$0xff]  }
 0x152   : > { %v10401_v33 = vld [vmem:[%s10946_s5 + $0x4a8] sm:$0xff]  }
 0x153   : > { %9300 = vmatpush3.bf16.msra.mxu0 %v10356_v34  ;;  %9322 = vmatpush3.bf16.msra.mxu1 %v10357_v35  ;;  %v10402_v34 = vld [vmem:[%s10946_s5 + $0x460] sm:$0xff]  }
 0x154   : > { %9329 = vmatprep.subr.bf16.mxu0 %v10358_v36  ;;  %9351 = vmatprep.subr.bf16.mxu1 %v10359_v37  ;;  %v10403_v35 = vld [vmem:[%s10946_s5 + $0x4e0] sm:$0xff]  }
 0x155   : > { %v10404_v36 = vld [vmem:[%s10946_s5 + $0x420] sm:$0xff]  }
 0x156   : > { %2521 = vmatmul.mubr.bf16.vlgmr.msra.gmra.mxu0 %v11425_v59  ;;  %2561 = vmatmul.mubr.bf16.vlgmr.msra.gmra.mxu1 %v11421_v56  ;;  %v10405_v37 = vld [vmem:[%s10946_s5 + $0x4a0] sm:$0xff]  }
 0x157   : > { %9330 = vmatpush3.bf16.msra.mxu0 %v10360_v39  ;;  %2600 = vmatprep.mubr.bf16.mxu0 %v11504_v0  ;;  %v10407_v39 = vld [vmem:[%s10946_s5 + $0x4d8] sm:$0xff]  }
 0x158   : > { %9352 = vmatpush3.bf16.msra.mxu1 %v10361_v47  ;;  %2640 = vmatprep.mubr.bf16.mxu1 %v11507_v1  ;;  %v10410_v47 = vld [vmem:[%s10946_s5 + $0x450] sm:$0xff]  }
 0x159   : > { %9331 = vmatprep.subr.bf16.mxu0 %v10362_v51  ;;  %9353 = vmatprep.subr.bf16.mxu1 %v10363_v52  ;;  %v10413_v51 = vld [vmem:[%s10946_s5 + $0x490] sm:$0xff]   ;;  %v10414_v52 = vld [vmem:[%s10946_s5 + $0x448] sm:$0xff]  }
 0x15b   : > { %9332 = vmatpush3.bf16.msra.mxu0 %v10364_v44  ;;  %v10418_v44 = vld [vmem:[%s10946_s5 + $0x440] sm:$0xff]  }
 0x15c   : > { %9354 = vmatpush3.bf16.msra.mxu1 %v10365_v45  ;;  %9333 = vmatprep.subr.bf16.mxu0 %v10366_v42  ;;  %v10419_v45 = vld [vmem:[%s10946_s5 + $0x4c0] sm:$0xff]  }
 0x15d   : > { %9355 = vmatprep.subr.bf16.mxu1 %v10367_v46  ;;  %v10420_v42 = vld [vmem:[%s10946_s5 + $0x400] sm:$0xff]  }
 0x15e   : > { %v10421_v46 = vld [vmem:[%s10946_s5 + $0x480] sm:$0xff]  }
 0x15f   : > { %9334 = vmatpush3.bf16.msra.mxu0 %v10368_v54  ;;  %v2777_v54 = vrot.slane %v11425_v59, 2 }
 0x160   : > { %9356 = vmatpush3.bf16.msra.mxu1 %v10369_v55  ;;  %9335 = vmatprep.subr.bf16.mxu0 %v10370_v58  ;;  %v10422_v55 = vld [vmem:[%s10946_s5 + $0x578] sm:$0xff]  }
 0x161   : > { %9357 = vmatprep.subr.bf16.mxu1 %v10371_v62  ;;  %v10423_v58 = vld [vmem:[%s10946_s5 + $0x5f8] sm:$0xff]   ;;  %v2779_v62 = vrot.slane %v11421_v56, 2 }
 0x163   : > { %9336 = vmatpush3.bf16.msra.mxu0 %v10372_v4  ;;  %v10424_v4 = vld [vmem:[%s10946_s5 + $0x538] sm:$0xff]  }
 0x164   : > { %9358 = vmatpush3.bf16.msra.mxu1 %v10373_v5  ;;  %9337 = vmatprep.subr.bf16.mxu0 %v10374_v6  ;;  %v10425_v5 = vld [vmem:[%s10946_s5 + $0x5b8] sm:$0xff]   ;;  %v2782_v6 = vrot.slane %v11504_v0, 2 }
 0x165   : > { %9359 = vmatprep.subr.bf16.mxu1 %v10375_v7  ;;  %v10426_v7 = vld [vmem:[%s10946_s5 + $0x570] sm:$0xff]  }
 0x167   : > { %9338 = vmatpush3.bf16.msra.mxu0 %v10376_v8  ;;  %v10427_v8 = vld [vmem:[%s10946_s5 + $0x5f0] sm:$0xff]  }
 0x168   : > { %9360 = vmatpush3.bf16.msra.mxu1 %v10377_v9  ;;  %9339 = vmatprep.subr.bf16.mxu0 %v10378_v10  ;;  %v2784_v9 = vrot.slane %v11507_v1, 2  ;;  %v10428_v10 = vld [vmem:[%s10946_s5 + $0x530] sm:$0xff]  }
 0x169   : > { %9361 = vmatprep.subr.bf16.mxu1 %v10379_v11  ;;  %v10429_v11 = vld [vmem:[%s10946_s5 + $0x5b0] sm:$0xff]  }
 0x16b   : > { %9340 = vmatpush3.bf16.msra.mxu0 %v10380_v12  ;;  %v10430_v12 = vld [vmem:[%s10946_s5 + $0x568] sm:$0xff]  }
 0x16c   : > { %9362 = vmatpush3.bf16.msra.mxu1 %v10381_v13  ;;  %9341 = vmatprep.subr.bf16.mxu0 %v10382_v14  ;;  %v10431_v13 = vld [vmem:[%s10946_s5 + $0x5e8] sm:$0xff]  }
 0x16d   : > { %9363 = vmatprep.subr.bf16.mxu1 %v10383_v15  ;;  %v10432_v14 = vld [vmem:[%s10946_s5 + $0x528] sm:$0xff]  }
 0x16e   : > { %v10433_v15 = vld [vmem:[%s10946_s5 + $0x5a8] sm:$0xff]  }
 0x16f   : > { %9342 = vmatpush3.bf16.msra.mxu0 %v10384_v16  ;;  %v10434_v16 = vld [vmem:[%s10946_s5 + $0x560] sm:$0xff]  }
 0x170   : > { %9364 = vmatpush3.bf16.msra.mxu1 %v10385_v17  ;;  %9343 = vmatprep.subr.bf16.mxu0 %v10386_v18  ;;  %v10435_v17 = vld [vmem:[%s10946_s5 + $0x5e0] sm:$0xff]  }
 0x171   : > { %9365 = vmatprep.subr.bf16.mxu1 %v10387_v2  ;;  %v10436_v18 = vld [vmem:[%s10946_s5 + $0x520] sm:$0xff]  }
 0x172   : > { %v10437_v2 = vld [vmem:[%s10946_s5 + $0x5a0] sm:$0xff]  }
 0x173   : > { %9344 = vmatpush3.bf16.msra.mxu0 %v10388_v19  ;;  %v10438_v19 = vld [vmem:[%s10946_s5 + $0x558] sm:$0xff]  }
 0x174   : > { %9366 = vmatpush3.bf16.msra.mxu1 %v10389_v20  ;;  %9373 = vmatprep.subr.bf16.mxu0 %v10390_v21  ;;  %v10439_v20 = vld [vmem:[%s10946_s5 + $0x5d8] sm:$0xff]  }
 0x175   : > { %9395 = vmatprep.subr.bf16.mxu1 %v10391_v22  ;;  %v10440_v21 = vld [vmem:[%s10946_s5 + $0x518] sm:$0xff]  }
 0x176   : > { %2601 = vmatmul.mubr.bf16.vlgmr.msra.gmra.mxu0 %v11501_v63  ;;  %v10441_v22 = vld [vmem:[%s10946_s5 + $0x598] sm:$0xff]  }
 0x177   : > { %2641 = vmatmul.mubr.bf16.vlgmr.msra.gmra.mxu1 %v11497_v57  ;;  %9374 = vmatpush3.bf16.msra.mxu0 %v10392_v3  ;;  %v10442_v3 = vld [vmem:[%s10946_s5 + $0x550] sm:$0xff]  }
 0x178   : > { %3209 = vmatprep.mubr.bf16.mxu0 %v2778_v24  ;;  %9396 = vmatpush3.bf16.msra.mxu1 %v10393_v23  ;;  %v10443_v23 = vld [vmem:[%s10946_s5 + $0x5d0] sm:$0xff]  }
 0x179   : > { %3249 = vmatprep.mubr.bf16.mxu1 %v2780_v27  ;;  %9375 = vmatprep.subr.bf16.mxu0 %v10394_v25  ;;  %v10444_v24 = vld [vmem:[%s10946_s5 + $0x510] sm:$0xff]   ;;  %v10447_v27 = vld [vmem:[%s10946_s5 + $0x5c8] sm:$0xff]  }
 0x17a   : > { %9397 = vmatprep.subr.bf16.mxu1 %v10395_v26  ;;  %v10445_v25 = vld [vmem:[%s10946_s5 + $0x590] sm:$0xff]   ;;  %v10446_v26 = vld [vmem:[%s10946_s5 + $0x548] sm:$0xff]  }
 0x17b   : > { %9376 = vmatpush3.bf16.msra.mxu0 %v10396_v28  ;;  %v10448_v28 = vld [vmem:[%s10946_s5 + $0x508] sm:$0xff]  }
 0x17c   : > { %9398 = vmatpush3.bf16.msra.mxu1 %v10397_v29  ;;  %9377 = vmatprep.subr.bf16.mxu0 %v10398_v30  ;;  %v10449_v29 = vld [vmem:[%s10946_s5 + $0x588] sm:$0xff]   ;;  %v10450_v30 = vld [vmem:[%s10946_s5 + $0x540] sm:$0xff]  }
 0x17d   : > { %9399 = vmatprep.subr.bf16.mxu1 %v10399_v31  ;;  %v10451_v31 = vld [vmem:[%s10946_s5 + $0x5c0] sm:$0xff]  }
 0x17f   : > { %9378 = vmatpush3.bf16.msra.mxu0 %v10400_v32  ;;  %v10452_v32 = vld [vmem:[%s10946_s5 + $0x500] sm:$0xff]  }
 0x180   : > { %9400 = vmatpush3.bf16.msra.mxu1 %v10401_v33  ;;  %9379 = vmatprep.subr.bf16.mxu0 %v10402_v34  ;;  %v10453_v33 = vld [vmem:[%s10946_s5 + $0x580] sm:$0xff]   ;;  %v10454_v34 = vld [vmem:[%s10946_s5 + $0x678] sm:$0xff]  }
 0x181   : > { %9401 = vmatprep.subr.bf16.mxu1 %v10403_v35  ;;  %v10455_v35 = vld [vmem:[%s10946_s5 + $0x6f8] sm:$0xff]  }
 0x183   : > { %9380 = vmatpush3.bf16.msra.mxu0 %v10404_v36  ;;  %v3468_v36 = vrot.slane %v11428_v60, 3  ;;  %v3470_v60 = vrot.slane %v11431_v61, 3  ;;  %v10465_v61 = vld [vmem:[%s10946_s5 + $0x6a8] sm:$0xff]  }
 0x184   : > { %9402 = vmatpush3.bf16.msra.mxu1 %v10405_v37  ;;  %9381 = vmatprep.subr.bf16.mxu0 %v10406_v38  ;;  %v2781_v37 = vrot.slane %v11501_v63, 2  ;;  %v10456_v38 = vld [vmem:[%s10946_s5 + $0x638] sm:$0xff]  }
 0x185   : > { %9403 = vmatprep.subr.bf16.mxu1 %v10407_v39  ;;  %v10457_v39 = vld [vmem:[%s10946_s5 + $0x6b8] sm:$0xff]  }
 0x187   : > { %9382 = vmatpush3.bf16.msra.mxu0 %v10408_v41  ;;  %v2783_v41 = vrot.slane %v11497_v57, 2 }
 0x188   : > { %9404 = vmatpush3.bf16.msra.mxu1 %v10409_v40  ;;  %9383 = vmatprep.subr.bf16.mxu0 %v10410_v47  ;;  %v10458_v40 = vld [vmem:[%s10946_s5 + $0x670] sm:$0xff]  }
 0x189   : > { %9405 = vmatprep.subr.bf16.mxu1 %v10411_v48  ;;  %v10459_v47 = vld [vmem:[%s10946_s5 + $0x6f0] sm:$0xff]  }
 0x18a   : > { %v10460_v48 = vld [vmem:[%s10946_s5 + $0x630] sm:$0xff]  }
 0x18b   : > { %9384 = vmatpush3.bf16.msra.mxu0 %v10412_v50  ;;  %v10461_v50 = vld [vmem:[%s10946_s5 + $0x6b0] sm:$0xff]  }
 0x18c   : > { %9406 = vmatpush3.bf16.msra.mxu1 %v10413_v51  ;;  %9385 = vmatprep.subr.bf16.mxu0 %v10414_v52  ;;  %v10462_v51 = vld [vmem:[%s10946_s5 + $0x668] sm:$0xff]  }
 0x18d   : > { %9407 = vmatprep.subr.bf16.mxu1 %v10415_v49  ;;  %v10463_v52 = vld [vmem:[%s10946_s5 + $0x6e8] sm:$0xff]  }
 0x18e   : > { %v10464_v49 = vld [vmem:[%s10946_s5 + $0x628] sm:$0xff]  }
 0x18f   : > { %9386 = vmatpush3.bf16.msra.mxu0 %v10416_v43  ;;  %v10466_v43 = vld [vmem:[%s10946_s5 + $0x660] sm:$0xff]  }
 0x190   : > { %9408 = vmatpush3.bf16.msra.mxu1 %v10417_v53  ;;  %9387 = vmatprep.subr.bf16.mxu0 %v10418_v44  ;;  %v10467_v53 = vld [vmem:[%s10946_s5 + $0x6e0] sm:$0xff]  }
 0x191   : > { %9409 = vmatprep.subr.bf16.mxu1 %v10419_v45  ;;  %v10468_v44 = vld [vmem:[%s10946_s5 + $0x620] sm:$0xff]  }
 0x192   : > { %v10469_v45 = vld [vmem:[%s10946_s5 + $0x6a0] sm:$0xff]  }
 0x193   : > { %9388 = vmatpush3.bf16.msra.mxu0 %v10420_v42  ;;  %v10470_v42 = vld [vmem:[%s10946_s5 + $0x658] sm:$0xff]  }
 0x194   : > { %9410 = vmatpush3.bf16.msra.mxu1 %v10421_v46  ;;  %9417 = vmatprep.subr.bf16.mxu0 %v10422_v55  ;;  %v10471_v46 = vld [vmem:[%s10946_s5 + $0x6d8] sm:$0xff]  }
 0x195   : > { %9439 = vmatprep.subr.bf16.mxu1 %v10423_v58  ;;  %v10473_v55 = vld [vmem:[%s10946_s5 + $0x698] sm:$0xff]   ;;  %v10474_v58 = vld [vmem:[%s10946_s5 + $0x650] sm:$0xff]  }
 0x196   : > { %3210 = vmatmul.mubr.bf16.vlgmr.msra.gmra.mxu0 %v2777_v54  ;;  %v10472_v54 = vld [vmem:[%s10946_s5 + $0x618] sm:$0xff]  }
 0x197   : > { %3250 = vmatmul.mubr.bf16.vlgmr.msra.gmra.mxu1 %v2779_v62  ;;  %9418 = vmatpush3.bf16.msra.mxu0 %v10424_v4  ;;  %v10475_v62 = vld [vmem:[%s10946_s5 + $0x6d0] sm:$0xff]  }
 0x198   : > { %3289 = vmatprep.mubr.bf16.mxu0 %v2782_v6  ;;  %9440 = vmatpush3.bf16.msra.mxu1 %v10425_v5  ;;  %v10476_v4 = vld [vmem:[%s10946_s5 + $0x610] sm:$0xff]   ;;  %v10478_v6 = vld [vmem:[%s10946_s5 + $0x648] sm:$0xff]  }
 0x199   : > { %3329 = vmatprep.mubr.bf16.mxu1 %v2784_v9  ;;  %9419 = vmatprep.subr.bf16.mxu0 %v10426_v7  ;;  %v10477_v5 = vld [vmem:[%s10946_s5 + $0x690] sm:$0xff]   ;;  %v10479_v7 = vld [vmem:[%s10946_s5 + $0x6c8] sm:$0xff]  }
 0x19a   : > { %9441 = vmatprep.subr.bf16.mxu1 %v10427_v8  ;;  %v10480_v8 = vld [vmem:[%s10946_s5 + $0x608] sm:$0xff]  }
 0x19b   : > { %9420 = vmatpush3.bf16.msra.mxu0 %v10428_v10  ;;  %v10481_v9 = vld [vmem:[%s10946_s5 + $0x688] sm:$0xff]   ;;  %v10482_v10 = vld [vmem:[%s10946_s5 + $0x640] sm:$0xff]  }
 0x19c   : > { %9442 = vmatpush3.bf16.msra.mxu1 %v10429_v11  ;;  %9421 = vmatprep.subr.bf16.mxu0 %v10430_v12  ;;  %v10483_v11 = vld [vmem:[%s10946_s5 + $0x6c0] sm:$0xff]  }
 0x19d   : > { %9443 = vmatprep.subr.bf16.mxu1 %v10431_v13  ;;  %v10484_v12 = vld [vmem:[%s10946_s5 + $0x600] sm:$0xff]  }
 0x19e   : > { %v10485_v13 = vld [vmem:[%s10946_s5 + $0x680] sm:$0xff]  }
 0x19f   : > { %9422 = vmatpush3.bf16.msra.mxu0 %v10432_v14  ;;  %v3467_v14 = vrot.slane %v11425_v59, 3 }
 0x1a0   : > { %9444 = vmatpush3.bf16.msra.mxu1 %v10433_v15  ;;  %9423 = vmatprep.subr.bf16.mxu0 %v10434_v16  ;;  %v10486_v15 = vld [vmem:[%s10946_s5 + $0x778] sm:$0xff]  }
 0x1a1   : > { %9445 = vmatprep.subr.bf16.mxu1 %v10435_v17  ;;  %v10487_v16 = vld [vmem:[%s10946_s5 + $0x7f8] sm:$0xff]   ;;  %v3469_v17 = vrot.slane %v11421_v56, 3 }
 0x1a3   : > { %9424 = vmatpush3.bf16.msra.mxu0 %v10436_v18  ;;  %v10488_v18 = vld [vmem:[%s10946_s5 + $0x738] sm:$0xff]  }
 0x1a4   : > { %9446 = vmatpush3.bf16.msra.mxu1 %v10437_v2  ;;  %9425 = vmatprep.subr.bf16.mxu0 %v10438_v19 }
 0x1a5   : > { %9447 = vmatprep.subr.bf16.mxu1 %v10439_v20  ;;  %v10489_v20 = vld [vmem:[%s10946_s5 + $0x7b8] sm:$0xff]  }
 0x1a7   : > { %9426 = vmatpush3.bf16.msra.mxu0 %v10440_v21  ;;  %v3472_v21 = vrot.slane %v11504_v0, 3  ;;  %v3474_v0 = vrot.slane %v11507_v1, 3  ;;  %v10496_v1 = vld [vmem:[%s10946_s5 + $0x728] sm:$0xff]  }
 0x1a8   : > { %9448 = vmatpush3.bf16.msra.mxu1 %v10441_v22  ;;  %9427 = vmatprep.subr.bf16.mxu0 %v10442_v3  ;;  %v10490_v22 = vld [vmem:[%s10946_s5 + $0x770] sm:$0xff]  }
 0x1a9   : > { %9449 = vmatprep.subr.bf16.mxu1 %v10443_v23  ;;  %v10491_v23 = vld [vmem:[%s10946_s5 + $0x7f0] sm:$0xff]  }
 0x1ab   : > { %9428 = vmatpush3.bf16.msra.mxu0 %v10444_v24 }
 0x1ac   : > { %9450 = vmatpush3.bf16.msra.mxu1 %v10445_v25  ;;  %9429 = vmatprep.subr.bf16.mxu0 %v10446_v26 }
 0x1ad   : > { %9451 = vmatprep.subr.bf16.mxu1 %v10447_v27 }
 0x1af   : > { %9430 = vmatpush3.bf16.msra.mxu0 %v10448_v28  ;;  %v10492_v28 = vld [vmem:[%s10946_s5 + $0x730] sm:$0xff]  }
 0x1b0   : > { %9452 = vmatpush3.bf16.msra.mxu1 %v10449_v29  ;;  %9431 = vmatprep.subr.bf16.mxu0 %v10450_v30  ;;  %v10493_v29 = vld [vmem:[%s10946_s5 + $0x7b0] sm:$0xff]   ;;  %v10494_v30 = vld [vmem:[%s10946_s5 + $0x768] sm:$0xff]  }
 0x1b1   : > { %9453 = vmatprep.subr.bf16.mxu1 %v10451_v31 }
 0x1b3   : > { %9432 = vmatpush3.bf16.msra.mxu0 %v10452_v32 }
 0x1b4   : > { %9454 = vmatpush3.bf16.msra.mxu1 %v10453_v33  ;;  %9461 = vmatprep.subr.bf16.mxu0 %v10454_v34  ;;  %v10495_v33 = vld [vmem:[%s10946_s5 + $0x7e8] sm:$0xff]  }
 0x1b5   : > { %9483 = vmatprep.subr.bf16.mxu1 %v10455_v35  ;;  %v10497_v34 = vld [vmem:[%s10946_s5 + $0x7a8] sm:$0xff]   ;;  %v10498_v35 = vld [vmem:[%s10946_s5 + $0x760] sm:$0xff]  }
 0x1b6   : > { %3290 = vmatmul.mubr.bf16.vlgmr.msra.gmra.mxu0 %v2781_v37  ;;  %v10500_v37 = vld [vmem:[%s10946_s5 + $0x720] sm:$0xff]  }
 0x1b7   : > { %3330 = vmatmul.mubr.bf16.vlgmr.msra.gmra.mxu1 %v2783_v41  ;;  %9462 = vmatpush3.bf16.msra.mxu0 %v10456_v38  ;;  %v10501_v38 = vld [vmem:[%s10946_s5 + $0x7a0] sm:$0xff]   ;;  %v10503_v41 = vld [vmem:[%s10946_s5 + $0x7d8] sm:$0xff]  }
 0x1b8   : > { %3899 = vmatprep.mubr.bf16.mxu0 %v3468_v36  ;;  %9484 = vmatpush3.bf16.msra.mxu1 %v10457_v39  ;;  %v10499_v36 = vld [vmem:[%s10946_s5 + $0x7e0] sm:$0xff]   ;;  %v10502_v39 = vld [vmem:[%s10946_s5 + $0x758] sm:$0xff]  }
 0x1b9   : > { %3939 = vmatprep.mubr.bf16.mxu1 %v3470_v60  ;;  %9463 = vmatprep.subr.bf16.mxu0 %v10458_v40  ;;  %v10504_v40 = vld [vmem:[%s10946_s5 + $0x718] sm:$0xff]   ;;  %v10506_v60 = vld [vmem:[%s10946_s5 + $0x750] sm:$0xff]  }
 0x1ba   : > { %9485 = vmatprep.subr.bf16.mxu1 %v10459_v47  ;;  %v10505_v47 = vld [vmem:[%s10946_s5 + $0x798] sm:$0xff]  }
 0x1bb   : > { %9464 = vmatpush3.bf16.msra.mxu0 %v10460_v48  ;;  %v10507_v48 = vld [vmem:[%s10946_s5 + $0x7d0] sm:$0xff]  }
 0x1bc   : > { %9486 = vmatpush3.bf16.msra.mxu1 %v10461_v50  ;;  %9465 = vmatprep.subr.bf16.mxu0 %v10462_v51  ;;  %v10508_v50 = vld [vmem:[%s10946_s5 + $0x710] sm:$0xff]  }
 0x1bd   : > { %9487 = vmatprep.subr.bf16.mxu1 %v10463_v52  ;;  %v10509_v51 = vld [vmem:[%s10946_s5 + $0x790] sm:$0xff]   ;;  %v10510_v52 = vld [vmem:[%s10946_s5 + $0x748] sm:$0xff]  }
 0x1bf   : > { %9466 = vmatpush3.bf16.msra.mxu0 %v10464_v49  ;;  %v10511_v49 = vld [vmem:[%s10946_s5 + $0x7c8] sm:$0xff]  }
 0x1c0   : > { %9488 = vmatpush3.bf16.msra.mxu1 %v10465_v61  ;;  %9467 = vmatprep.subr.bf16.mxu0 %v10466_v43  ;;  %v10512_v61 = vld [vmem:[%s10946_s5 + $0x708] sm:$0xff]  }
 0x1c1   : > { %9489 = vmatprep.subr.bf16.mxu1 %v10467_v53  ;;  %v10513_v43 = vld [vmem:[%s10946_s5 + $0x788] sm:$0xff]   ;;  %v10514_v53 = vld [vmem:[%s10946_s5 + $0x740] sm:$0xff]  }
 0x1c3   : > { %9468 = vmatpush3.bf16.msra.mxu0 %v10468_v44  ;;  %v10515_v44 = vld [vmem:[%s10946_s5 + $0x7c0] sm:$0xff]  }
 0x1c4   : > { %9490 = vmatpush3.bf16.msra.mxu1 %v10469_v45  ;;  %9469 = vmatprep.subr.bf16.mxu0 %v10470_v42  ;;  %v10516_v45 = vld [vmem:[%s10946_s5 + $0x700] sm:$0xff]  }
 0x1c5   : > { %9491 = vmatprep.subr.bf16.mxu1 %v10471_v46  ;;  %v10517_v42 = vld [vmem:[%s10946_s5 + $0x780] sm:$0xff]   ;;  %v10518_v46 = vld [vmem:[%s10946_s5 + $0x878] sm:$0xff]  }
 0x1c7   : > { %9470 = vmatpush3.bf16.msra.mxu0 %v10472_v54  ;;  %v10519_v54 = vld [vmem:[%s10946_s5 + $0x8f8] sm:$0xff]  }
 0x1c8   : > { %9492 = vmatpush3.bf16.msra.mxu1 %v10473_v55  ;;  %9471 = vmatprep.subr.bf16.mxu0 %v10474_v58  ;;  %v3471_v55 = vrot.slane %v11501_v63, 3  ;;  %v10520_v58 = vld [vmem:[%s10946_s5 + $0x838] sm:$0xff]  }
 0x1c9   : > { %9493 = vmatprep.subr.bf16.mxu1 %v10475_v62  ;;  %v10521_v62 = vld [vmem:[%s10946_s5 + $0x8b8] sm:$0xff]  }
 0x1cb   : > { %9472 = vmatpush3.bf16.msra.mxu0 %v10476_v4  ;;  %v3473_v4 = vrot.slane %v11497_v57, 3  ;;  %v10524_v57 = vld [vmem:[%s10946_s5 + $0x830] sm:$0xff]  }
 0x1cc   : > { %9494 = vmatpush3.bf16.msra.mxu1 %v10477_v5  ;;  %9473 = vmatprep.subr.bf16.mxu0 %v10478_v6  ;;  %v10522_v5 = vld [vmem:[%s10946_s5 + $0x870] sm:$0xff]  }
 0x1cd   : > { %9495 = vmatprep.subr.bf16.mxu1 %v10479_v7  ;;  %v10523_v6 = vld [vmem:[%s10946_s5 + $0x8f0] sm:$0xff]   ;;  %v10774_v7 = vld [vmem:[%s10951_s24 + $0x48] sm:$0xff] }
 0x1cf   : > { %9474 = vmatpush3.bf16.msra.mxu0 %v10480_v8  ;;  %v11744_v8 = vpack.c.bf16 %v10774_v7, %v10774_v7 }
 0x1d0   : > { %9496 = vmatpush3.bf16.msra.mxu1 %v10481_v9  ;;  %9475 = vmatprep.subr.bf16.mxu0 %v10482_v10  ;;  %v10775_v10 = vld [vmem:[%s10951_s24 + $0x58] sm:$0xff] }
 0x1d1   : > { %9497 = vmatprep.subr.bf16.mxu1 %v10483_v11  ;;  %v11747_v11 = vpack.c.bf16 %v10775_v10, %v10775_v10 }
 0x1d2   : > { %v9213_v2 = vpop.f32.mrf.mxu0  ;;  %v9235_v19 = vpop.f32.mrf.mxu1 }
 0x1d3   : > { %9476 = vmatpush3.bf16.msra.mxu0 %v10484_v12  ;;  %v10525_v12 = vld [vmem:[%s10946_s5 + $0x8b0] sm:$0xff]  }
 0x1d4   : > { %9498 = vmatpush3.bf16.msra.mxu1 %v10485_v13  ;;  %9505 = vmatprep.subr.bf16.mxu0 %v10486_v15  ;;  %v9214_v59 = vpop.f32.mrf.mxu0  ;;  %v9236_v3 = vpop.f32.mrf.mxu1  ;;  %v10526_v13 = vld [vmem:[%s10946_s5 + $0x868] sm:$0xff]  }
 0x1d5   : > { %9527 = vmatprep.subr.bf16.mxu1 %v10487_v16  ;;  %v9215_v24 = vadd.f32 %v9214_v59, %v9213_v2  ;;  %v9237_v56 = vadd.f32 %v9236_v3, %v9235_v19  ;;  %v10527_v16 = vld [vmem:[%s10946_s5 + $0x8e8] sm:$0xff]  }
 0x1d6   : > { %3900 = vmatmul.mubr.bf16.vlgmr.msra.gmra.mxu0 %v3467_v14  ;;  %v9216_v25 = vpop.f32.mrf.mxu0  ;;  %v9238_v26 = vpop.f32.mrf.mxu1  ;;  %v10528_v2 = vld [vmem:[%s10946_s5 + $0x828] sm:$0xff]  }
 0x1d7   : > { %3940 = vmatmul.mubr.bf16.vlgmr.msra.gmra.mxu1 %v3469_v17  ;;  %9506 = vmatpush3.bf16.msra.mxu0 %v10488_v18  ;;  %v11707_v27 = vadd.f32 %v9237_v56, %v9215_v24  ;;  %v10529_v3 = vld [vmem:[%s10946_s5 + $0x8a8] sm:$0xff]   ;;  %v10531_v56 = vld [vmem:[%s10946_s5 + $0x8e0] sm:$0xff]  }
 0x1d8   : > { %3979 = vmatprep.mubr.bf16.mxu0 %v3472_v21  ;;  %9528 = vmatpush3.bf16.msra.mxu1 %v10489_v20  ;;  %v9217_v31 = vpop.f32.mrf.mxu0  ;;  %v9239_v32 = vpop.f32.mrf.mxu1  ;;  %v10532_v25 = vld [vmem:[%s10946_s5 + $0x820] sm:$0xff]  }
 0x1d9   : > { %4019 = vmatprep.mubr.bf16.mxu1 %v3474_v0  ;;  %9507 = vmatprep.subr.bf16.mxu0 %v10490_v22  ;;  %v10533_v26 = vld [vmem:[%s10946_s5 + $0x8a0] sm:$0xff]   ;;  %v10534_v0 = vld [vmem:[%s10946_s5 + $0x858] sm:$0xff]   ;;  %v10539_v31 = vld [vmem:[%s10946_s5 + $0x8d0] sm:$0xff]  }
 0x1da   : > { %9529 = vmatprep.subr.bf16.mxu1 %v10491_v23  ;;  %v10530_v23 = vld [vmem:[%s10946_s5 + $0x860] sm:$0xff]   ;;  %v10540_v32 = vld [vmem:[%s10946_s5 + $0x810] sm:$0xff]  }
 0x1db   : > { %9508 = vmatpush3.bf16.msra.mxu0 %v10492_v28  ;;  %v10536_v28 = vld [vmem:[%s10946_s5 + $0x818] sm:$0xff]  }
 0x1dc   : > { %9530 = vmatpush3.bf16.msra.mxu1 %v10493_v29  ;;  %9509 = vmatprep.subr.bf16.mxu0 %v10494_v30  ;;  %v10537_v29 = vld [vmem:[%s10946_s5 + $0x898] sm:$0xff]   ;;  %v10538_v30 = vld [vmem:[%s10946_s5 + $0x850] sm:$0xff]  }
 0x1dd   : > { %9531 = vmatprep.subr.bf16.mxu1 %v10495_v33  ;;  %v10541_v33 = vld [vmem:[%s10946_s5 + $0x890] sm:$0xff]  }
 0x1df   : > { %9510 = vmatpush3.bf16.msra.mxu0 %v10496_v1  ;;  %v10542_v1 = vld [vmem:[%s10946_s5 + $0x848] sm:$0xff]  }
 0x1e0   : > { %9532 = vmatpush3.bf16.msra.mxu1 %v10497_v34  ;;  %9511 = vmatprep.subr.bf16.mxu0 %v10498_v35  ;;  %v10543_v34 = vld [vmem:[%s10946_s5 + $0x8c8] sm:$0xff]  }
 0x1e1   : > { %9533 = vmatprep.subr.bf16.mxu1 %v10499_v36  ;;  %v10544_v35 = vld [vmem:[%s10946_s5 + $0x808] sm:$0xff]  }
 0x1e2   : > { %v10545_v36 = vld [vmem:[%s10946_s5 + $0x888] sm:$0xff]  }
 0x1e3   : > { %9512 = vmatpush3.bf16.msra.mxu0 %v10500_v37  ;;  %v10546_v37 = vld [vmem:[%s10946_s5 + $0x840] sm:$0xff]  }
 0x1e4   : > { %9534 = vmatpush3.bf16.msra.mxu1 %v10501_v38  ;;  %9513 = vmatprep.subr.bf16.mxu0 %v10502_v39  ;;  %v10547_v38 = vld [vmem:[%s10946_s5 + $0x8c0] sm:$0xff]  }
 0x1e5   : > { %9535 = vmatprep.subr.bf16.mxu1 %v10503_v41  ;;  %v10548_v39 = vld [vmem:[%s10946_s5 + $0x800] sm:$0xff]  }
 0x1e6   : > { %v10549_v41 = vld [vmem:[%s10946_s5 + $0x880] sm:$0xff]  }
 0x1e7   : > { %9514 = vmatpush3.bf16.msra.mxu0 %v10504_v40  ;;  %v10550_v40 = vld [vmem:[%s10946_s5 + $0x978] sm:$0xff]  }
 0x1e8   : > { %9536 = vmatpush3.bf16.msra.mxu1 %v10505_v47  ;;  %9515 = vmatprep.subr.bf16.mxu0 %v10506_v60  ;;  %v10551_v47 = vld [vmem:[%s10946_s5 + $0x9f8] sm:$0xff]  }
 0x1e9   : > { %9537 = vmatprep.subr.bf16.mxu1 %v10507_v48  ;;  %v10552_v60 = vld [vmem:[%s10946_s5 + $0x938] sm:$0xff]  }
 0x1ea   : > { %v10553_v48 = vld [vmem:[%s10946_s5 + $0x9b8] sm:$0xff]  }
 0x1eb   : > { %9516 = vmatpush3.bf16.msra.mxu0 %v10508_v50  ;;  %v10554_v50 = vld [vmem:[%s10946_s5 + $0x970] sm:$0xff]  }
 0x1ec   : > { %9538 = vmatpush3.bf16.msra.mxu1 %v10509_v51  ;;  %9517 = vmatprep.subr.bf16.mxu0 %v10510_v52  ;;  %v10776_v51 = vld [vmem:[%s10951_s24 + $0x40] sm:$0xff] }
 0x1ed   : > { %9539 = vmatprep.subr.bf16.mxu1 %v10511_v49  ;;  %v11786_v52 = vpack.c.bf16 %v10776_v51, %v10776_v51  ;;  %v10555_v49 = vld [vmem:[%s10946_s5 + $0x9f0] sm:$0xff]  }
 0x1ee   : > { %v10589_v51 = vld [vmem:[%s10946_s5 + $0xab0] sm:$0xff]  }
 0x1ef   : > { %9518 = vmatpush3.bf16.msra.mxu0 %v10512_v61  ;;  %v10777_v61 = vld [vmem:[%s10951_s24 + $0x50] sm:$0xff] }
 0x1f0   : > { %9540 = vmatpush3.bf16.msra.mxu1 %v10513_v43  ;;  %9519 = vmatprep.subr.bf16.mxu0 %v10514_v53  ;;  %v11790_v43 = vpack.c.bf16 %v10777_v61, %v10777_v61  ;;  %v10778_v53 = vld [vmem:[%s10951_s24 + $0x68] sm:$0xff] }
 0x1f1   : > { %9541 = vmatprep.subr.bf16.mxu1 %v10515_v44  ;;  %v11793_v44 = vpack.c.bf16 %v10778_v53, %v10778_v53  ;;  %v10591_v53 = vld [vmem:[%s10946_s5 + $0xae8] sm:$0xff]  }
 0x1f3   : > { %9520 = vmatpush3.bf16.msra.mxu0 %v10516_v45 }
 0x1f4   : > { %9542 = vmatpush3.bf16.msra.mxu1 %v10517_v42  ;;  %9549 = vmatprep.subr.bf16.mxu0 %v10518_v46  ;;  %v10779_v46 = vld [vmem:[%s10951_s24 + $0x78] sm:$0xff] }
 0x1f5   : > { %9571 = vmatprep.subr.bf16.mxu1 %v10519_v54  ;;  %v11797_v54 = vpack.c.bf16 %v10779_v46, %v10779_v46  ;;  %v10592_v46 = vld [vmem:[%s10946_s5 + $0xa28] sm:$0xff]  }
 0x1f6   : > { %3980 = vmatmul.mubr.bf16.vlgmr.msra.gmra.mxu0 %v3471_v55  ;;  %v9257_v9 = vpop.f32.mrf.mxu0  ;;  %v9279_v63 = vpop.f32.mrf.mxu1  ;;  %v10556_v55 = vld [vmem:[%s10946_s5 + $0x930] sm:$0xff]  }
 0x1f7   : > { %4020 = vmatmul.mubr.bf16.vlgmr.msra.gmra.mxu1 %v3473_v4  ;;  %9550 = vmatpush3.bf16.msra.mxu0 %v10520_v58  ;;  %v10557_v58 = vld [vmem:[%s10946_s5 + $0x9b0] sm:$0xff]  }
 0x1f8   : > { %4581 = vmatprep.mubr.bf16.mxu0 %v11744_v8  ;;  %9572 = vmatpush3.bf16.msra.mxu1 %v10521_v62  ;;  %v9258_v14 = vpop.f32.mrf.mxu0  ;;  %v9280_v15 = vpop.f32.mrf.mxu1  ;;  %v10558_v62 = vld [vmem:[%s10946_s5 + $0x968] sm:$0xff]  }
 0x1f9   : > { %4621 = vmatprep.mubr.bf16.mxu1 %v11747_v11  ;;  %v9259_v17 = vadd.f32 %v9258_v14, %v9257_v9  ;;  %v9281_v18 = vadd.f32 %v9280_v15, %v9279_v63  ;;  %9551 = vmatprep.subr.bf16.mxu0 %v10522_v5  ;;  %v10560_v63 = vld [vmem:[%s10946_s5 + $0x928] sm:$0xff]  }
 0x1fa   : > { %9573 = vmatprep.subr.bf16.mxu1 %v10523_v6  ;;  %v9260_v19 = vpop.f32.mrf.mxu0  ;;  %v9282_v20 = vpop.f32.mrf.mxu1  ;;  %v10559_v6 = vld [vmem:[%s10946_s5 + $0x9e8] sm:$0xff]  }
 0x1fb   : > { %v2059_v21 = vadd.f32 %v9259_v17, %v11707_v27  ;;  %9552 = vmatpush3.bf16.msra.mxu0 %v10524_v57  ;;  %v10535_v27 = vld [vmem:[%s10946_s5 + $0x8d8] sm:$0xff]   ;;  %v10561_v15 = vld [vmem:[%s10946_s5 + $0x9a8] sm:$0xff]   ;;  %v10565_v19 = vld [vmem:[%s10946_s5 + $0x9a0] sm:$0xff]  }
 0x1fc   : > { %9574 = vmatpush3.bf16.msra.mxu1 %v10525_v12  ;;  %v9261_v22 = vpop.f32.mrf.mxu0  ;;  %v9283_v59 = vpop.f32.mrf.mxu1  ;;  %9553 = vmatprep.subr.bf16.mxu0 %v10526_v13  ;;  %v10566_v20 = vld [vmem:[%s10946_s5 + $0x958] sm:$0xff]  }
 0x1fd   : > { %v11759_v24 = vadd.f32 %v9281_v18, %v2059_v21  ;;  %9575 = vmatprep.subr.bf16.mxu1 %v10527_v16  ;;  %v10562_v16 = vld [vmem:[%s10946_s5 + $0x960] sm:$0xff]   ;;  %v10567_v21 = vld [vmem:[%s10946_s5 + $0x9d8] sm:$0xff]  }
 0x1fe   : > { %v10563_v18 = vld [vmem:[%s10946_s5 + $0x9e0] sm:$0xff]   ;;  %v10568_v22 = vld [vmem:[%s10946_s5 + $0x918] sm:$0xff]  }
 0x1ff   : > { %9554 = vmatpush3.bf16.msra.mxu0 %v10528_v2  ;;  %v10564_v2 = vld [vmem:[%s10946_s5 + $0x920] sm:$0xff]   ;;  %v10569_v59 = vld [vmem:[%s10946_s5 + $0x998] sm:$0xff]  }
 0x200   : > { %9576 = vmatpush3.bf16.msra.mxu1 %v10529_v3  ;;  %9555 = vmatprep.subr.bf16.mxu0 %v10530_v23  ;;  %v10570_v3 = vld [vmem:[%s10946_s5 + $0x950] sm:$0xff]  }
 0x201   : > { %9577 = vmatprep.subr.bf16.mxu1 %v10531_v56  ;;  %v10571_v23 = vld [vmem:[%s10946_s5 + $0x9d0] sm:$0xff]  }
 0x202   : > { %v10573_v56 = vld [vmem:[%s10946_s5 + $0x990] sm:$0xff]  }
 0x203   : > { %9556 = vmatpush3.bf16.msra.mxu0 %v10532_v25  ;;  %v10574_v25 = vld [vmem:[%s10946_s5 + $0x948] sm:$0xff]  }
 0x204   : > { %9578 = vmatpush3.bf16.msra.mxu1 %v10533_v26  ;;  %9557 = vmatprep.subr.bf16.mxu0 %v10534_v0  ;;  %v10575_v26 = vld [vmem:[%s10946_s5 + $0x9c8] sm:$0xff]  }
 0x205   : > { %9579 = vmatprep.subr.bf16.mxu1 %v10535_v27  ;;  %v10576_v0 = vld [vmem:[%s10946_s5 + $0x908] sm:$0xff]  }
 0x206   : > { %v10577_v27 = vld [vmem:[%s10946_s5 + $0x988] sm:$0xff]  }
 0x207   : > { %9558 = vmatpush3.bf16.msra.mxu0 %v10536_v28  ;;  %v10578_v28 = vld [vmem:[%s10946_s5 + $0x940] sm:$0xff]  }
 0x208   : > { %9580 = vmatpush3.bf16.msra.mxu1 %v10537_v29  ;;  %9559 = vmatprep.subr.bf16.mxu0 %v10538_v30  ;;  %v10579_v29 = vld [vmem:[%s10946_s5 + $0x9c0] sm:$0xff]  }
 0x209   : > { %9581 = vmatprep.subr.bf16.mxu1 %v10539_v31  ;;  %v10580_v30 = vld [vmem:[%s10946_s5 + $0x900] sm:$0xff]  }
 0x20a   : > { %v10581_v31 = vld [vmem:[%s10946_s5 + $0x980] sm:$0xff]  }
 0x20b   : > { %9560 = vmatpush3.bf16.msra.mxu0 %v10540_v32  ;;  %v10582_v32 = vld [vmem:[%s10946_s5 + $0xa78] sm:$0xff]  }
 0x20c   : > { %9582 = vmatpush3.bf16.msra.mxu1 %v10541_v33  ;;  %9561 = vmatprep.subr.bf16.mxu0 %v10542_v1  ;;  %v10583_v33 = vld [vmem:[%s10946_s5 + $0xaf8] sm:$0xff]  }
 0x20d   : > { %9583 = vmatprep.subr.bf16.mxu1 %v10543_v34  ;;  %v10584_v1 = vld [vmem:[%s10946_s5 + $0xa38] sm:$0xff]  }
 0x20e   : > { %v10585_v34 = vld [vmem:[%s10946_s5 + $0xab8] sm:$0xff]  }
 0x20f   : > { %9562 = vmatpush3.bf16.msra.mxu0 %v10544_v35  ;;  %v4848_v35 = vrot.slane %v11744_v8, 1 }
 0x210   : > { %9584 = vmatpush3.bf16.msra.mxu1 %v10545_v36  ;;  %9563 = vmatprep.subr.bf16.mxu0 %v10546_v37  ;;  %v10586_v36 = vld [vmem:[%s10946_s5 + $0xa70] sm:$0xff]   ;;  %v10780_v37 = vld [vmem:[%s10951_s24 + $0x60] sm:$0xff] }
 0x211   : > { %9585 = vmatprep.subr.bf16.mxu1 %v10547_v38  ;;  %v11838_v38 = vpack.c.bf16 %v10780_v37, %v10780_v37  ;;  %v10621_v37 = vld [vmem:[%s10946_s5 + $0xbb0] sm:$0xff]  }
 0x213   : > { %9564 = vmatpush3.bf16.msra.mxu0 %v10548_v39  ;;  %v10587_v39 = vld [vmem:[%s10946_s5 + $0xaf0] sm:$0xff]  }
 0x214   : > { %9586 = vmatpush3.bf16.msra.mxu1 %v10549_v41  ;;  %9593 = vmatprep.subr.bf16.mxu0 %v10550_v40  ;;  %v10781_v41 = vld [vmem:[%s10951_s24 + $0x70] sm:$0xff] }
 0x215   : > { %9615 = vmatprep.subr.bf16.mxu1 %v10551_v47  ;;  %v11842_v40 = vpack.c.bf16 %v10781_v41, %v10781_v41 }
 0x216   : > { %v9301_v45 = vpop.f32.mrf.mxu0  ;;  %v9323_v42 = vpop.f32.mrf.mxu1  ;;  %4582 = vmatmul.mubr.bf16.vlgmr.msra.gmra.mxu0 %v11786_v52 }
 0x217   : > { %4622 = vmatmul.mubr.bf16.vlgmr.msra.gmra.mxu1 %v11790_v43  ;;  %9594 = vmatpush3.bf16.msra.mxu0 %v10552_v60 }
 0x218   : > { %4661 = vmatprep.mubr.bf16.mxu0 %v11793_v44  ;;  %9616 = vmatpush3.bf16.msra.mxu1 %v10553_v48  ;;  %v9302_v4 = vpop.f32.mrf.mxu0  ;;  %v9324_v5 = vpop.f32.mrf.mxu1  ;;  %v4850_v48 = vrot.slane %v11747_v11, 1 }
 0x219   : > { %4701 = vmatprep.mubr.bf16.mxu1 %v11797_v54  ;;  %v9303_v7 = vadd.f32 %v9302_v4, %v9301_v45  ;;  %v9325_v9 = vadd.f32 %v9324_v5, %v9323_v42  ;;  %9595 = vmatprep.subr.bf16.mxu0 %v10554_v50  ;;  %v10588_v50 = vld [vmem:[%s10946_s5 + $0xa30] sm:$0xff]   ;;  %v10594_v4 = vld [vmem:[%s10946_s5 + $0xa60] sm:$0xff]  }
 0x21a   : > { %v9304_v10 = vpop.f32.mrf.mxu0  ;;  %v9326_v57 = vpop.f32.mrf.mxu1  ;;  %9617 = vmatprep.subr.bf16.mxu1 %v10555_v49  ;;  %v10590_v49 = vld [vmem:[%s10946_s5 + $0xa68] sm:$0xff]  }
 0x21b   : > { %v2523_v12 = vadd.f32 %v9303_v7, %v11759_v24  ;;  %9596 = vmatpush3.bf16.msra.mxu0 %v10556_v55  ;;  %v10572_v24 = vld [vmem:[%s10946_s5 + $0x910] sm:$0xff]   ;;  %v10595_v7 = vld [vmem:[%s10946_s5 + $0xae0] sm:$0xff]  }
 0x21c   : > { %9618 = vmatpush3.bf16.msra.mxu1 %v10557_v58  ;;  %v9305_v13 = vpop.f32.mrf.mxu0  ;;  %v9327_v14 = vpop.f32.mrf.mxu1  ;;  %9597 = vmatprep.subr.bf16.mxu0 %v10558_v62  ;;  %v10593_v62 = vld [vmem:[%s10946_s5 + $0xaa8] sm:$0xff]   ;;  %v10596_v57 = vld [vmem:[%s10946_s5 + $0xa20] sm:$0xff]  }
 0x21d   : > { %v11810_v17 = vadd.f32 %v9325_v9, %v2523_v12  ;;  %9619 = vmatprep.subr.bf16.mxu1 %v10559_v6  ;;  %v10597_v12 = vld [vmem:[%s10946_s5 + $0xaa0] sm:$0xff]   ;;  %v10598_v13 = vld [vmem:[%s10946_s5 + $0xa58] sm:$0xff]  }
 0x21e   : > { %v10599_v14 = vld [vmem:[%s10946_s5 + $0xad8] sm:$0xff]  }
 0x21f   : > { %9598 = vmatpush3.bf16.msra.mxu0 %v10560_v63 }
 0x220   : > { %9620 = vmatpush3.bf16.msra.mxu1 %v10561_v15  ;;  %9599 = vmatprep.subr.bf16.mxu0 %v10562_v16  ;;  %v10600_v15 = vld [vmem:[%s10946_s5 + $0xa18] sm:$0xff]  }
 0x221   : > { %9621 = vmatprep.subr.bf16.mxu1 %v10563_v18  ;;  %v10601_v16 = vld [vmem:[%s10946_s5 + $0xa98] sm:$0xff]   ;;  %v10603_v18 = vld [vmem:[%s10946_s5 + $0xad0] sm:$0xff]  }
 0x223   : > { %9600 = vmatpush3.bf16.msra.mxu0 %v10564_v2  ;;  %v10604_v2 = vld [vmem:[%s10946_s5 + $0xa10] sm:$0xff]  }
 0x224   : > { %9622 = vmatpush3.bf16.msra.mxu1 %v10565_v19  ;;  %9601 = vmatprep.subr.bf16.mxu0 %v10566_v20  ;;  %v10605_v19 = vld [vmem:[%s10946_s5 + $0xa90] sm:$0xff]   ;;  %v10606_v20 = vld [vmem:[%s10946_s5 + $0xa48] sm:$0xff]  }
 0x225   : > { %9623 = vmatprep.subr.bf16.mxu1 %v10567_v21  ;;  %v10607_v21 = vld [vmem:[%s10946_s5 + $0xac8] sm:$0xff]  }
 0x227   : > { %9602 = vmatpush3.bf16.msra.mxu0 %v10568_v22  ;;  %v10608_v22 = vld [vmem:[%s10946_s5 + $0xa08] sm:$0xff]  }
 0x228   : > { %9624 = vmatpush3.bf16.msra.mxu1 %v10569_v59  ;;  %9603 = vmatprep.subr.bf16.mxu0 %v10570_v3  ;;  %v10609_v59 = vld [vmem:[%s10946_s5 + $0xa88] sm:$0xff]   ;;  %v10610_v3 = vld [vmem:[%s10946_s5 + $0xa40] sm:$0xff]  }
 0x229   : > { %9625 = vmatprep.subr.bf16.mxu1 %v10571_v23  ;;  %v10611_v23 = vld [vmem:[%s10946_s5 + $0xac0] sm:$0xff]  }
 0x22b   : > { %9604 = vmatpush3.bf16.msra.mxu0 %v10572_v24  ;;  %v10612_v24 = vld [vmem:[%s10946_s5 + $0xa00] sm:$0xff]  }
 0x22c   : > { %9626 = vmatpush3.bf16.msra.mxu1 %v10573_v56  ;;  %9605 = vmatprep.subr.bf16.mxu0 %v10574_v25  ;;  %v10613_v56 = vld [vmem:[%s10946_s5 + $0xa80] sm:$0xff]   ;;  %v10614_v25 = vld [vmem:[%s10946_s5 + $0xb78] sm:$0xff]  }
 0x22d   : > { %9627 = vmatprep.subr.bf16.mxu1 %v10575_v26  ;;  %v10615_v26 = vld [vmem:[%s10946_s5 + $0xbf8] sm:$0xff]  }
 0x22f   : > { %9606 = vmatpush3.bf16.msra.mxu0 %v10576_v0  ;;  %v10616_v0 = vld [vmem:[%s10946_s5 + $0xb38] sm:$0xff]  }
 0x230   : > { %9628 = vmatpush3.bf16.msra.mxu1 %v10577_v27  ;;  %9607 = vmatprep.subr.bf16.mxu0 %v10578_v28  ;;  %v4847_v27 = vrot.slane %v11786_v52, 1  ;;  %v10617_v28 = vld [vmem:[%s10946_s5 + $0xbb8] sm:$0xff]  }
 0x231   : > { %9629 = vmatprep.subr.bf16.mxu1 %v10579_v29  ;;  %v4849_v29 = vrot.slane %v11790_v43, 1 }
 0x233   : > { %9608 = vmatpush3.bf16.msra.mxu0 %v10580_v30  ;;  %v10618_v30 = vld [vmem:[%s10946_s5 + $0xb70] sm:$0xff]  }
 0x234   : > { %9630 = vmatpush3.bf16.msra.mxu1 %v10581_v31  ;;  %9637 = vmatprep.subr.bf16.mxu0 %v10582_v32  ;;  %v4852_v32 = vrot.slane %v11793_v44, 1 }
 0x235   : > { %9659 = vmatprep.subr.bf16.mxu1 %v10583_v33  ;;  %v10619_v33 = vld [vmem:[%s10946_s5 + $0xbf0] sm:$0xff]  }
 0x236   : > { %v9345_v47 = vpop.f32.mrf.mxu0  ;;  %4662 = vmatmul.mubr.bf16.vlgmr.msra.gmra.mxu0 %v11838_v38 }
 0x237   : > { %v9367_v60 = vpop.f32.mrf.mxu1  ;;  %4702 = vmatmul.mubr.bf16.vlgmr.msra.gmra.mxu1 %v11842_v40  ;;  %9638 = vmatpush3.bf16.msra.mxu0 %v10584_v1 }
 0x238   : > { %5279 = vmatprep.mubr.bf16.mxu0 %v4848_v35  ;;  %9660 = vmatpush3.bf16.msra.mxu1 %v10585_v34  ;;  %v9346_v61 = vpop.f32.mrf.mxu0  ;;  %v4854_v34 = vrot.slane %v11797_v54, 1  ;;  %v10620_v35 = vld [vmem:[%s10946_s5 + $0xb30] sm:$0xff]  }
 0x239   : > { %5319 = vmatprep.mubr.bf16.mxu1 %v4850_v48  ;;  %v9347_v45 = vadd.f32 %v9346_v61, %v9345_v47  ;;  %v9368_v42 = vpop.f32.mrf.mxu1  ;;  %9639 = vmatprep.subr.bf16.mxu0 %v10586_v36 }
 0x23a   : > { %v9369_v55 = vadd.f32 %v9368_v42, %v9367_v60  ;;  %v9348_v58 = vpop.f32.mrf.mxu0  ;;  %9661 = vmatprep.subr.bf16.mxu1 %v10587_v39  ;;  %v10622_v39 = vld [vmem:[%s10946_s5 + $0xb68] sm:$0xff]   ;;  %v10626_v42 = vld [vmem:[%s10946_s5 + $0xb60] sm:$0xff]  }
 0x23b   : > { %v2603_v5 = vadd.f32 %v9347_v45, %v11810_v17  ;;  %v9370_v6 = vpop.f32.mrf.mxu1  ;;  %9640 = vmatpush3.bf16.msra.mxu0 %v10588_v50  ;;  %v10602_v17 = vld [vmem:[%s10946_s5 + $0xa50] sm:$0xff]   ;;  %v10623_v60 = vld [vmem:[%s10946_s5 + $0xbe8] sm:$0xff]   ;;  %v10628_v58 = vld [vmem:[%s10946_s5 + $0xb20] sm:$0xff]  }
 0x23c   : > { %9662 = vmatpush3.bf16.msra.mxu1 %v10589_v51  ;;  %v9349_v9 = vpop.f32.mrf.mxu0  ;;  %9641 = vmatprep.subr.bf16.mxu0 %v10590_v49  ;;  %v10624_v49 = vld [vmem:[%s10946_s5 + $0xb28] sm:$0xff]   ;;  %v10632_v6 = vld [vmem:[%s10946_s5 + $0xb18] sm:$0xff]  }
 0x23d   : > { %v11856_v63 = vadd.f32 %v9369_v55, %v2603_v5  ;;  %v9371_v10 = vpop.f32.mrf.mxu1  ;;  %9663 = vmatprep.subr.bf16.mxu1 %v10591_v53  ;;  %v10625_v45 = vld [vmem:[%s10946_s5 + $0xba8] sm:$0xff]   ;;  %v10627_v55 = vld [vmem:[%s10946_s5 + $0xbe0] sm:$0xff]   ;;  %v10631_v5 = vld [vmem:[%s10946_s5 + $0xbd8] sm:$0xff]  }
 0x23e   : > { %v10634_v9 = vld [vmem:[%s10946_s5 + $0xb50] sm:$0xff]  }
 0x23f   : > { %9642 = vmatpush3.bf16.msra.mxu0 %v10592_v46  ;;  %v10635_v10 = vld [vmem:[%s10946_s5 + $0xbd0] sm:$0xff]  }
 0x240   : > { %9664 = vmatpush3.bf16.msra.mxu1 %v10593_v62  ;;  %9643 = vmatprep.subr.bf16.mxu0 %v10594_v4  ;;  %v10629_v62 = vld [vmem:[%s10946_s5 + $0xba0] sm:$0xff]   ;;  %v10630_v4 = vld [vmem:[%s10946_s5 + $0xb58] sm:$0xff]  }
 0x241   : > { %9665 = vmatprep.subr.bf16.mxu1 %v10595_v7  ;;  %v10633_v7 = vld [vmem:[%s10946_s5 + $0xb98] sm:$0xff]  }
 0x243   : > { %9644 = vmatpush3.bf16.msra.mxu0 %v10596_v57  ;;  %v10636_v57 = vld [vmem:[%s10946_s5 + $0xb10] sm:$0xff]  }
 0x244   : > { %9666 = vmatpush3.bf16.msra.mxu1 %v10597_v12  ;;  %9645 = vmatprep.subr.bf16.mxu0 %v10598_v13  ;;  %v10637_v12 = vld [vmem:[%s10946_s5 + $0xb90] sm:$0xff]   ;;  %v10638_v13 = vld [vmem:[%s10946_s5 + $0xb48] sm:$0xff]  }
 0x245   : > { %9667 = vmatprep.subr.bf16.mxu1 %v10599_v14  ;;  %v10639_v14 = vld [vmem:[%s10946_s5 + $0xbc8] sm:$0xff]  }
 0x247   : > { %9646 = vmatpush3.bf16.msra.mxu0 %v10600_v15  ;;  %v10640_v15 = vld [vmem:[%s10946_s5 + $0xb08] sm:$0xff]  }
 0x248   : > { %9668 = vmatpush3.bf16.msra.mxu1 %v10601_v16  ;;  %9647 = vmatprep.subr.bf16.mxu0 %v10602_v17  ;;  %v10641_v16 = vld [vmem:[%s10946_s5 + $0xb88] sm:$0xff]   ;;  %v10642_v17 = vld [vmem:[%s10946_s5 + $0xb40] sm:$0xff]  }
 0x249   : > { %9669 = vmatprep.subr.bf16.mxu1 %v10603_v18  ;;  %v10643_v18 = vld [vmem:[%s10946_s5 + $0xbc0] sm:$0xff]  }
 0x24b   : > { %9648 = vmatpush3.bf16.msra.mxu0 %v10604_v2  ;;  %v10644_v2 = vld [vmem:[%s10946_s5 + $0xb00] sm:$0xff]  }
 0x24c   : > { %9670 = vmatpush3.bf16.msra.mxu1 %v10605_v19  ;;  %9649 = vmatprep.subr.bf16.mxu0 %v10606_v20  ;;  %v10645_v19 = vld [vmem:[%s10946_s5 + $0xb80] sm:$0xff]   ;;  %v10646_v20 = vld [vmem:[%s10946_s5 + $0xc78] sm:$0xff]  }
 0x24d   : > { %9671 = vmatprep.subr.bf16.mxu1 %v10607_v21  ;;  %v10647_v21 = vld [vmem:[%s10946_s5 + $0xcf8] sm:$0xff]  }
 0x24f   : > { %9650 = vmatpush3.bf16.msra.mxu0 %v10608_v22  ;;  %v10648_v22 = vld [vmem:[%s10946_s5 + $0xc38] sm:$0xff]  }
 0x250   : > { %9672 = vmatpush3.bf16.msra.mxu1 %v10609_v59  ;;  %9651 = vmatprep.subr.bf16.mxu0 %v10610_v3  ;;  %v4851_v59 = vrot.slane %v11838_v38, 1  ;;  %v10649_v3 = vld [vmem:[%s10946_s5 + $0xcb8] sm:$0xff]  }
 0x251   : > { %9673 = vmatprep.subr.bf16.mxu1 %v10611_v23  ;;  %v4853_v23 = vrot.slane %v11842_v40, 1 }
 0x253   : > { %9652 = vmatpush3.bf16.msra.mxu0 %v10612_v24  ;;  %v10650_v24 = vld [vmem:[%s10946_s5 + $0xc70] sm:$0xff]  }
 0x254   : > { %9674 = vmatpush3.bf16.msra.mxu1 %v10613_v56  ;;  %9681 = vmatprep.subr.bf16.mxu0 %v10614_v25  ;;  %v5538_v25 = vrot.slane %v11744_v8, 2 }
 0x255   : > { %9703 = vmatprep.subr.bf16.mxu1 %v10615_v26  ;;  %v10651_v26 = vld [vmem:[%s10946_s5 + $0xcf0] sm:$0xff]  }
 0x256   : > { %v9389_v31 = vpop.f32.mrf.mxu0  ;;  %5280 = vmatmul.mubr.bf16.vlgmr.msra.gmra.mxu0 %v4847_v27  ;;  %v5540_v27 = vrot.slane %v11747_v11, 2 }
 0x257   : > { %v9411_v1 = vpop.f32.mrf.mxu1  ;;  %5320 = vmatmul.mubr.bf16.vlgmr.msra.gmra.mxu1 %v4849_v29  ;;  %9682 = vmatpush3.bf16.msra.mxu0 %v10616_v0 }
 0x258   : > { %5359 = vmatprep.mubr.bf16.mxu0 %v4852_v32  ;;  %9704 = vmatpush3.bf16.msra.mxu1 %v10617_v28  ;;  %v9390_v36 = vpop.f32.mrf.mxu0  ;;  %v10652_v28 = vld [vmem:[%s10946_s5 + $0xc30] sm:$0xff]  }
 0x259   : > { %5399 = vmatprep.mubr.bf16.mxu1 %v4854_v34  ;;  %v9391_v41 = vadd.f32 %v9390_v36, %v9389_v31  ;;  %v9412_v47 = vpop.f32.mrf.mxu1  ;;  %9683 = vmatprep.subr.bf16.mxu0 %v10618_v30  ;;  %v10653_v30 = vld [vmem:[%s10946_s5 + $0xcb0] sm:$0xff]   ;;  %v10654_v31 = vld [vmem:[%s10946_s5 + $0xc68] sm:$0xff]  }
 0x25a   : > { %v9413_v48 = vadd.f32 %v9412_v47, %v9411_v1  ;;  %v9392_v50 = vpop.f32.mrf.mxu0  ;;  %9705 = vmatprep.subr.bf16.mxu1 %v10619_v33  ;;  %v10655_v1 = vld [vmem:[%s10946_s5 + $0xce8] sm:$0xff]  }
 0x25b   : > { %v9414_v51 = vpop.f32.mrf.mxu1  ;;  %9684 = vmatpush3.bf16.msra.mxu0 %v10620_v35  ;;  %v10657_v47 = vld [vmem:[%s10946_s5 + $0xca8] sm:$0xff]  }
 0x25c   : > { %v11891_v61 = vadd.f32 %v9413_v48, %v9391_v41  ;;  %9706 = vmatpush3.bf16.msra.mxu1 %v10621_v37  ;;  %v9393_v53 = vpop.f32.mrf.mxu0  ;;  %9685 = vmatprep.subr.bf16.mxu0 %v10622_v39  ;;  %v10656_v39 = vld [vmem:[%s10946_s5 + $0xc28] sm:$0xff]   ;;  %v10659_v51 = vld [vmem:[%s10946_s5 + $0xce0] sm:$0xff]  }
 0x25d   : > { %v9415_v46 = vpop.f32.mrf.mxu1  ;;  %9707 = vmatprep.subr.bf16.mxu1 %v10623_v60  ;;  %v10658_v60 = vld [vmem:[%s10946_s5 + $0xc60] sm:$0xff]  }
 0x25e   : > { %v10661_v53 = vld [vmem:[%s10946_s5 + $0xca0] sm:$0xff]   ;;  %v10664_v46 = vld [vmem:[%s10946_s5 + $0xc18] sm:$0xff]  }
 0x25f   : > { %9686 = vmatpush3.bf16.msra.mxu0 %v10624_v49 }
 0x260   : > { %9708 = vmatpush3.bf16.msra.mxu1 %v10625_v45  ;;  %9687 = vmatprep.subr.bf16.mxu0 %v10626_v42  ;;  %v10662_v45 = vld [vmem:[%s10946_s5 + $0xc58] sm:$0xff]  }
 0x261   : > { %9709 = vmatprep.subr.bf16.mxu1 %v10627_v55  ;;  %v10663_v42 = vld [vmem:[%s10946_s5 + $0xcd8] sm:$0xff]   ;;  %v10666_v55 = vld [vmem:[%s10946_s5 + $0xc50] sm:$0xff]  }
 0x263   : > { %9688 = vmatpush3.bf16.msra.mxu0 %v10628_v58  ;;  %v10667_v58 = vld [vmem:[%s10946_s5 + $0xcd0] sm:$0xff]  }
 0x264   : > { %9710 = vmatpush3.bf16.msra.mxu1 %v10629_v62  ;;  %9689 = vmatprep.subr.bf16.mxu0 %v10630_v4  ;;  %v10668_v62 = vld [vmem:[%s10946_s5 + $0xc10] sm:$0xff]  }
 0x265   : > { %9711 = vmatprep.subr.bf16.mxu1 %v10631_v5  ;;  %v10669_v4 = vld [vmem:[%s10946_s5 + $0xc90] sm:$0xff]   ;;  %v10670_v5 = vld [vmem:[%s10946_s5 + $0xc48] sm:$0xff]  }
 0x267   : > { %9690 = vmatpush3.bf16.msra.mxu0 %v10632_v6  ;;  %v10671_v6 = vld [vmem:[%s10946_s5 + $0xcc8] sm:$0xff]  }
 0x268   : > { %9712 = vmatpush3.bf16.msra.mxu1 %v10633_v7  ;;  %9691 = vmatprep.subr.bf16.mxu0 %v10634_v9  ;;  %v10672_v7 = vld [vmem:[%s10946_s5 + $0xc08] sm:$0xff]  }
 0x269   : > { %9713 = vmatprep.subr.bf16.mxu1 %v10635_v10  ;;  %v10673_v9 = vld [vmem:[%s10946_s5 + $0xc88] sm:$0xff]   ;;  %v10674_v10 = vld [vmem:[%s10946_s5 + $0xc40] sm:$0xff]  }
 0x26b   : > { %9692 = vmatpush3.bf16.msra.mxu0 %v10636_v57  ;;  %v10675_v57 = vld [vmem:[%s10946_s5 + $0xcc0] sm:$0xff]  }
 0x26c   : > { %9714 = vmatpush3.bf16.msra.mxu1 %v10637_v12  ;;  %9693 = vmatprep.subr.bf16.mxu0 %v10638_v13  ;;  %v10676_v12 = vld [vmem:[%s10946_s5 + $0xc00] sm:$0xff]  }
 0x26d   : > { %9715 = vmatprep.subr.bf16.mxu1 %v10639_v14  ;;  %v10677_v13 = vld [vmem:[%s10946_s5 + $0xc80] sm:$0xff]   ;;  %v10678_v14 = vld [vmem:[%s10946_s5 + $0xd78] sm:$0xff]  }
 0x26f   : > { %9694 = vmatpush3.bf16.msra.mxu0 %v10640_v15  ;;  %v10679_v15 = vld [vmem:[%s10946_s5 + $0xdf8] sm:$0xff]  }
 0x270   : > { %9716 = vmatpush3.bf16.msra.mxu1 %v10641_v16  ;;  %9695 = vmatprep.subr.bf16.mxu0 %v10642_v17  ;;  %v10680_v16 = vld [vmem:[%s10946_s5 + $0xd38] sm:$0xff]   ;;  %v5537_v17 = vrot.slane %v11786_v52, 2 }
 0x271   : > { %9717 = vmatprep.subr.bf16.mxu1 %v10643_v18  ;;  %v10681_v18 = vld [vmem:[%s10946_s5 + $0xdb8] sm:$0xff]  }
 0x273   : > { %9696 = vmatpush3.bf16.msra.mxu0 %v10644_v2  ;;  %v5539_v2 = vrot.slane %v11790_v43, 2 }
 0x274   : > { %9718 = vmatpush3.bf16.msra.mxu1 %v10645_v19  ;;  %9725 = vmatprep.subr.bf16.mxu0 %v10646_v20  ;;  %v10682_v19 = vld [vmem:[%s10946_s5 + $0xd70] sm:$0xff]  }
 0x275   : > { %9747 = vmatprep.subr.bf16.mxu1 %v10647_v21  ;;  %v5542_v21 = vrot.slane %v11793_v44, 2 }
 0x276   : > { %v9433_v56 = vpop.f32.mrf.mxu0  ;;  %5360 = vmatmul.mubr.bf16.vlgmr.msra.gmra.mxu0 %v4851_v59 }
 0x277   : > { %v9455_v0 = vpop.f32.mrf.mxu1  ;;  %5400 = vmatmul.mubr.bf16.vlgmr.msra.gmra.mxu1 %v4853_v23  ;;  %9726 = vmatpush3.bf16.msra.mxu0 %v10648_v22  ;;  %v10683_v22 = vld [vmem:[%s10946_s5 + $0xdf0] sm:$0xff]  }
 0x278   : > { %5969 = vmatprep.mubr.bf16.mxu0 %v5538_v25  ;;  %9748 = vmatpush3.bf16.msra.mxu1 %v10649_v3  ;;  %v9434_v29 = vpop.f32.mrf.mxu0  ;;  %v5544_v3 = vrot.slane %v11797_v54, 2  ;;  %v10684_v23 = vld [vmem:[%s10946_s5 + $0xd30] sm:$0xff]   ;;  %v10686_v25 = vld [vmem:[%s10946_s5 + $0xd68] sm:$0xff]  }
 0x279   : > { %6009 = vmatprep.mubr.bf16.mxu1 %v5540_v27  ;;  %v9435_v32 = vadd.f32 %v9434_v29, %v9433_v56  ;;  %v9456_v33 = vpop.f32.mrf.mxu1  ;;  %9727 = vmatprep.subr.bf16.mxu0 %v10650_v24  ;;  %v10685_v56 = vld [vmem:[%s10946_s5 + $0xdb0] sm:$0xff]   ;;  %v10687_v27 = vld [vmem:[%s10946_s5 + $0xde8] sm:$0xff]  }
 0x27a   : > { %v9457_v34 = vadd.f32 %v9456_v33, %v9455_v0  ;;  %v9436_v35 = vpop.f32.mrf.mxu0  ;;  %9749 = vmatprep.subr.bf16.mxu1 %v10651_v26 }
 0x27b   : > { %v3292_v36 = vadd.f32 %v9435_v32, %v11891_v61  ;;  %v9458_v37 = vpop.f32.mrf.mxu1  ;;  %9728 = vmatpush3.bf16.msra.mxu0 %v10652_v28  ;;  %v10660_v61 = vld [vmem:[%s10946_s5 + $0xc20] sm:$0xff]  }
 0x27c   : > { %9750 = vmatpush3.bf16.msra.mxu1 %v10653_v30  ;;  %v9437_v41 = vpop.f32.mrf.mxu0  ;;  %9729 = vmatprep.subr.bf16.mxu0 %v10654_v31  ;;  %v10688_v31 = vld [vmem:[%s10946_s5 + $0xd28] sm:$0xff]   ;;  %v10692_v37 = vld [vmem:[%s10946_s5 + $0xd20] sm:$0xff]  }
 0x27d   : > { %v3332_v48 = vadd.f32 %v9457_v34, %v3292_v36  ;;  %v9459_v50 = vpop.f32.mrf.mxu1  ;;  %9751 = vmatprep.subr.bf16.mxu1 %v10655_v1  ;;  %v10689_v1 = vld [vmem:[%s10946_s5 + $0xda8] sm:$0xff]   ;;  %v10690_v34 = vld [vmem:[%s10946_s5 + $0xd60] sm:$0xff]   ;;  %v10694_v41 = vld [vmem:[%s10946_s5 + $0xd58] sm:$0xff]  }
 0x27e   : > { %v10691_v36 = vld [vmem:[%s10946_s5 + $0xde0] sm:$0xff]   ;;  %v10698_v50 = vld [vmem:[%s10946_s5 + $0xd50] sm:$0xff]  }
 0x27f   : > { %v11934_v49 = vadd.f32 %v3332_v48, %v11856_v63  ;;  %9730 = vmatpush3.bf16.msra.mxu0 %v10656_v39  ;;  %v10665_v63 = vld [vmem:[%s10946_s5 + $0xc98] sm:$0xff]   ;;  %v10693_v39 = vld [vmem:[%s10946_s5 + $0xda0] sm:$0xff]  }
 0x280   : > { %9752 = vmatpush3.bf16.msra.mxu1 %v10657_v47  ;;  %9731 = vmatprep.subr.bf16.mxu0 %v10658_v60  ;;  %v10695_v47 = vld [vmem:[%s10946_s5 + $0xdd8] sm:$0xff]  }
 0x281   : > { %9753 = vmatprep.subr.bf16.mxu1 %v10659_v51  ;;  %v10696_v60 = vld [vmem:[%s10946_s5 + $0xd18] sm:$0xff]   ;;  %v10699_v51 = vld [vmem:[%s10946_s5 + $0xdd0] sm:$0xff]  }
 0x282   : > { %v10697_v48 = vld [vmem:[%s10946_s5 + $0xd98] sm:$0xff]  }
 0x283   : > { %9732 = vmatpush3.bf16.msra.mxu0 %v10660_v61  ;;  %v10700_v61 = vld [vmem:[%s10946_s5 + $0xd10] sm:$0xff]  }
 0x284   : > { %9754 = vmatpush3.bf16.msra.mxu1 %v10661_v53  ;;  %9733 = vmatprep.subr.bf16.mxu0 %v10662_v45  ;;  %v10701_v53 = vld [vmem:[%s10946_s5 + $0xd90] sm:$0xff]   ;;  %v10702_v45 = vld [vmem:[%s10946_s5 + $0xd48] sm:$0xff]  }
 0x285   : > { %9755 = vmatprep.subr.bf16.mxu1 %v10663_v42  ;;  %v10703_v42 = vld [vmem:[%s10946_s5 + $0xdc8] sm:$0xff]  }
 0x287   : > { %9734 = vmatpush3.bf16.msra.mxu0 %v10664_v46  ;;  %v10704_v46 = vld [vmem:[%s10946_s5 + $0xd08] sm:$0xff]  }
 0x288   : > { %9756 = vmatpush3.bf16.msra.mxu1 %v10665_v63  ;;  %9735 = vmatprep.subr.bf16.mxu0 %v10666_v55  ;;  %v10705_v63 = vld [vmem:[%s10946_s5 + $0xd88] sm:$0xff]   ;;  %v10706_v55 = vld [vmem:[%s10946_s5 + $0xd40] sm:$0xff]  }
 0x289   : > { %9757 = vmatprep.subr.bf16.mxu1 %v10667_v58  ;;  %v10707_v58 = vld [vmem:[%s10946_s5 + $0xdc0] sm:$0xff]  }
 0x28b   : > { %9736 = vmatpush3.bf16.msra.mxu0 %v10668_v62  ;;  %v10708_v62 = vld [vmem:[%s10946_s5 + $0xd00] sm:$0xff]  }
 0x28c   : > { %9758 = vmatpush3.bf16.msra.mxu1 %v10669_v4  ;;  %9737 = vmatprep.subr.bf16.mxu0 %v10670_v5  ;;  %v10709_v4 = vld [vmem:[%s10946_s5 + $0xd80] sm:$0xff]   ;;  %v10710_v5 = vld [vmem:[%s10946_s5 + $0xe78] sm:$0xff]  }
 0x28d   : > { %9759 = vmatprep.subr.bf16.mxu1 %v10671_v6  ;;  %v10711_v6 = vld [vmem:[%s10946_s5 + $0xef8] sm:$0xff]  }
 0x28f   : > { %9738 = vmatpush3.bf16.msra.mxu0 %v10672_v7  ;;  %v10712_v7 = vld [vmem:[%s10946_s5 + $0xe38] sm:$0xff]  }
 0x290   : > { %9760 = vmatpush3.bf16.msra.mxu1 %v10673_v9  ;;  %9739 = vmatprep.subr.bf16.mxu0 %v10674_v10  ;;  %v5541_v9 = vrot.slane %v11838_v38, 2  ;;  %v10713_v10 = vld [vmem:[%s10946_s5 + $0xeb8] sm:$0xff]  }
 0x291   : > { %9761 = vmatprep.subr.bf16.mxu1 %v10675_v57  ;;  %v5543_v57 = vrot.slane %v11842_v40, 2 }
 0x293   : > { %9740 = vmatpush3.bf16.msra.mxu0 %v10676_v12  ;;  %v10714_v12 = vld [vmem:[%s10946_s5 + $0xe70] sm:$0xff]  }
 0x294   : > { %9762 = vmatpush3.bf16.msra.mxu1 %v10677_v13  ;;  %9769 = vmatprep.subr.bf16.mxu0 %v10678_v14  ;;  %v6228_v14 = vrot.slane %v11744_v8, 3  ;;  %v10719_v8 = vld [vmem:[%s10946_s5 + $0xee8] sm:$0xff]  }
 0x295   : > { %9791 = vmatprep.subr.bf16.mxu1 %v10679_v15  ;;  %v10715_v15 = vld [vmem:[%s10946_s5 + $0xef0] sm:$0xff]  }
 0x296   : > { %v9477_v20 = vpop.f32.mrf.mxu0  ;;  %5970 = vmatmul.mubr.bf16.vlgmr.msra.gmra.mxu0 %v5537_v17  ;;  %v6230_v17 = vrot.slane %v11747_v11, 3 }
 0x297   : > { %v9499_v59 = vpop.f32.mrf.mxu1  ;;  %6010 = vmatmul.mubr.bf16.vlgmr.msra.gmra.mxu1 %v5539_v2  ;;  %9770 = vmatpush3.bf16.msra.mxu0 %v10680_v16 }
 0x298   : > { %6049 = vmatprep.mubr.bf16.mxu0 %v5542_v21  ;;  %9792 = vmatpush3.bf16.msra.mxu1 %v10681_v18  ;;  %v9478_v24 = vpop.f32.mrf.mxu0  ;;  %v10716_v18 = vld [vmem:[%s10946_s5 + $0xe30] sm:$0xff]  }
 0x299   : > { %6089 = vmatprep.mubr.bf16.mxu1 %v5544_v3  ;;  %v9479_v26 = vadd.f32 %v9478_v24, %v9477_v20  ;;  %v9500_v0 = vpop.f32.mrf.mxu1  ;;  %9771 = vmatprep.subr.bf16.mxu0 %v10682_v19  ;;  %v10717_v19 = vld [vmem:[%s10946_s5 + $0xeb0] sm:$0xff]   ;;  %v10718_v20 = vld [vmem:[%s10946_s5 + $0xe68] sm:$0xff]  }
 0x29a   : > { %v9501_v28 = vadd.f32 %v9500_v0, %v9499_v59  ;;  %v9480_v29 = vpop.f32.mrf.mxu0  ;;  %9793 = vmatprep.subr.bf16.mxu1 %v10683_v22  ;;  %v10720_v24 = vld [vmem:[%s10946_s5 + $0xe28] sm:$0xff]  }
 0x29b   : > { %v9502_v30 = vpop.f32.mrf.mxu1  ;;  %9772 = vmatpush3.bf16.msra.mxu0 %v10684_v23 }
 0x29c   : > { %v11969_v32 = vadd.f32 %v9501_v28, %v9479_v26  ;;  %9794 = vmatpush3.bf16.msra.mxu1 %v10685_v56  ;;  %v9481_v33 = vpop.f32.mrf.mxu0  ;;  %9773 = vmatprep.subr.bf16.mxu0 %v10686_v25  ;;  %v10721_v25 = vld [vmem:[%s10946_s5 + $0xea8] sm:$0xff]   ;;  %v10722_v26 = vld [vmem:[%s10946_s5 + $0xe60] sm:$0xff]  }
 0x29d   : > { %v9503_v35 = vpop.f32.mrf.mxu1  ;;  %9795 = vmatprep.subr.bf16.mxu1 %v10687_v27  ;;  %v10723_v28 = vld [vmem:[%s10946_s5 + $0xee0] sm:$0xff]   ;;  %v10727_v33 = vld [vmem:[%s10946_s5 + $0xed8] sm:$0xff]  }
 0x29e   : > { %v10724_v30 = vld [vmem:[%s10946_s5 + $0xe20] sm:$0xff]   ;;  %v10731_v35 = vld [vmem:[%s10946_s5 + $0xed0] sm:$0xff]  }
 0x29f   : > { %9774 = vmatpush3.bf16.msra.mxu0 %v10688_v31  ;;  %v10725_v31 = vld [vmem:[%s10946_s5 + $0xea0] sm:$0xff]  }
 0x2a0   : > { %9796 = vmatpush3.bf16.msra.mxu1 %v10689_v1  ;;  %9775 = vmatprep.subr.bf16.mxu0 %v10690_v34  ;;  %v10728_v1 = vld [vmem:[%s10946_s5 + $0xe18] sm:$0xff]   ;;  %v10730_v34 = vld [vmem:[%s10946_s5 + $0xe50] sm:$0xff]  }
 0x2a1   : > { %9797 = vmatprep.subr.bf16.mxu1 %v10691_v36  ;;  %v10732_v36 = vld [vmem:[%s10946_s5 + $0xe10] sm:$0xff]  }
 0x2a3   : > { %9776 = vmatpush3.bf16.msra.mxu0 %v10692_v37  ;;  %v10733_v37 = vld [vmem:[%s10946_s5 + $0xe90] sm:$0xff]  }
 0x2a4   : > { %9798 = vmatpush3.bf16.msra.mxu1 %v10693_v39  ;;  %9777 = vmatprep.subr.bf16.mxu0 %v10694_v41  ;;  %v10734_v39 = vld [vmem:[%s10946_s5 + $0xe48] sm:$0xff]  }
 0x2a5   : > { %9799 = vmatprep.subr.bf16.mxu1 %v10695_v47  ;;  %v10735_v41 = vld [vmem:[%s10946_s5 + $0xec8] sm:$0xff]  }
 0x2a6   : > { %v10736_v47 = vld [vmem:[%s10946_s5 + $0xe08] sm:$0xff]  }
 0x2a7   : > { %9778 = vmatpush3.bf16.msra.mxu0 %v10696_v60  ;;  %v10737_v60 = vld [vmem:[%s10946_s5 + $0xe88] sm:$0xff]  }
 0x2a8   : > { %9800 = vmatpush3.bf16.msra.mxu1 %v10697_v48  ;;  %9779 = vmatprep.subr.bf16.mxu0 %v10698_v50  ;;  %v10738_v48 = vld [vmem:[%s10946_s5 + $0xe40] sm:$0xff]  }
 0x2a9   : > { %9801 = vmatprep.subr.bf16.mxu1 %v10699_v51  ;;  %v10739_v50 = vld [vmem:[%s10946_s5 + $0xec0] sm:$0xff]  }
 0x2aa   : > { %v10740_v51 = vld [vmem:[%s10946_s5 + $0xe00] sm:$0xff]  }
 0x2ab   : > { %9780 = vmatpush3.bf16.msra.mxu0 %v10700_v61  ;;  %v10741_v61 = vld [vmem:[%s10946_s5 + $0xe80] sm:$0xff]  }
 0x2ac   : > { %9802 = vmatpush3.bf16.msra.mxu1 %v10701_v53  ;;  %9781 = vmatprep.subr.bf16.mxu0 %v10702_v45  ;;  %v10742_v53 = vld [vmem:[%s10946_s5 + $0xf78] sm:$0xff]  }
 0x2ad   : > { %9803 = vmatprep.subr.bf16.mxu1 %v10703_v42  ;;  %v10743_v45 = vld [vmem:[%s10946_s5 + $0xff8] sm:$0xff]  }
 0x2ae   : > { %v10744_v42 = vld [vmem:[%s10946_s5 + $0xf38] sm:$0xff]  }
 0x2af   : > { %9782 = vmatpush3.bf16.msra.mxu0 %v10704_v46  ;;  %v6227_v46 = vrot.slane %v11786_v52, 3  ;;  %v10748_v52 = vld [vmem:[%s10946_s5 + $0xf30] sm:$0xff]  }
 0x2b0   : > { %9804 = vmatpush3.bf16.msra.mxu1 %v10705_v63  ;;  %9783 = vmatprep.subr.bf16.mxu0 %v10706_v55  ;;  %v10745_v63 = vld [vmem:[%s10946_s5 + $0xfb8] sm:$0xff]   ;;  %v6229_v55 = vrot.slane %v11790_v43, 3  ;;  %v10749_v43 = vld [vmem:[%s10946_s5 + $0xfb0] sm:$0xff]  }
 0x2b1   : > { %9805 = vmatprep.subr.bf16.mxu1 %v10707_v58  ;;  %v10746_v58 = vld [vmem:[%s10946_s5 + $0xf70] sm:$0xff]  }
 0x2b3   : > { %9784 = vmatpush3.bf16.msra.mxu0 %v10708_v62 }
 0x2b4   : > { %9806 = vmatpush3.bf16.msra.mxu1 %v10709_v4  ;;  %9813 = vmatprep.subr.bf16.mxu0 %v10710_v5  ;;  %v6232_v4 = vrot.slane %v11793_v44, 3  ;;  %v10747_v5 = vld [vmem:[%s10946_s5 + $0xff0] sm:$0xff]   ;;  %v10751_v44 = vld [vmem:[%s10946_s5 + $0xfe8] sm:$0xff]  }
 0x2b5   : > { %9835 = vmatprep.subr.bf16.mxu1 %v10711_v6 }
 0x2b6   : > { %v9521_v13 = vpop.f32.mrf.mxu0  ;;  %6050 = vmatmul.mubr.bf16.vlgmr.msra.gmra.mxu0 %v5541_v9 }
 0x2b7   : > { %v9543_v16 = vpop.f32.mrf.mxu1  ;;  %6090 = vmatmul.mubr.bf16.vlgmr.msra.gmra.mxu1 %v5543_v57  ;;  %9814 = vmatpush3.bf16.msra.mxu0 %v10712_v7  ;;  %v6234_v7 = vrot.slane %v11797_v54, 3 }
 0x2b8   : > { %6659 = vmatprep.mubr.bf16.mxu0 %v6228_v14  ;;  %9836 = vmatpush3.bf16.msra.mxu1 %v10713_v10  ;;  %v9522_v2 = vpop.f32.mrf.mxu0  ;;  %v10750_v10 = vld [vmem:[%s10946_s5 + $0xf68] sm:$0xff]  }
 0x2b9   : > { %6699 = vmatprep.mubr.bf16.mxu1 %v6230_v17  ;;  %v9523_v21 = vadd.f32 %v9522_v2, %v9521_v13  ;;  %v9544_v22 = vpop.f32.mrf.mxu1  ;;  %9815 = vmatprep.subr.bf16.mxu0 %v10714_v12  ;;  %v10754_v2 = vld [vmem:[%s10946_s5 + $0xf60] sm:$0xff]  }
 0x2ba   : > { %v9545_v59 = vadd.f32 %v9544_v22, %v9543_v16  ;;  %v9524_v3 = vpop.f32.mrf.mxu0  ;;  %9837 = vmatprep.subr.bf16.mxu1 %v10715_v15  ;;  %v10752_v15 = vld [vmem:[%s10946_s5 + $0xf28] sm:$0xff]   ;;  %v10757_v22 = vld [vmem:[%s10946_s5 + $0xfa0] sm:$0xff]  }
 0x2bb   : > { %v3982_v11 = vadd.f32 %v9523_v21, %v11969_v32  ;;  %v9546_v23 = vpop.f32.mrf.mxu1  ;;  %9816 = vmatpush3.bf16.msra.mxu0 %v10716_v18  ;;  %v10726_v32 = vld [vmem:[%s10946_s5 + $0xe58] sm:$0xff]   ;;  %v10753_v18 = vld [vmem:[%s10946_s5 + $0xfa8] sm:$0xff]   ;;  %v10756_v21 = vld [vmem:[%s10946_s5 + $0xf20] sm:$0xff]  }
 0x2bc   : > { %9838 = vmatpush3.bf16.msra.mxu1 %v10717_v19  ;;  %v9525_v56 = vpop.f32.mrf.mxu0  ;;  %9817 = vmatprep.subr.bf16.mxu0 %v10718_v20  ;;  %v10755_v20 = vld [vmem:[%s10946_s5 + $0xfe0] sm:$0xff]   ;;  %v10760_v3 = vld [vmem:[%s10946_s5 + $0xf18] sm:$0xff]   ;;  %v10762_v23 = vld [vmem:[%s10946_s5 + $0xf50] sm:$0xff]  }
 0x2bd   : > { %v4022_v0 = vadd.f32 %v9545_v59, %v3982_v11  ;;  %v9547_v27 = vpop.f32.mrf.mxu1  ;;  %9839 = vmatprep.subr.bf16.mxu1 %v10719_v8  ;;  %v10758_v8 = vld [vmem:[%s10946_s5 + $0xf58] sm:$0xff]   ;;  %v10764_v56 = vld [vmem:[%s10946_s5 + $0xf10] sm:$0xff]  }
 0x2be   : > { %v10759_v59 = vld [vmem:[%s10946_s5 + $0xfd8] sm:$0xff]   ;;  %v10768_v27 = vld [vmem:[%s10946_s5 + $0xf08] sm:$0xff]  }
 0x2bf   : > { %v12012_v29 = vadd.f32 %v4022_v0, %v11934_v49  ;;  %9818 = vmatpush3.bf16.msra.mxu0 %v10720_v24  ;;  %v10729_v49 = vld [vmem:[%s10946_s5 + $0xe98] sm:$0xff]   ;;  %v10763_v24 = vld [vmem:[%s10946_s5 + $0xfd0] sm:$0xff]   ;;  %v10767_v0 = vld [vmem:[%s10946_s5 + $0xfc8] sm:$0xff]  }
 0x2c0   : > { %9840 = vmatpush3.bf16.msra.mxu1 %v10721_v25  ;;  %9819 = vmatprep.subr.bf16.mxu0 %v10722_v26  ;;  %v10761_v11 = vld [vmem:[%s10946_s5 + $0xf98] sm:$0xff]   ;;  %v10765_v25 = vld [vmem:[%s10946_s5 + $0xf90] sm:$0xff]   ;;  %v10766_v26 = vld [vmem:[%s10946_s5 + $0xf48] sm:$0xff]  }
 0x2c1   : > { %9841 = vmatprep.subr.bf16.mxu1 %v10723_v28  ;;  %v10769_v28 = vld [vmem:[%s10946_s5 + $0xf88] sm:$0xff]  }
 0x2c3   : > { %9820 = vmatpush3.bf16.msra.mxu0 %v10724_v30  ;;  %v10770_v30 = vld [vmem:[%s10946_s5 + $0xf40] sm:$0xff]  }
 0x2c4   : > { %9842 = vmatpush3.bf16.msra.mxu1 %v10725_v31  ;;  %9821 = vmatprep.subr.bf16.mxu0 %v10726_v32  ;;  %v10771_v31 = vld [vmem:[%s10946_s5 + $0xfc0] sm:$0xff]  }
 0x2c5   : > { %9843 = vmatprep.subr.bf16.mxu1 %v10727_v33  ;;  %v10772_v32 = vld [vmem:[%s10946_s5 + $0xf00] sm:$0xff]  }
 0x2c6   : > { %v10773_v33 = vld [vmem:[%s10946_s5 + $0xf80] sm:$0xff]  }
 0x2c7   : > { %9822 = vmatpush3.bf16.msra.mxu0 %v10728_v1  ;;  %v6231_v1 = vrot.slane %v11838_v38, 3 }
 0x2c8   : > { %9844 = vmatpush3.bf16.msra.mxu1 %v10729_v49  ;;  %9823 = vmatprep.subr.bf16.mxu0 %v10730_v34  ;;  %v6233_v49 = vrot.slane %v11842_v40, 3 }
 0x2c9   : > { %9845 = vmatprep.subr.bf16.mxu1 %v10731_v35 }
 0x2cb   : > { %9824 = vmatpush3.bf16.msra.mxu0 %v10732_v36 }
 0x2cc   : > { %9846 = vmatpush3.bf16.msra.mxu1 %v10733_v37  ;;  %9825 = vmatprep.subr.bf16.mxu0 %v10734_v39 }
 0x2cd   : > { %9847 = vmatprep.subr.bf16.mxu1 %v10735_v41 }
 0x2cf   : > { %9826 = vmatpush3.bf16.msra.mxu0 %v10736_v47 }
 0x2d0   : > { %9848 = vmatpush3.bf16.msra.mxu1 %v10737_v60  ;;  %9827 = vmatprep.subr.bf16.mxu0 %v10738_v48 }
 0x2d1   : > { %9849 = vmatprep.subr.bf16.mxu1 %v10739_v50 }
 0x2d3   : > { %9828 = vmatpush3.bf16.msra.mxu0 %v10740_v51 }
 0x2d4   : > { %9850 = vmatpush3.bf16.msra.mxu1 %v10741_v61  ;;  %9857 = vmatprep.subr.bf16.mxu0 %v10742_v53 }
 0x2d5   : > { %9879 = vmatprep.subr.bf16.mxu1 %v10743_v45 }
 0x2d6   : > { %v9565_v62 = vpop.f32.mrf.mxu0  ;;  %6660 = vmatmul.mubr.bf16.vlgmr.msra.gmra.mxu0 %v6227_v46 }
 0x2d7   : > { %v9587_v6 = vpop.f32.mrf.mxu1  ;;  %6700 = vmatmul.mubr.bf16.vlgmr.msra.gmra.mxu1 %v6229_v55  ;;  %9858 = vmatpush3.bf16.msra.mxu0 %v10744_v42 }
 0x2d8   : > { %6739 = vmatprep.mubr.bf16.mxu0 %v6232_v4  ;;  %9880 = vmatpush3.bf16.msra.mxu1 %v10745_v63  ;;  %v9566_v9 = vpop.f32.mrf.mxu0 }
 0x2d9   : > { %6779 = vmatprep.mubr.bf16.mxu1 %v6234_v7  ;;  %v9567_v57 = vadd.f32 %v9566_v9, %v9565_v62  ;;  %v9588_v12 = vpop.f32.mrf.mxu1  ;;  %9859 = vmatprep.subr.bf16.mxu0 %v10746_v58 }
 0x2da   : > { %v9589_v13 = vadd.f32 %v9588_v12, %v9587_v6  ;;  %v9568_v14 = vpop.f32.mrf.mxu0  ;;  %9881 = vmatprep.subr.bf16.mxu1 %v10747_v5 }
 0x2db   : > { %v9590_v54 = vpop.f32.mrf.mxu1  ;;  %9860 = vmatpush3.bf16.msra.mxu0 %v10748_v52 }
 0x2dc   : > { %v4624_v16 = vadd.f32 %v9589_v13, %v9567_v57  ;;  %9882 = vmatpush3.bf16.msra.mxu1 %v10749_v43  ;;  %v9569_v17 = vpop.f32.mrf.mxu0  ;;  %9861 = vmatprep.subr.bf16.mxu0 %v10750_v10 }
 0x2dd   : > { %v9591_v19 = vpop.f32.mrf.mxu1  ;;  %9883 = vmatprep.subr.bf16.mxu1 %v10751_v44 }
 0x2df   : > { %9862 = vmatpush3.bf16.msra.mxu0 %v10752_v15 }
 0x2e0   : > { %9884 = vmatpush3.bf16.msra.mxu1 %v10753_v18  ;;  %9863 = vmatprep.subr.bf16.mxu0 %v10754_v2 }
 0x2e1   : > { %9885 = vmatprep.subr.bf16.mxu1 %v10755_v20 }
 0x2e3   : > { %9864 = vmatpush3.bf16.msra.mxu0 %v10756_v21 }
 0x2e4   : > { %9886 = vmatpush3.bf16.msra.mxu1 %v10757_v22  ;;  %9865 = vmatprep.subr.bf16.mxu0 %v10758_v8 }
 0x2e5   : > { %9887 = vmatprep.subr.bf16.mxu1 %v10759_v59 }
 0x2e7   : > { %9866 = vmatpush3.bf16.msra.mxu0 %v10760_v3 }
 0x2e8   : > { %9888 = vmatpush3.bf16.msra.mxu1 %v10761_v11  ;;  %9867 = vmatprep.subr.bf16.mxu0 %v10762_v23 }
 0x2e9   : > { %9889 = vmatprep.subr.bf16.mxu1 %v10763_v24 }
 0x2eb   : > { %9868 = vmatpush3.bf16.msra.mxu0 %v10764_v56 }
 0x2ec   : > { %9890 = vmatpush3.bf16.msra.mxu1 %v10765_v25  ;;  %9869 = vmatprep.subr.bf16.mxu0 %v10766_v26 }
 0x2ed   : > { %9891 = vmatprep.subr.bf16.mxu1 %v10767_v0 }
 0x2ef   : > { %9870 = vmatpush3.bf16.msra.mxu0 %v10768_v27 }
 0x2f0   : > { %9892 = vmatpush3.bf16.msra.mxu1 %v10769_v28  ;;  %9871 = vmatprep.subr.bf16.mxu0 %v10770_v30 }
 0x2f1   : > { %9893 = vmatprep.subr.bf16.mxu1 %v10771_v31 }
 0x2f3   : > { %9872 = vmatpush3.bf16.msra.mxu0 %v10772_v32 }
 0x2f4   : > { %9894 = vmatpush3.bf16.msra.mxu1 %v10773_v33 }
 0x2f6   : > { %v9609_v34 = vpop.f32.mrf.mxu0  ;;  %6740 = vmatmul.mubr.bf16.vlgmr.msra.gmra.mxu0 %v6231_v1 }
 0x2f7   : > { %v9631_v35 = vpop.f32.mrf.mxu1  ;;  %6780 = vmatmul.mubr.bf16.vlgmr.msra.gmra.mxu1 %v6233_v49 }
 0x2f8   : > { %v9610_v36 = vpop.f32.mrf.mxu0 }
 0x2f9   : > { %v9611_v37 = vadd.f32 %v9610_v36, %v9609_v34  ;;  %v9632_v39 = vpop.f32.mrf.mxu1 }
 0x2fa   : > { %v9633_v41 = vadd.f32 %v9632_v39, %v9631_v35  ;;  %v9612_v47 = vpop.f32.mrf.mxu0 }
 0x2fb   : > { %v4664_v60 = vadd.f32 %v9611_v37, %v4624_v16  ;;  %v9634_v48 = vpop.f32.mrf.mxu1 }
 0x2fc   : > { %v9613_v50 = vpop.f32.mrf.mxu0 }
 0x2fd   : > { %v4704_v51 = vadd.f32 %v9633_v41, %v4664_v60  ;;  %v9635_v61 = vpop.f32.mrf.mxu1 }
 0x2ff   : > { %v4709_v53 = vadd.f32 %v4704_v51, %v12012_v29 }
 0x316   : > { %v9653_v45 = vpop.f32.mrf.mxu0 }
 0x317   : > { %v9675_v38 = vpop.f32.mrf.mxu1 }
 0x318   : > { %v9654_v42 = vpop.f32.mrf.mxu0 }
 0x319   : > { %v9655_v40 = vadd.f32 %v9654_v42, %v9653_v45  ;;  %v9676_v46 = vpop.f32.mrf.mxu1 }
 0x31a   : > { %v9677_v63 = vadd.f32 %v9676_v46, %v9675_v38  ;;  %v9656_v55 = vpop.f32.mrf.mxu0 }
 0x31b   : > { %v9678_v58 = vpop.f32.mrf.mxu1 }
 0x31c   : > { %v5322_v62 = vadd.f32 %v9677_v63, %v9655_v40  ;;  %v9657_v4 = vpop.f32.mrf.mxu0  ;;  %v6788_v58 = vld [vmem:[#allocation2] sm:$0x3] }
 0x31d   : > { %v9679_v5 = vpop.f32.mrf.mxu1 }
 0x336   : > { %v9697_v6 = vpop.f32.mrf.mxu0 }
 0x337   : > { %v9719_v7 = vpop.f32.mrf.mxu1 }
 0x338   : > { %v9698_v52 = vpop.f32.mrf.mxu0 }
 0x339   : > { %v9699_v9 = vadd.f32 %v9698_v52, %v9697_v6  ;;  %v9720_v43 = vpop.f32.mrf.mxu1 }
 0x33a   : > { %v9721_v10 = vadd.f32 %v9720_v43, %v9719_v7  ;;  %v9700_v57 = vpop.f32.mrf.mxu0 }
 0x33b   : > { %v5362_v12 = vadd.f32 %v9699_v9, %v5322_v62  ;;  %v9722_v29 = vpop.f32.mrf.mxu1 }
 0x33c   : > { %v9701_v44 = vpop.f32.mrf.mxu0 }
 0x33d   : > { %v5402_v13 = vadd.f32 %v9721_v10, %v5362_v12  ;;  %v9723_v14 = vpop.f32.mrf.mxu1 }
 0x33f   : > { %v5407_v54 = vadd.f32 %v5402_v13, %v4709_v53 }
 0x356   : > { %v9741_v15 = vpop.f32.mrf.mxu0 }
 0x357   : > { %v9763_v16 = vpop.f32.mrf.mxu1 }
 0x358   : > { %v9742_v17 = vpop.f32.mrf.mxu0 }
 0x359   : > { %v9743_v18 = vadd.f32 %v9742_v17, %v9741_v15  ;;  %v9764_v2 = vpop.f32.mrf.mxu1 }
 0x35a   : > { %v9765_v19 = vadd.f32 %v9764_v2, %v9763_v16  ;;  %v9744_v20 = vpop.f32.mrf.mxu0 }
 0x35b   : > { %v9766_v21 = vpop.f32.mrf.mxu1 }
 0x35c   : > { %v6012_v22 = vadd.f32 %v9765_v19, %v9743_v18  ;;  %v9745_v8 = vpop.f32.mrf.mxu0 }
 0x35d   : > { %v9767_v59 = vpop.f32.mrf.mxu1 }
 0x376   : > { %v9785_v3 = vpop.f32.mrf.mxu0 }
 0x377   : > { %v9807_v11 = vpop.f32.mrf.mxu1 }
 0x378   : > { %v9786_v23 = vpop.f32.mrf.mxu0 }
 0x379   : > { %v9787_v24 = vadd.f32 %v9786_v23, %v9785_v3  ;;  %v9808_v56 = vpop.f32.mrf.mxu1 }
 0x37a   : > { %v9788_v25 = vpop.f32.mrf.mxu0  ;;  %v9809_v0 = vadd.f32 %v9808_v56, %v9807_v11 }
 0x37b   : > { %v6052_v26 = vadd.f32 %v9787_v24, %v6012_v22  ;;  %v9810_v27 = vpop.f32.mrf.mxu1 }
 0x37c   : > { %v9789_v28 = vpop.f32.mrf.mxu0 }
 0x37d   : > { %v6092_v30 = vadd.f32 %v9809_v0, %v6052_v26  ;;  %v9811_v31 = vpop.f32.mrf.mxu1 }
 0x37f   : > { %v6097_v32 = vadd.f32 %v6092_v30, %v5407_v54 }
 0x396   : > { %v9829_v33 = vpop.f32.mrf.mxu0 }
 0x397   : > { %v9851_v1 = vpop.f32.mrf.mxu1 }
 0x398   : > { %v9830_v49 = vpop.f32.mrf.mxu0 }
 0x399   : > { %v9852_v34 = vpop.f32.mrf.mxu1  ;;  %v9831_v41 = vadd.f32 %v9830_v49, %v9829_v33 }
 0x39a   : > { %v9832_v35 = vpop.f32.mrf.mxu0  ;;  %v9853_v47 = vadd.f32 %v9852_v34, %v9851_v1 }
 0x39b   : > { %v9854_v36 = vpop.f32.mrf.mxu1 }
 0x39c   : > { %v9833_v37 = vpop.f32.mrf.mxu0  ;;  %v6702_v51 = vadd.f32 %v9853_v47, %v9831_v41 }
 0x39d   : > { %v9855_v39 = vpop.f32.mrf.mxu1 }
 0x3b6   : > { %v9873_v60 = vpop.f32.mrf.mxu0 }
 0x3b7   : > { %v9895_v48 = vpop.f32.mrf.mxu1 }
 0x3b8   : > { %v9874_v50 = vpop.f32.mrf.mxu0 }
 0x3b9   : > { %v9875_v61 = vadd.f32 %v9874_v50, %v9873_v60  ;;  %v9896_v53 = vpop.f32.mrf.mxu1 }
 0x3ba   : > { %v9876_v45 = vpop.f32.mrf.mxu0  ;;  %v9897_v42 = vadd.f32 %v9896_v53, %v9895_v48 }
 0x3bb   : > { %v6742_v38 = vadd.f32 %v9875_v61, %v6702_v51  ;;  %v9898_v40 = vpop.f32.mrf.mxu1 }
 0x3bc   : > { %v9877_v46 = vpop.f32.mrf.mxu0 }
 0x3bd   : > { %v6782_v63 = vadd.f32 %v9897_v42, %v6742_v38  ;;  %v9899_v55 = vpop.f32.mrf.mxu1 }
 0x3bf   : > { %v6787_v62 = vadd.f32 %v6782_v63, %v6097_v32  ;;  %6795 = sbr.rel (%p9175_p6) target bundleno = 2043 (0x7fb), region = 120 }
 0x3c1   : > { %v6789_v4 = vadd.f32 %v6788_v58, %v6787_v62 }
 0x3c3   : > { %6791 = vst.msk [vmem:[#allocation2] sm:$0x3] %vm6790_vm1, %v6789_v4 }
 0x3c4   : > { %v6920_v5 = vld [vmem:[%s12646_s25 + $0x78] sm:$0xff]  ;;  %v10796_v6 = vmov 0.0   ;;  %v6919_v7 = vld [vmem:[%s12646_s25 + $0x70] sm:$0xff]  ;;  %vm10797_vm2 = vmmov 0   ;;  %v6918_v52 = vld [vmem:[%s12646_s25 + $0x68] sm:$0xff]  ;;  %vm6827_vm4 = vcmask 785408  }
 0x3c5   : > { %10065 = vmatprep.subr.mxu1 %v10796_v6  ;;  %10097 = vmatprep.mubr.msk.f32.mxu1 %vm10797_vm2, %v10796_v6  ;;  %v6917_v9 = vld [vmem:[%s12646_s25 + $0x60] sm:$0xff]  ;;  %v6819_v43 = vld [vmem:[%s12647_s22 + $0x58] sm:$0xff]  ;;  %v6818_v10 = vld [vmem:[%s12647_s22 + $0x50] sm:$0xff]  ;;  %vm7595_vm11 = vcmask 392192   ;;  %vm7675_vm12 = vcmask 1024  }
 0x3c6   : > { %10066 = vmatpush3.msra.mxu1 %v6920_v5  ;;  %10038 = vmatprep.subr.mxu0 %v10796_v6  ;;  %v6916_v57 = vld [vmem:[%s12646_s25 + $0x58] sm:$0xff]  ;;  %v6817_v12 = vld [vmem:[%s12647_s22 + $0x48] sm:$0xff]  ;;  %v6915_v29 = vld [vmem:[%s12646_s25 + $0x50] sm:$0xff] }
 0x3c7   : > { %10067 = vmatprep.subr.mxu1 %v10796_v6  ;;  %10062 = vmatprep.mubr.msk.f32.mxu0 %vm10797_vm2, %v10796_v6  ;;  %v6816_v44 = vld [vmem:[%s12647_s22 + $0x40] sm:$0xff]  ;;  %v6914_v13 = vld [vmem:[%s12646_s25 + $0x48] sm:$0xff]  ;;  %v6815_v14 = vld [vmem:[%s12647_s22 + $0x38] sm:$0xff] }
 0x3c8   : > { %10068 = vmatpush3.msra.mxu1 %v6919_v7  ;;  %10039 = vmatpush3.msra.mxu0 %v6819_v43  ;;  %v6913_v54 = vld [vmem:[%s12646_s25 + $0x40] sm:$0xff]  ;;  %v6814_v15 = vld [vmem:[%s12647_s22 + $0x30] sm:$0xff]  ;;  %v6912_v16 = vld [vmem:[%s12646_s25 + $0x38] sm:$0xff] }
 0x3c9   : > { %10069 = vmatprep.subr.mxu1 %v10796_v6  ;;  %10040 = vmatprep.subr.mxu0 %v10796_v6  ;;  %v6813_v17 = vld [vmem:[%s12647_s22 + $0x28] sm:$0xff]  ;;  %v9176_v2 = vld [vmem:[%s12648_s4] ss:$0 sm:$0xff]  ;;  %v6911_v19 = vld [vmem:[%s12646_s25 + $0x30] sm:$0xff] }
 0x3ca   : > { %10070 = vmatpush3.msra.mxu1 %v6918_v52  ;;  %10041 = vmatpush3.msra.mxu0 %v6818_v10  ;;  %v6796_v18 = vld [vmem:[#allocation2] sm:$0x3]  ;;  %v6910_v22 = vld [vmem:[%s12646_s25 + $0x28] sm:$0xff]  ;;  %v6811_v8 = vld [vmem:[%s12647_s22 + $0x18] sm:$0xff] }
 0x3cb   : > { %10071 = vmatprep.subr.mxu1 %v10796_v6  ;;  %10042 = vmatprep.subr.mxu0 %v10796_v6  ;;  %v6812_v20 = vld [vmem:[%s12647_s22 + $0x20] sm:$0xff]  ;;  %v6804_v21 = vadd.f32 %v9176_v2, %v6796_v18  ;;  %v6810_v3 = vld [vmem:[%s12647_s22 + $0x10] sm:$0xff]  ;;  %v6908_v23 = vld [vmem:[%s12646_s25 + $0x18] sm:$0xff] }
 0x3cc   : > { %10072 = vmatpush3.msra.mxu1 %v6917_v9  ;;  %10043 = vmatpush3.msra.mxu0 %v6817_v12  ;;  %v6909_v59 = vld [vmem:[%s12646_s25 + $0x20] sm:$0xff]  ;;  %v6809_v24 = vld [vmem:[%s12647_s22 + $0x8] sm:$0xff]  ;;  %v6907_v56 = vld [vmem:[%s12646_s25 + $0x10] sm:$0xff] }
 0x3cd   : > { %10073 = vmatprep.subr.mxu1 %v10796_v6  ;;  %10044 = vmatprep.subr.mxu0 %v10796_v6  ;;  %v6806_v11 = vmul.f32 0.1, %v6804_v21  ;;  %vm6805_vm3 = vcmp.gt.f32.partialorder %v6804_v21, 0.0  ;;  %v6808_v25 = vld [vmem:[%s12647_s22] sm:$0xff]  ;;  %v6906_v0 = vld [vmem:[%s12646_s25 + $0x8] sm:$0xff]  ;;  %v7012_v27 = vld [vmem:[%s12612_s10 + $0x58] sm:$0xff] }
 0x3ce   : > { %10074 = vmatpush3.msra.mxu1 %v6916_v57  ;;  %10045 = vmatpush3.msra.mxu0 %v6816_v44  ;;  %v6905_v28 = vld [vmem:[%s12646_s25] sm:$0xff]  ;;  %v7011_v31 = vld [vmem:[%s12612_s10 + $0x50] sm:$0xff]  ;;  %v7128_v32 = vld [vmem:[%s12615_s13 + $0xf8] sm:$0xff] }
 0x3cf   : > { %10075 = vmatprep.subr.mxu1 %v10796_v6  ;;  %10046 = vmatprep.subr.mxu0 %v10796_v6  ;;  %v6807_v26 = vsel %vm6805_vm3, %v6804_v21, %v6806_v11  ;;  %v6904_v30 = vld [vmem:[%s12649_s3] sm:$0x3]  ;;  %v7010_v33 = vld [vmem:[%s12612_s10 + $0x48] sm:$0xff]  ;;  %v7112_v1 = vld [vmem:[%s12615_s13 + $0x78] sm:$0xff] }
 0x3d0   : > { %10076 = vmatpush3.msra.mxu1 %v6915_v29  ;;  %10047 = vmatpush3.msra.mxu0 %v6815_v14  ;;  %v7127_v49 = vld [vmem:[%s12615_s13 + $0xf0] sm:$0xff]  ;;  %v7009_v34 = vld [vmem:[%s12612_s10 + $0x40] sm:$0xff]  ;;  %v7126_v36 = vld [vmem:[%s12615_s13 + $0xe8] sm:$0xff] }
 0x3d1   : > { %10077 = vmatprep.subr.mxu1 %v10796_v6  ;;  %10048 = vmatprep.subr.mxu0 %v10796_v6  ;;  %v7111_v35 = vld [vmem:[%s12615_s13 + $0x70] sm:$0xff]  ;;  %v7008_v37 = vld [vmem:[%s12612_s10 + $0x38] sm:$0xff]  ;;  %v7110_v39 = vld [vmem:[%s12615_s13 + $0x68] sm:$0xff] }
 0x3d2   : > { %10078 = vmatpush3.msra.mxu1 %v6914_v13  ;;  %10049 = vmatpush3.msra.mxu0 %v6814_v15  ;;  %v7125_v41 = vld [vmem:[%s12615_s13 + $0xe0] sm:$0xff]  ;;  %v7007_v47 = vld [vmem:[%s12612_s10 + $0x30] sm:$0xff]  ;;  %v7124_v48 = vld [vmem:[%s12615_s13 + $0xd8] sm:$0xff] }
 0x3d3   : > { %10079 = vmatprep.subr.mxu1 %v10796_v6  ;;  %10050 = vmatprep.subr.mxu0 %v10796_v6  ;;  %v7109_v60 = vld [vmem:[%s12615_s13 + $0x60] sm:$0xff]  ;;  %v7006_v50 = vld [vmem:[%s12612_s10 + $0x28] sm:$0xff]  ;;  %v7108_v51 = vld [vmem:[%s12615_s13 + $0x58] sm:$0xff] }
 0x3d4   : > { %10080 = vmatpush3.msra.mxu1 %v6913_v54  ;;  %10051 = vmatpush3.msra.mxu0 %v6813_v17  ;;  %v7123_v61 = vld [vmem:[%s12615_s13 + $0xd0] sm:$0xff]  ;;  %v7005_v53 = vld [vmem:[%s12612_s10 + $0x20] sm:$0xff]  ;;  %v7004_v45 = vld [vmem:[%s12612_s10 + $0x18] sm:$0xff] }
 0x3d5   : > { %10081 = vmatprep.subr.mxu1 %v10796_v6  ;;  %10052 = vmatprep.subr.mxu0 %v10796_v6  ;;  %v7107_v38 = vld [vmem:[%s12615_s13 + $0x50] sm:$0xff]  ;;  %v7122_v40 = vld [vmem:[%s12615_s13 + $0xc8] sm:$0xff]  ;;  %v7121_v55 = vld [vmem:[%s12615_s13 + $0xc0] sm:$0xff] }
 0x3d6   : > { %10082 = vmatpush3.msra.mxu1 %v6912_v16  ;;  %10053 = vmatpush3.msra.mxu0 %v6812_v20  ;;  %v7003_v42 = vld [vmem:[%s12612_s10 + $0x10] sm:$0xff]  ;;  %v7106_v46 = vld [vmem:[%s12615_s13 + $0x48] sm:$0xff]  ;;  %v7105_v58 = vld [vmem:[%s12615_s13 + $0x40] sm:$0xff] }
 0x3d7   : > { %10083 = vmatprep.subr.mxu1 %v10796_v6  ;;  %10054 = vmatprep.subr.mxu0 %v10796_v6  ;;  %v7002_v63 = vld [vmem:[%s12612_s10 + $0x8] sm:$0xff]  ;;  %v7001_v62 = vld [vmem:[%s12612_s10] sm:$0xff]  ;;  %v7120_v4 = vld [vmem:[%s12615_s13 + $0xb8] sm:$0xff] }
 0x3d8   : > { %10084 = vmatpush3.msra.mxu1 %v6911_v19  ;;  %10055 = vmatpush3.msra.mxu0 %v6811_v8  ;;  %v7104_v5 = vld [vmem:[%s12615_s13 + $0x38] sm:$0xff]  ;;  %v7119_v7 = vld [vmem:[%s12615_s13 + $0xb0] sm:$0xff]  ;;  %v7118_v9 = vld [vmem:[%s12615_s13 + $0xa8] sm:$0xff] }
 0x3d9   : > { %10085 = vmatprep.subr.mxu1 %v10796_v6  ;;  %10056 = vmatprep.subr.mxu0 %v10796_v6  ;;  %v7103_v52 = vld [vmem:[%s12615_s13 + $0x30] sm:$0xff]  ;;  %v7102_v43 = vld [vmem:[%s12615_s13 + $0x28] sm:$0xff]  ;;  %v7117_v10 = vld [vmem:[%s12615_s13 + $0xa0] sm:$0xff] }
 0x3da   : > { %10086 = vmatpush3.msra.mxu1 %v6910_v22  ;;  %10057 = vmatpush3.msra.mxu0 %v6810_v3  ;;  %v7101_v57 = vld [vmem:[%s12615_s13 + $0x20] sm:$0xff]  ;;  %v7116_v12 = vld [vmem:[%s12615_s13 + $0x98] sm:$0xff]  ;;  %v7115_v14 = vld [vmem:[%s12615_s13 + $0x90] sm:$0xff] }
 0x3db   : > { %10087 = vmatprep.subr.mxu1 %v10796_v6  ;;  %10058 = vmatprep.subr.mxu0 %v10796_v6  ;;  %v9183_v29 = vld.sshfl [vmem:[%s12614_s12] sm:$0x33 pattern:$0x76325410]  ;;  %v7100_v44 = vld [vmem:[%s12615_s13 + $0x18] sm:$0xff]  ;;  %v7099_v54 = vld [vmem:[%s12615_s13 + $0x10] sm:$0xff] }
 0x3dc   : > { %10088 = vmatpush3.msra.mxu1 %v6909_v59  ;;  %10059 = vmatpush3.msra.mxu0 %v6809_v24  ;;  %v7144_v13 = vcombine.high %v9183_v29, %v9183_v29  ;;  %v7114_v15 = vld [vmem:[%s12615_s13 + $0x88] sm:$0xff]  ;;  %v7113_v17 = vld [vmem:[%s12615_s13 + $0x80] sm:$0xff]  ;;  %v7231_v2 = vld [vmem:[%s12617_s15 + $0x58] sm:$0xff] }
 0x3dd   : > { %10089 = vmatprep.subr.mxu1 %v10796_v6  ;;  %10060 = vmatprep.subr.mxu0 %v10796_v6  ;;  %v7098_v16 = vld [vmem:[%s12615_s13 + $0x8] sm:$0xff]  ;;  %v7097_v18 = vld [vmem:[%s12615_s13] sm:$0xff]  ;;  %v7230_v19 = vld [vmem:[%s12617_s15 + $0x50] sm:$0xff] }
 0x3de   : > { %10090 = vmatpush3.msra.mxu1 %v6908_v23  ;;  %10061 = vmatpush3.msra.mxu0 %v6808_v25  ;;  %v7229_v20 = vld [vmem:[%s12617_s15 + $0x48] sm:$0xff]  ;;  %v7228_v21 = vld [vmem:[%s12617_s15 + $0x40] sm:$0xff]  ;;  %v7227_v22 = vld [vmem:[%s12617_s15 + $0x38] sm:$0xff] }
 0x3df   : > { %10091 = vmatprep.subr.mxu1 %v10796_v6  ;;  %10063 = vmatmul.mubr.msk.f32.vlgmr.msra.gmra.mxu0 %vm6827_vm4, %v6807_v26  ;;  %v7226_v8 = vld [vmem:[%s12617_s15 + $0x30] sm:$0xff]  ;;  %v7225_v59 = vld [vmem:[%s12617_s15 + $0x28] sm:$0xff]  ;;  %v7224_v3 = vld [vmem:[%s12617_s15 + $0x20] sm:$0xff] }
 0x3e0   : > { %10092 = vmatpush3.msra.mxu1 %v6907_v56  ;;  %10100 = vmatprep.subr.mxu0 %v10796_v6  ;;  %v7223_v11 = vld [vmem:[%s12617_s15 + $0x18] sm:$0xff]  ;;  %v7222_v23 = vld [vmem:[%s12617_s15 + $0x10] sm:$0xff]  ;;  %v7221_v24 = vld [vmem:[%s12617_s15 + $0x8] sm:$0xff] }
 0x3e1   : > { %10093 = vmatprep.subr.mxu1 %v10796_v6  ;;  %10101 = vmatpush3.msra.mxu0 %v7012_v27  ;;  %v7220_v56 = vld [vmem:[%s12617_s15] sm:$0xff] }
 0x3e2   : > { %10094 = vmatpush3.msra.mxu1 %v6906_v0  ;;  %10102 = vmatprep.subr.mxu0 %v10796_v6  ;;  %v9177_v25 = vld [vmem:[%s12650_s2] ss:$0 sm:$0xff] }
 0x3e3   : > { %10095 = vmatprep.subr.mxu1 %v10796_v6  ;;  %10103 = vmatpush3.msra.mxu0 %v7011_v31  ;;  %v9179_v27 = vld [vmem:[%s12611_s9] ss:$0 sm:$0xff] }
 0x3e4   : > { %10096 = vmatpush3.msra.mxu1 %v6905_v28  ;;  %10104 = vmatprep.subr.mxu0 %v10796_v6 }
 0x3e5   : > { %10098 = vmatmul.mubr.f32.vlgmr.msra.gmra.mxu1 %v6904_v30  ;;  %9944 = vmatprep.subr.mxu1 %v7128_v32 }
 0x3e6   : > { %10105 = vmatpush3.msra.mxu0 %v7010_v33  ;;  %9945 = vmatpush3.msra.mxu1 %v7112_v1 }
 0x3e7   : > { %10106 = vmatprep.subr.mxu0 %v10796_v6  ;;  %9946 = vmatprep.subr.mxu1 %v7127_v49 }
 0x3e8   : > { %10107 = vmatpush3.msra.mxu0 %v7009_v34  ;;  %9947 = vmatpush3.msra.mxu1 %v7111_v35  ;;  %v7243_v34 = vld [vmem:[%s12618_s16 + $0x58] sm:$0xff] }
 0x3e9   : > { %10108 = vmatprep.subr.mxu0 %v10796_v6  ;;  %9948 = vmatprep.subr.mxu1 %v7126_v36  ;;  %v7242_v36 = vld [vmem:[%s12618_s16 + $0x50] sm:$0xff] }
 0x3ea   : > { %10109 = vmatpush3.msra.mxu0 %v7008_v37  ;;  %9949 = vmatpush3.msra.mxu1 %v7110_v39  ;;  %v7241_v37 = vld [vmem:[%s12618_s16 + $0x48] sm:$0xff]  ;;  %v7240_v39 = vld [vmem:[%s12618_s16 + $0x40] sm:$0xff] }
 0x3eb   : > { %10110 = vmatprep.subr.mxu0 %v10796_v6  ;;  %9950 = vmatprep.subr.mxu1 %v7125_v41  ;;  %v7239_v41 = vld [vmem:[%s12618_s16 + $0x38] sm:$0xff] }
 0x3ec   : > { %10111 = vmatpush3.msra.mxu0 %v7007_v47  ;;  %9951 = vmatpush3.msra.mxu1 %v7109_v60  ;;  %v7238_v47 = vld [vmem:[%s12618_s16 + $0x30] sm:$0xff]  ;;  %v7237_v60 = vld [vmem:[%s12618_s16 + $0x28] sm:$0xff] }
 0x3ed   : > { %10112 = vmatprep.subr.mxu0 %v10796_v6  ;;  %9952 = vmatprep.subr.mxu1 %v7124_v48  ;;  %v7236_v48 = vld [vmem:[%s12618_s16 + $0x20] sm:$0xff] }
 0x3ee   : > { %10113 = vmatpush3.msra.mxu0 %v7006_v50  ;;  %9953 = vmatpush3.msra.mxu1 %v7108_v51  ;;  %v7235_v50 = vld [vmem:[%s12618_s16 + $0x18] sm:$0xff]  ;;  %v7234_v51 = vld [vmem:[%s12618_s16 + $0x10] sm:$0xff] }
 0x3ef   : > { %10114 = vmatprep.subr.mxu0 %v10796_v6  ;;  %9954 = vmatprep.subr.mxu1 %v7123_v61  ;;  %v7233_v61 = vld [vmem:[%s12618_s16 + $0x8] sm:$0xff] }
 0x3f0   : > { %10115 = vmatpush3.msra.mxu0 %v7005_v53  ;;  %10124 = vmatprep.mubr.msk.f32.mxu0 %vm10797_vm2, %v10796_v6  ;;  %v7232_v53 = vld [vmem:[%s12618_s16] sm:$0xff] }
 0x3f1   : > { %10116 = vmatprep.subr.mxu0 %v10796_v6  ;;  %9955 = vmatpush3.msra.mxu1 %v7107_v38 }
 0x3f2   : > { %10117 = vmatpush3.msra.mxu0 %v7004_v45  ;;  %9956 = vmatprep.subr.mxu1 %v7122_v40  ;;  %v9180_v40 = vld [vmem:[%s12613_s11] ss:$0 sm:$0xff] }
 0x3f3   : > { %10118 = vmatprep.subr.mxu0 %v10796_v6  ;;  %9957 = vmatpush3.msra.mxu1 %v7106_v46 }
 0x3f4   : > { %10119 = vmatpush3.msra.mxu0 %v7003_v42  ;;  %9958 = vmatprep.subr.mxu1 %v7121_v55 }
 0x3f5   : > { %10120 = vmatprep.subr.mxu0 %v10796_v6  ;;  %9959 = vmatpush3.msra.mxu1 %v7105_v58 }
 0x3f6   : > { %10121 = vmatpush3.msra.mxu0 %v7002_v63  ;;  %9960 = vmatprep.subr.mxu1 %v7120_v4  ;;  %v7401_v4 = vld [vmem:[%s12619_s17 + $0x58] sm:$0xff] }
 0x3f7   : > { %10122 = vmatprep.subr.mxu0 %v10796_v6  ;;  %9961 = vmatpush3.msra.mxu1 %v7104_v5 }
 0x3f8   : > { %10123 = vmatpush3.msra.mxu0 %v7001_v62  ;;  %9962 = vmatprep.subr.mxu1 %v7119_v7  ;;  %v7400_v7 = vld [vmem:[%s12619_s17 + $0x50] sm:$0xff] }
 0x3f9   : > { %10127 = vmatprep.subr.mxu0 %v10796_v6  ;;  %9963 = vmatpush3.msra.mxu1 %v7103_v52  ;;  %v7399_v52 = vld [vmem:[%s12619_s17 + $0x48] sm:$0xff] }
 0x3fa   : > { %9964 = vmatprep.subr.mxu1 %v7118_v9  ;;  %7211 = vmatprep.mubr.f32.mxu1 %v7144_v13  ;;  %v7398_v9 = vld [vmem:[%s12619_s17 + $0x40] sm:$0xff]  ;;  %v7393_v13 = vld [vmem:[%s12619_s17 + $0x18] sm:$0xff] }
 0x3fb   : > { %9965 = vmatpush3.msra.mxu1 %v7102_v43  ;;  %v7397_v43 = vld [vmem:[%s12619_s17 + $0x38] sm:$0xff] }
 0x3fc   : > { %9966 = vmatprep.subr.mxu1 %v7117_v10  ;;  %v7396_v10 = vld [vmem:[%s12619_s17 + $0x30] sm:$0xff] }
 0x3fd   : > { %9967 = vmatpush3.msra.mxu1 %v7101_v57  ;;  %v7395_v57 = vld [vmem:[%s12619_s17 + $0x28] sm:$0xff] }
 0x3fe   : > { %9968 = vmatprep.subr.mxu1 %v7116_v12 }
 0x3ff   : > { %9969 = vmatpush3.msra.mxu1 %v7100_v44  ;;  %v7394_v44 = vld [vmem:[%s12619_s17 + $0x20] sm:$0xff] }
 0x400   : > { %9970 = vmatprep.subr.mxu1 %v7115_v14 }
 0x401   : > { %9971 = vmatpush3.msra.mxu1 %v7099_v54  ;;  %v7392_v54 = vld [vmem:[%s12619_s17 + $0x10] sm:$0xff] }
 0x402   : > { %9972 = vmatprep.subr.mxu1 %v7114_v15  ;;  %v7391_v15 = vld [vmem:[%s12619_s17 + $0x8] sm:$0xff] }
 0x403   : > { %9973 = vmatpush3.msra.mxu1 %v7098_v16 }
 0x404   : > { %9974 = vmatprep.subr.mxu1 %v7113_v17  ;;  %v7390_v17 = vld [vmem:[%s12619_s17] sm:$0xff] }
 0x405   : > { %9975 = vmatpush3.msra.mxu1 %v7097_v18 }
 0x406   : > { %7212 = vmatmul.mubr.f32.vlgmr.msra.gmra.mxu1 %v9183_v29  ;;  %10154 = vmatprep.subr.mxu1 %v10796_v6  ;;  %v9182_v29 = vld [vmem:[%s12616_s14] ss:$0 sm:$0xff] }
 0x407   : > { %10155 = vmatpush3.msra.mxu1 %v7231_v2  ;;  %10178 = vmatprep.mubr.msk.f32.mxu1 %vm10797_vm2, %v10796_v6  ;;  %v7498_v2 = vld [vmem:[%s12621_s19 + $0x58] sm:$0xff] }
 0x408   : > { %10156 = vmatprep.subr.mxu1 %v10796_v6 }
 0x409   : > { %10157 = vmatpush3.msra.mxu1 %v7230_v19  ;;  %v7497_v19 = vld [vmem:[%s12621_s19 + $0x50] sm:$0xff] }
 0x40a   : > { %10158 = vmatprep.subr.mxu1 %v10796_v6 }
 0x40b   : > { %10159 = vmatpush3.msra.mxu1 %v7229_v20  ;;  %v7496_v20 = vld [vmem:[%s12621_s19 + $0x48] sm:$0xff] }
 0x40c   : > { %10160 = vmatprep.subr.mxu1 %v10796_v6 }
 0x40d   : > { %10161 = vmatpush3.msra.mxu1 %v7228_v21  ;;  %v7495_v21 = vld [vmem:[%s12621_s19 + $0x40] sm:$0xff] }
 0x40e   : > { %10162 = vmatprep.subr.mxu1 %v10796_v6 }
 0x40f   : > { %10163 = vmatpush3.msra.mxu1 %v7227_v22  ;;  %v7494_v22 = vld [vmem:[%s12621_s19 + $0x38] sm:$0xff] }
 0x410   : > { %10164 = vmatprep.subr.mxu1 %v10796_v6 }
 0x411   : > { %10165 = vmatpush3.msra.mxu1 %v7226_v8  ;;  %v7493_v8 = vld [vmem:[%s12621_s19 + $0x30] sm:$0xff] }
 0x412   : > { %10166 = vmatprep.subr.mxu1 %v10796_v6 }
 0x413   : > { %10167 = vmatpush3.msra.mxu1 %v7225_v59  ;;  %v7492_v59 = vld [vmem:[%s12621_s19 + $0x28] sm:$0xff] }
 0x414   : > { %10168 = vmatprep.subr.mxu1 %v10796_v6 }
 0x415   : > { %10169 = vmatpush3.msra.mxu1 %v7224_v3  ;;  %v7491_v3 = vld [vmem:[%s12621_s19 + $0x20] sm:$0xff] }
 0x416   : > { %10170 = vmatprep.subr.mxu1 %v10796_v6 }
 0x417   : > { %10171 = vmatpush3.msra.mxu1 %v7223_v11  ;;  %v7490_v11 = vld [vmem:[%s12621_s19 + $0x18] sm:$0xff] }
 0x418   : > { %10172 = vmatprep.subr.mxu1 %v10796_v6 }
 0x419   : > { %10173 = vmatpush3.msra.mxu1 %v7222_v23  ;;  %v7489_v23 = vld [vmem:[%s12621_s19 + $0x10] sm:$0xff] }
 0x41a   : > { %10174 = vmatprep.subr.mxu1 %v10796_v6 }
 0x41b   : > { %10175 = vmatpush3.msra.mxu1 %v7221_v24  ;;  %v7488_v24 = vld [vmem:[%s12621_s19 + $0x8] sm:$0xff] }
 0x41c   : > { %10176 = vmatprep.subr.mxu1 %v10796_v6 }
 0x41d   : > { %10177 = vmatpush3.msra.mxu1 %v7220_v56  ;;  %v7487_v56 = vld [vmem:[%s12621_s19] sm:$0xff] }
 0x41e   : > { %10208 = vmatprep.subr.mxu1 %v10796_v6 }
 0x49f   : > { %v6897_v26 = vpop.f32.mrf.mxu0 }
 0x4a0   : > { %v6898_v0 = vadd.f32 %v9177_v25, %v6897_v26  ;;  %v7587_v25 = vld [vmem:[%s12623_s21 + $0x28] sm:$0xff]  ;;  %v7586_v26 = vld [vmem:[%s12623_s21 + $0x20] sm:$0xff] }
 0x4a1   : > { %v10064_v28 = vpop.f32.mrf.mxu0 }
 0x4a2   : > { %vm6901_vm5 = vcmp.gt.f32.partialorder %v6898_v0, 0.0  ;;  %v6902_v30 = vmul.f32 0.1, %v6898_v0 }
 0x4a4   : > { %v6903_v33 = vsel %vm6901_vm5, %v6898_v0, %v6902_v30  ;;  %v7585_v0 = vld [vmem:[%s12623_s21 + $0x18] sm:$0xff] }
 0x4a5   : > { %v6994_v31 = vpop.f32.mrf.mxu1  ;;  %10179 = vmatmul.mubr.msk.f32.vlgmr.msra.gmra.mxu1 %vm6827_vm4, %v6903_v33 }
 0x4a6   : > { %v6995_v32 = vadd.f32 %v9179_v27, %v6994_v31  ;;  %10232 = vmatprep.mubr.msk.f32.mxu1 %vm10797_vm2, %v10796_v6  ;;  %10209 = vmatpush3.msra.mxu1 %v7498_v2 }
 0x4a7   : > { %v10099_v1 = vpop.f32.mrf.mxu1  ;;  %10210 = vmatprep.subr.mxu1 %v10796_v6 }
 0x4a8   : > { %vm6998_vm6 = vcmp.gt.f32.partialorder %v6995_v32, 0.0  ;;  %v6999_v49 = vmul.f32 0.1, %v6995_v32  ;;  %10211 = vmatpush3.msra.mxu1 %v7497_v19 }
 0x4a9   : > { %10212 = vmatprep.subr.mxu1 %v10796_v6 }
 0x4aa   : > { %v7000_v35 = vsel %vm6998_vm6, %v6995_v32, %v6999_v49  ;;  %10213 = vmatpush3.msra.mxu1 %v7496_v20  ;;  %v9187_v32 = vld [vmem:[%s12620_s18] ss:$0 sm:$0xff] }
 0x4ab   : > { %10125 = vmatmul.mubr.msk.f32.vlgmr.msra.gmra.mxu0 %vm6827_vm4, %v7000_v35  ;;  %10214 = vmatprep.subr.mxu1 %v10796_v6 }
 0x4ac   : > { %10128 = vmatpush3.msra.mxu0 %v7243_v34  ;;  %10151 = vmatprep.mubr.msk.f32.mxu0 %vm10797_vm2, %v10796_v6 }
 0x4ad   : > { %10129 = vmatprep.subr.mxu0 %v10796_v6  ;;  %10215 = vmatpush3.msra.mxu1 %v7495_v21 }
 0x4ae   : > { %10130 = vmatpush3.msra.mxu0 %v7242_v36  ;;  %10216 = vmatprep.subr.mxu1 %v10796_v6  ;;  %v7584_v36 = vld [vmem:[%s12623_s21 + $0x10] sm:$0xff] }
 0x4af   : > { %10131 = vmatprep.subr.mxu0 %v10796_v6  ;;  %10217 = vmatpush3.msra.mxu1 %v7494_v22 }
 0x4b0   : > { %10132 = vmatpush3.msra.mxu0 %v7241_v37  ;;  %10218 = vmatprep.subr.mxu1 %v10796_v6  ;;  %v7583_v37 = vld [vmem:[%s12623_s21 + $0x8] sm:$0xff] }
 0x4b1   : > { %10133 = vmatprep.subr.mxu0 %v10796_v6  ;;  %10219 = vmatpush3.msra.mxu1 %v7493_v8 }
 0x4b2   : > { %10134 = vmatpush3.msra.mxu0 %v7240_v39  ;;  %10220 = vmatprep.subr.mxu1 %v10796_v6  ;;  %v7582_v39 = vld [vmem:[%s12623_s21] sm:$0xff] }
 0x4b3   : > { %10135 = vmatprep.subr.mxu0 %v10796_v6  ;;  %10221 = vmatpush3.msra.mxu1 %v7492_v59 }
 0x4b4   : > { %10136 = vmatpush3.msra.mxu0 %v7239_v41  ;;  %10222 = vmatprep.subr.mxu1 %v10796_v6  ;;  %v9188_v41 = vld [vmem:[%s12622_s20] ss:$0 sm:$0xff] }
 0x4b5   : > { %10137 = vmatprep.subr.mxu0 %v10796_v6  ;;  %10223 = vmatpush3.msra.mxu1 %v7491_v3 }
 0x4b6   : > { %10138 = vmatpush3.msra.mxu0 %v7238_v47  ;;  %10224 = vmatprep.subr.mxu1 %v10796_v6 }
 0x4b7   : > { %10139 = vmatprep.subr.mxu0 %v10796_v6  ;;  %10225 = vmatpush3.msra.mxu1 %v7490_v11 }
 0x4b8   : > { %10140 = vmatpush3.msra.mxu0 %v7237_v60  ;;  %10226 = vmatprep.subr.mxu1 %v10796_v6 }
 0x4b9   : > { %10141 = vmatprep.subr.mxu0 %v10796_v6  ;;  %10227 = vmatpush3.msra.mxu1 %v7489_v23 }
 0x4ba   : > { %10142 = vmatpush3.msra.mxu0 %v7236_v48  ;;  %10228 = vmatprep.subr.mxu1 %v10796_v6 }
 0x4bb   : > { %10143 = vmatprep.subr.mxu0 %v10796_v6  ;;  %10229 = vmatpush3.msra.mxu1 %v7488_v24 }
 0x4bc   : > { %10144 = vmatpush3.msra.mxu0 %v7235_v50  ;;  %10230 = vmatprep.subr.mxu1 %v10796_v6 }
 0x4bd   : > { %10145 = vmatprep.subr.mxu0 %v10796_v6  ;;  %10231 = vmatpush3.msra.mxu1 %v7487_v56 }
 0x4be   : > { %10146 = vmatpush3.msra.mxu0 %v7234_v51 }
 0x4bf   : > { %10147 = vmatprep.subr.mxu0 %v10796_v6 }
 0x4c0   : > { %10148 = vmatpush3.msra.mxu0 %v7233_v61  ;;  %v9190_v61 = vld [vmem:[#allocation3] ss:$0 sm:$0xff] }
 0x4c1   : > { %10149 = vmatprep.subr.mxu0 %v10796_v6 }
 0x4c2   : > { %10150 = vmatpush3.msra.mxu0 %v7232_v53 }
 0x4c3   : > { %10181 = vmatprep.subr.mxu0 %v10796_v6 }
 0x4c6   : > { %v9976_v45 = vpop.f32.mrf.mxu1 }
 0x4c8   : > { %v9977_v38 = vpop.f32.mrf.mxu1 }
 0x4c9   : > { %v9978_v12 = vadd.f32 %v9977_v38, %v9976_v45 }
 0x4cb   : > { %v7214_v14 = vadd.f32 %v9978_v12, %v9182_v29 }
 0x4cd   : > { %v7218_v16 = vmul.f32 0.1, %v7214_v14  ;;  %vm7217_vm8 = vcmp.gt.f32.partialorder %v7214_v14, 0.0 }
 0x4cf   : > { %v7219_v18 = vsel %vm7217_vm8, %v7214_v14, %v7218_v16 }
 0x565   : > { %v12456_v42 = vpop.f32.mrf.mxu1 }
 0x567   : > { %v10180_v46 = vpop.f32.mrf.mxu1 }
 0x56b   : > { %v7089_v63 = vpop.f32.mrf.mxu0 }
 0x56c   : > { %v7090_v55 = vadd.f32 %v9180_v40, %v7089_v63 }
 0x56d   : > { %v10126_v58 = vpop.f32.mrf.mxu0 }
 0x56e   : > { %vm7093_vm7 = vcmp.gt.f32.partialorder %v7090_v55, 0.0  ;;  %v7094_v62 = vmul.f32 0.1, %v7090_v55 }
 0x570   : > { %v7095_v5 = vsel %vm7093_vm7, %v7090_v55, %v7094_v62 }
 0x571   : > { %10152 = vmatmul.mubr.msk.f32.vlgmr.msra.gmra.mxu0 %vm6827_vm4, %v7095_v5 }
 0x572   : > { %10182 = vmatpush3.msra.mxu0 %v7401_v4  ;;  %10205 = vmatprep.mubr.msk.f32.mxu0 %vm10797_vm2, %v10796_v6 }
 0x573   : > { %10183 = vmatprep.subr.mxu0 %v10796_v6 }
 0x574   : > { %10184 = vmatpush3.msra.mxu0 %v7400_v7 }
 0x575   : > { %10185 = vmatprep.subr.mxu0 %v10796_v6 }
 0x576   : > { %10186 = vmatpush3.msra.mxu0 %v7399_v52 }
 0x577   : > { %10187 = vmatprep.subr.mxu0 %v10796_v6 }
 0x578   : > { %10188 = vmatpush3.msra.mxu0 %v7398_v9 }
 0x579   : > { %10189 = vmatprep.subr.mxu0 %v10796_v6 }
 0x57a   : > { %10190 = vmatpush3.msra.mxu0 %v7397_v43 }
 0x57b   : > { %10191 = vmatprep.subr.mxu0 %v10796_v6 }
 0x57c   : > { %10192 = vmatpush3.msra.mxu0 %v7396_v10 }
 0x57d   : > { %10193 = vmatprep.subr.mxu0 %v10796_v6 }
 0x57e   : > { %10194 = vmatpush3.msra.mxu0 %v7395_v57 }
 0x57f   : > { %10195 = vmatprep.subr.mxu0 %v10796_v6 }
 0x580   : > { %10196 = vmatpush3.msra.mxu0 %v7394_v44 }
 0x581   : > { %10197 = vmatprep.subr.mxu0 %v10796_v6 }
 0x582   : > { %10198 = vmatpush3.msra.mxu0 %v7393_v13 }
 0x583   : > { %10199 = vmatprep.subr.mxu0 %v10796_v6 }
 0x584   : > { %10200 = vmatpush3.msra.mxu0 %v7392_v54 }
 0x585   : > { %10201 = vmatprep.subr.mxu0 %v10796_v6 }
 0x586   : > { %10202 = vmatpush3.msra.mxu0 %v7391_v15 }
 0x587   : > { %10203 = vmatprep.subr.mxu0 %v10796_v6 }
 0x588   : > { %10204 = vmatpush3.msra.mxu0 %v7390_v17 }
 0x589   : > { %10206 = vmatmul.mubr.msk.f32.vlgmr.msra.gmra.mxu0 %vm6827_vm4, %v7219_v18  ;;  %10235 = vmatprep.subr.mxu0 %v10796_v6 }
 0x58a   : > { %10247 = vmatprep.mubr.msk.f32.mxu0 %vm10797_vm2, %v10796_v6  ;;  %10236 = vmatpush3.msra.mxu0 %v7587_v25 }
 0x58b   : > { %10237 = vmatprep.subr.mxu0 %v10796_v6 }
 0x58c   : > { %10238 = vmatpush3.msra.mxu0 %v7586_v26 }
 0x58d   : > { %10239 = vmatprep.subr.mxu0 %v10796_v6 }
 0x58e   : > { %10240 = vmatpush3.msra.mxu0 %v7585_v0 }
 0x58f   : > { %10241 = vmatprep.subr.mxu0 %v10796_v6 }
 0x590   : > { %10242 = vmatpush3.msra.mxu0 %v7584_v36 }
 0x591   : > { %10243 = vmatprep.subr.mxu0 %v10796_v6 }
 0x592   : > { %10244 = vmatpush3.msra.mxu0 %v7583_v37 }
 0x593   : > { %10245 = vmatprep.subr.mxu0 %v10796_v6 }
 0x594   : > { %10246 = vmatpush3.msra.mxu0 %v7582_v39 }
 0x631   : > { %v7313_v27 = vpop.f32.mrf.mxu0 }
 0x632   : > { %v7387_v30 = vadd.f32 %v12456_v42, %v7313_v27 }
 0x633   : > { %v10153_v28 = vpop.f32.mrf.mxu0 }
 0x649   : > { %v7471_v31 = vpop.f32.mrf.mxu0 }
 0x64a   : > { %v7475_v33 = vadd.f32 %v7471_v31, %v7387_v30 }
 0x64b   : > { %v10207_v1 = vpop.f32.mrf.mxu0 }
 0x64c   : > { %v7483_v49 = vadd.f32 %v9187_v32, %v7475_v33 }
 0x64e   : > { %vm7484_vm9 = vcmp.gt.f32.partialorder %v7483_v49, 0.0  ;;  %v7485_v34 = vmul.f32 0.1, %v7483_v49 }
 0x650   : > { %v7486_v35 = vsel %vm7484_vm9, %v7483_v49, %v7485_v34 }
 0x651   : > { %10233 = vmatmul.mubr.msk.f32.vlgmr.msra.gmra.mxu1 %vm6827_vm4, %v7486_v35 }
 0x711   : > { %v7575_v47 = vpop.f32.mrf.mxu1 }
 0x712   : > { %v7576_v60 = vadd.f32 %v9188_v41, %v7575_v47 }
 0x713   : > { %v10234_v48 = vpop.f32.mrf.mxu1 }
 0x714   : > { %vm7579_vm10 = vcmp.gt.f32.partialorder %v7576_v60, 0.0  ;;  %v7580_v50 = vmul.f32 0.1, %v7576_v60 }
 0x716   : > { %v7581_v51 = vsel %vm7579_vm10, %v7576_v60, %v7580_v50 }
 0x717   : > { %10248 = vmatmul.mubr.msk.f32.vlgmr.msra.gmra.mxu0 %vm7595_vm11, %v7581_v51 }
 0x7d7   : > { %v7665_v53 = vpop.f32.mrf.mxu0 }
 0x7d8   : > { %v7666_v6 = vadd.f32 %v9190_v61, %v7665_v53 }
 0x7d9   : > { %v10249_v45 = vpop.f32.mrf.mxu0 }
 0x7da   : > { %v9192_v38 = vmul.f32 -1.442695, %v7666_v6 }
 0x7dc   : > { %10782 = vpow2.f32 %v9192_v38 }
 0x7e9   : > { %v10783_v42 = vpop.eup %10782 }
 0x7ea   : > { %v7672_v40 = vadd.f32 1.0, %v10783_v42 }
 0x7ec   : > { %10784 = vrcp.f32 %v7672_v40 }
 0x7f9   : > { %v10785_v46 = vpop.eup %10784 }
 0x7fa   : > { %7676 = vst.msk [vmem:[%s12651_s26] sm:$0x3] %vm7675_vm12, %v10785_v46 }
 0x7fb PF: > { %s12652_s2 = sld [smem:[#allocation4_spill]] }
 0x801   : > { %s37_s27 = sadd.s32 1, %s12652_s2  }
 0x802   : > { %p34_p7 = scmp.ge.s32.totalorder %s37_s27, 4  }
 0x804   :  { %36 = sbr.rel (!%p34_p7) target bundleno = 11 (0xb), region = 168 }

</bundles_post_ra>
